<compile_context>
chip_gen: v5e
topology: v5e:2x2
jax: 0.10.0
libtpu: 0.0.40
codegen_flags: <defaults>
</compile_context>

<pallas_src>
import functools

import jax
import jax.numpy as jnp
from jax import lax
from jax.experimental import pallas as pl
from jax.experimental.pallas import tpu as pltpu


def _gru_step(gi, gh, h, W, b_hn):
    """PyTorch GRU cell (gate order r, z, n) on W-wide (possibly fused) gates.

    gi holds input-projection + b_ih (all gates) + b_hh (r,z); the n-gate
    hidden bias b_hn stays separate because it is scaled by r.
    """
    rz = jax.nn.sigmoid(gi[:, 0:2 * W] + gh[:, 0:2 * W])   # one wide EUP pass
    r = rz[:, 0:W]
    z = rz[:, W:2 * W]
    n = jnp.tanh(gi[:, 2 * W:3 * W] + r * (gh[:, 2 * W:3 * W] + b_hn))
    return (1.0 - z) * n + z * h


def seq2seq_kernel(
    # activations (flattened time-major: row = t * Bp + b)
    src_ref, trg_ref,
    # fused encoder GRU (gate layout [r_f r_b | z_f z_b | n_f n_b])
    wih_ref, whh_ref, bie_ref, bhne_ref,
    # encoder fc
    wfc_ref, bfc_ref,
    # fused [attn-query | decoder W_hh], enc-side attn weight, v
    wscat_ref, wae_ref, v_ref,
    # decoder trg projection ([GRU x-part | fc_out x-part]), context weight, n-bias
    wtrg_ref, btrg_ref, wdc_ref, bdhn_ref,
    # deferred fc_out head over [s | c], bias
    whc_ref, bo_ref,
    # outputs
    enc_out_ref, outputs_ref,
    # scratch
    gi_ref, txo_ref, ea_ref, sc_ref,
    *, S, T, Bp, He, Hd,
):
    f32 = jnp.float32
    mm = functools.partial(jnp.dot, preferred_element_type=f32)
    H2 = 2 * He

    # Hoisted batched projections (off the serial recurrences); stored to VMEM
    # scratch so they do not pin vregs across the loops.
    gi_ref[...] = mm(src_ref[...], wih_ref[...]) + bie_ref[...]       # (S*Bp, 6He)
    txo_ref[...] = mm(trg_ref[...], wtrg_ref[...]) + btrg_ref[...]    # (T*Bp, 3Hd+Dout)

    # -------- Encoder: fused fwd+bwd GRU, one block-diag MXU push per step ---
    h = jnp.zeros((Bp, H2), f32)
    for i in range(S):                                    # unrolled, static slices
        gi = gi_ref[i * Bp:(i + 1) * Bp, :]               # fwd@t=i | bwd@t=S-1-i
        gh = mm(h, whh_ref[...])
        h = _gru_step(gi, gh, h, H2, bhne_ref[...])
        enc_out_ref[i * Bp:(i + 1) * Bp, 0:He] = h[:, 0:He]        # fwd -> time i
        rb = S - 1 - i
        enc_out_ref[rb * Bp:(rb + 1) * Bp, He:H2] = h[:, He:H2]    # bwd -> time S-1-i

    # s0 = tanh(fc(cat(h_fwd_last, h_bwd_last))) -- h already has that layout.
    s = jnp.tanh(mm(h, wfc_ref[...]) + bfc_ref[...])      # (Bp, Hd)

    # enc_output @ W_attn_enc once for the whole decoder.
    ea_ref[...] = mm(enc_out_ref[...], wae_ref[...])      # (S*Bp, Hd)

    # In-kernel batch-selection / replication one-hots (no HBM constant DMA).
    eye = (lax.broadcasted_iota(jnp.int32, (Bp, Bp), 0)
           == lax.broadcasted_iota(jnp.int32, (Bp, Bp), 1)).astype(f32)
    gmat = jnp.tile(eye, (1, S))     # (Bp, S*Bp): per-batch sum over S positions
    rep = jnp.tile(eye, (S, 1))      # (S*Bp, Bp): replicate a (Bp, .) block S times

    # -------- Decoder (dec_input == trg[t-1]; teacher forcing is a no-op) ----
    for t in range(1, T):
        # Fused query / hidden projection: one lane-dense (Bp, 4Hd) MXU push.
        sg = mm(s, wscat_ref[...])
        sa = sg[:, 0:Hd]
        gh = sg[:, Hd:4 * Hd]

        # Bahdanau attention with per-batch max (numerically robust softmax).
        energy = jnp.tanh(ea_ref[...] + mm(rep, sa))       # (S*Bp, Hd)
        score = jnp.sum(energy * v_ref[...], axis=-1, keepdims=True)  # (S*Bp, 1)
        m = score[0:Bp]
        for u in range(1, S):                              # per-batch max over S
            m = jnp.maximum(m, score[u * Bp:(u + 1) * Bp])
        p = jnp.exp(score - jnp.tile(m, (S, 1)))           # (S*Bp, 1)
        enc = enc_out_ref[...]
        num = mm(gmat, p * enc)                            # (Bp, 2He) sum_t p_t*enc_t
        den = mm(gmat, p)                                  # (Bp, 1)   sum_t p_t
        c = num / den                                      # exact softmax context

        # Decoder GRU cell on cat(x, c); the x-projection lives in txo_ref.
        gi = txo_ref[(t - 1) * Bp:t * Bp, 0:3 * Hd] + mm(c, wdc_ref[...])
        s = _gru_step(gi, gh, s, Hd, bdhn_ref[...])

        # Per-step [s | c] store for the deferred output head.
        sc_ref[(t - 1) * Bp:t * Bp, 0:Hd] = s
        sc_ref[(t - 1) * Bp:t * Bp, Hd:] = c

    # Deferred output head: one batched fc_out; outputs[0] stays zero.
    preds = (mm(sc_ref[...], whc_ref[...])
             + txo_ref[0:(T - 1) * Bp, 3 * Hd:] + bo_ref[...])
    outputs_ref[0:Bp, :] = jnp.zeros((Bp, preds.shape[-1]), f32)
    outputs_ref[Bp:, :] = preds


def init_params(key, Din, Dout, He, Hd):
    """Deterministic parameters in PyTorch shapes, rearranged for the kernel."""
    def u(k, shape, scale):
        return jax.random.uniform(k, shape, jnp.float32, -scale, scale)

    ks = iter(jax.random.split(key, 32))
    se = 1.0 / float(He) ** 0.5
    sd = 1.0 / float(Hd) ** 0.5

    # Raw PyTorch-shaped parameters.
    w_ih_f = u(next(ks), (3 * He, Din), se); w_hh_f = u(next(ks), (3 * He, He), se)
    b_ih_f = u(next(ks), (3 * He,), se);     b_hh_f = u(next(ks), (3 * He,), se)
    w_ih_b = u(next(ks), (3 * He, Din), se); w_hh_b = u(next(ks), (3 * He, He), se)
    b_ih_b = u(next(ks), (3 * He,), se);     b_hh_b = u(next(ks), (3 * He,), se)
    w_fc = u(next(ks), (Hd, 2 * He), sd);    b_fc = u(next(ks), (Hd,), sd)
    w_attn = u(next(ks), (Hd, Hd + 2 * He), sd)        # Linear(Hd+2He, Hd, bias=False)
    v_w = u(next(ks), (1, Hd), sd)                      # Linear(Hd, 1, bias=False)
    w_dih = u(next(ks), (3 * Hd, Dout + 2 * He), sd)    # decoder GRU input = cat(x, c)
    w_dhh = u(next(ks), (3 * Hd, Hd), sd)
    b_dih = u(next(ks), (3 * Hd,), sd);      b_dhh = u(next(ks), (3 * Hd,), sd)
    w_out = u(next(ks), (Dout, Hd + 2 * He + Dout), sd)  # fc_out on cat(h, c, x)
    b_out = u(next(ks), (Dout,), sd)

    def split_gates(w_t, H):     # (in, 3H) -> r, z, n each (in, H)
        return w_t[:, 0:H], w_t[:, H:2 * H], w_t[:, 2 * H:3 * H]

    # ---- Fused bidirectional encoder, gate layout [r_f r_b | z_f z_b | n_f n_b].
    wf_r, wf_z, wf_n = split_gates(w_ih_f.T, He)
    wb_r, wb_z, wb_n = split_gates(w_ih_b.T, He)
    zi = jnp.zeros((Din, He), jnp.float32)
    w_ih_enc = jnp.concatenate([
        jnp.concatenate([wf_r, zi, wf_z, zi, wf_n, zi], axis=1),   # rows: fwd src
        jnp.concatenate([zi, wb_r, zi, wb_z, zi, wb_n], axis=1),   # rows: reversed src
    ], axis=0)                                                     # (2Din, 6He)

    hf_r, hf_z, hf_n = split_gates(w_hh_f.T, He)
    hb_r, hb_z, hb_n = split_gates(w_hh_b.T, He)
    zh = jnp.zeros((He, He), jnp.float32)
    w_hh_enc = jnp.concatenate([
        jnp.concatenate([hf_r, zh, hf_z, zh, hf_n, zh], axis=1),   # rows: h_f
        jnp.concatenate([zh, hb_r, zh, hb_z, zh, hb_n], axis=1),   # rows: h_b
    ], axis=0)                                                     # (2He, 6He)

    def gate_bias(b_ih, b_hh, H):
        # r,z: input+hidden biases folded; n: input bias only (hidden n-bias
        # is kept separate since it is scaled by r inside the cell).
        return (b_ih[0:H] + b_hh[0:H], b_ih[H:2 * H] + b_hh[H:2 * H],
                b_ih[2 * H:3 * H], b_hh[2 * H:3 * H])

    bf_r, bf_z, bf_n, bf_hn = gate_bias(b_ih_f, b_hh_f, He)
    bb_r, bb_z, bb_n, bb_hn = gate_bias(b_ih_b, b_hh_b, He)
    b_i_enc = jnp.concatenate([bf_r, bb_r, bf_z, bb_z, bf_n, bb_n])[None, :]  # (1, 6He)
    b_hn_enc = jnp.concatenate([bf_hn, bb_hn])[None, :]                        # (1, 2He)

    # ---- Encoder fc (input order cat(h_f, h_b) matches the fused h layout).
    w_fc_t = w_fc.T                       # (2He, Hd)
    b_fc_r = b_fc[None, :]

    # ---- Attention + decoder-hidden fused weight, enc-side attention weight.
    w_attn_t = w_attn.T                   # (Hd + 2He, Hd); rows 0:Hd act on s
    w_s_cat = jnp.concatenate([w_attn_t[:Hd], w_dhh.T], axis=1)     # (Hd, 4Hd)
    w_ae = w_attn_t[Hd:]                  # (2He, Hd)

    # ---- Decoder trg projection: [GRU x-part | fc_out x-part], fused bias.
    w_dih_t = w_dih.T                     # (Dout + 2He, 3Hd)
    w_out_t = w_out.T                     # (Hd + 2He + Dout, Dout)
    w_trg = jnp.concatenate([w_dih_t[:Dout], w_out_t[Hd + 2 * He:]], axis=1)
    bd_r, bd_z, bd_n, bd_hn = gate_bias(b_dih, b_dhh, Hd)
    b_trg = jnp.concatenate(
        [bd_r, bd_z, bd_n, jnp.zeros((Dout,), jnp.float32)])[None, :]
    w_dc = w_dih_t[Dout:]                 # (2He, 3Hd) context part of GRU input
    b_dhn = bd_hn[None, :]                # (1, Hd)
    w_hc = w_out_t[:Hd + 2 * He]          # (Hd + 2He, Dout) head over [s | c]
    b_o = b_out[None, :]

    return [w_ih_enc, w_hh_enc, b_i_enc, b_hn_enc, w_fc_t, b_fc_r,
            w_s_cat, w_ae, v_w, w_trg, b_trg, w_dc, b_dhn, w_hc, b_o]


def seq2seq_forward(src, trg, params, He, Hd):
    S, B, Din = src.shape
    T, _, Dout = trg.shape

    # Pad batch to a multiple of 8 sublanes: aligned slices, no padding waste.
    Bp = ((B + 7) // 8) * 8
    if Bp != B:
        src = jnp.pad(src, ((0, 0), (0, Bp - B), (0, 0)))
        trg = jnp.pad(trg, ((0, 0), (0, Bp - B), (0, 0)))

    # Forward-time and reversed-time copies side by side so the fused
    # bidirectional encoder loop reads one aligned row block per step.
    src_cat = jnp.concatenate([src, src[::-1]], axis=-1).reshape(S * Bp, 2 * Din)
    trg2 = trg.reshape(T * Bp, Dout)            # row = t * Bp + b

    kernel_inputs = (src_cat, trg2, *params)
    vmem = pl.BlockSpec(memory_space=pltpu.MemorySpace.VMEM)

    out_shape = (
        jax.ShapeDtypeStruct((S * Bp, 2 * He), jnp.float32),   # enc_output (flat)
        jax.ShapeDtypeStruct((T * Bp, Dout), jnp.float32),     # outputs (flat)
    )
    # TODO(synk): for real MERBench batch sizes, add a leading grid axis over
    # batch chunks with dimension_semantics=("parallel",) (2 TCs on v7x) and
    # size the per-block footprint well under the 64 MiB v7x VMEM; at this toy
    # size a single VMEM-resident invocation is latency-optimal.
    enc_flat, out_flat = pl.pallas_call(
        functools.partial(seq2seq_kernel, S=S, T=T, Bp=Bp, He=He, Hd=Hd),
        out_shape=out_shape,
        in_specs=[vmem] * len(kernel_inputs),
        out_specs=(vmem, vmem),
        scratch_shapes=[
            pltpu.VMEM((S * Bp, 6 * He), jnp.float32),            # fused enc input-proj
            pltpu.VMEM((T * Bp, 3 * Hd + Dout), jnp.float32),     # fused trg projections
            pltpu.VMEM((S * Bp, Hd), jnp.float32),                # enc_output @ W_attn_enc
            pltpu.VMEM(((T - 1) * Bp, Hd + 2 * He), jnp.float32), # per-step [s | c]
        ],
        compiler_params=pltpu.CompilerParams(vmem_limit_bytes=32 * 1024 * 1024),
    )(*kernel_inputs)

    enc_output = enc_flat.reshape(S, Bp, 2 * He)[:, :B]
    outputs = out_flat.reshape(T, Bp, Dout)[:, :B]
    return enc_output, outputs


if __name__ == "__main__":
    # TODO(synk): random teacher forcing is a no-op in the reference code
    # (both branches feed trg[t]); dropout is eval-mode identity; no RNG needed.
    S, T, B = 8, 6, 2
    Din, Dout, He, Hd = 16, 16, 32, 32

    key = jax.random.PRNGKey(0)
    k_src, k_trg, k_par = jax.random.split(key, 3)
    src = jax.random.normal(k_src, (S, B, Din), jnp.float32)    # [src_len, batch, feat]
    trg = jax.random.normal(k_trg, (T, B, Dout), jnp.float32)   # [trg_len, batch, feat]

    params = init_params(k_par, Din, Dout, He, Hd)

    enc_output, outputs = seq2seq_forward(src, trg, params, He, Hd)
    jax.block_until_ready((enc_output, outputs))

    assert enc_output.shape == (S, B, 2 * He)
    assert outputs.shape == (T, B, Dout)
    print("KERNEL_OK")
</pallas_src>

<mosaic_0001>
module attributes {stable_mosaic.version = 11 : i64} {
  func.func @seq2seq_kernel(%arg0: memref<64x32xf32, #tpu.memory_space<vmem>>, %arg1: memref<48x16xf32, #tpu.memory_space<vmem>>, %arg2: memref<32x192xf32, #tpu.memory_space<vmem>>, %arg3: memref<64x192xf32, #tpu.memory_space<vmem>>, %arg4: memref<1x192xf32, #tpu.memory_space<vmem>>, %arg5: memref<1x64xf32, #tpu.memory_space<vmem>>, %arg6: memref<64x32xf32, #tpu.memory_space<vmem>>, %arg7: memref<1x32xf32, #tpu.memory_space<vmem>>, %arg8: memref<32x128xf32, #tpu.memory_space<vmem>>, %arg9: memref<64x32xf32, #tpu.memory_space<vmem>>, %arg10: memref<1x32xf32, #tpu.memory_space<vmem>>, %arg11: memref<16x112xf32, #tpu.memory_space<vmem>>, %arg12: memref<1x112xf32, #tpu.memory_space<vmem>>, %arg13: memref<64x96xf32, #tpu.memory_space<vmem>>, %arg14: memref<1x32xf32, #tpu.memory_space<vmem>>, %arg15: memref<96x16xf32, #tpu.memory_space<vmem>>, %arg16: memref<1x16xf32, #tpu.memory_space<vmem>>, %arg17: memref<64x64xf32, #tpu.memory_space<vmem>>, %arg18: memref<48x16xf32, #tpu.memory_space<vmem>>, %arg19: memref<64x192xf32, #tpu.memory_space<vmem>>, %arg20: memref<48x112xf32, #tpu.memory_space<vmem>>, %arg21: memref<64x32xf32, #tpu.memory_space<vmem>>, %arg22: memref<40x96xf32, #tpu.memory_space<vmem>>) attributes {dimension_semantics = [], scalar_prefetch = 0 : i64, scratch_operands = 4 : i64, tpu.core_type = #tpu.core_type<tc>} {
    %c0 = arith.constant 0 : index
    %c0_0 = arith.constant 0 : index
    %0 = vector.load %arg0[%c0, %c0_0] : memref<64x32xf32, #tpu.memory_space<vmem>>, vector<64x32xf32>
    %c0_1 = arith.constant 0 : index
    %c0_2 = arith.constant 0 : index
    %1 = vector.load %arg2[%c0_1, %c0_2] : memref<32x192xf32, #tpu.memory_space<vmem>>, vector<32x192xf32>
    %cst = arith.constant dense<0.000000e+00> : vector<64x192xf32>
    %2 = tpu.matmul %0, %1, %cst {dimension_numbers = #tpu.dot_dimension_numbers<[1], [0], [0], [1], [0, 0, 1, 1], [], []>} : vector<64x32xf32>, vector<32x192xf32>, vector<64x192xf32> -> vector<64x192xf32>
    %c0_3 = arith.constant 0 : index
    %c0_4 = arith.constant 0 : index
    %3 = vector.load %arg4[%c0_3, %c0_4] : memref<1x192xf32, #tpu.memory_space<vmem>>, vector<1x192xf32>
    %4 = vector.broadcast %3 : vector<1x192xf32> to vector<64x192xf32>
    %5 = arith.addf %2, %4 : vector<64x192xf32>
    %c0_5 = arith.constant 0 : index
    %c0_6 = arith.constant 0 : index
    %6 = vector.load %arg19[%c0_5, %c0_6] : memref<64x192xf32, #tpu.memory_space<vmem>>, vector<64x192xf32>
    tpu.vector_store %arg19[%c0_5, %c0_6], %5 {strides = array<i32>} : memref<64x192xf32, #tpu.memory_space<vmem>>, vector<64x192xf32>,
    %c0_7 = arith.constant 0 : index
    %c0_8 = arith.constant 0 : index
    %7 = vector.load %arg1[%c0_7, %c0_8] : memref<48x16xf32, #tpu.memory_space<vmem>>, vector<48x16xf32>
    %c0_9 = arith.constant 0 : index
    %c0_10 = arith.constant 0 : index
    %8 = vector.load %arg11[%c0_9, %c0_10] : memref<16x112xf32, #tpu.memory_space<vmem>>, vector<16x112xf32>
    %cst_11 = arith.constant dense<0.000000e+00> : vector<48x112xf32>
    %9 = tpu.matmul %7, %8, %cst_11 {dimension_numbers = #tpu.dot_dimension_numbers<[1], [0], [0], [1], [0, 0, 1, 1], [], []>} : vector<48x16xf32>, vector<16x112xf32>, vector<48x112xf32> -> vector<48x112xf32>
    %c0_12 = arith.constant 0 : index
    %c0_13 = arith.constant 0 : index
    %10 = vector.load %arg12[%c0_12, %c0_13] : memref<1x112xf32, #tpu.memory_space<vmem>>, vector<1x112xf32>
    %11 = vector.broadcast %10 : vector<1x112xf32> to vector<48x112xf32>
    %12 = arith.addf %9, %11 : vector<48x112xf32>
    %c0_14 = arith.constant 0 : index
    %c0_15 = arith.constant 0 : index
    %13 = vector.load %arg20[%c0_14, %c0_15] : memref<48x112xf32, #tpu.memory_space<vmem>>, vector<48x112xf32>
    tpu.vector_store %arg20[%c0_14, %c0_15], %12 {strides = array<i32>} : memref<48x112xf32, #tpu.memory_space<vmem>>, vector<48x112xf32>,
    %cst_16 = arith.constant 0.000000e+00 : f32
    %14 = vector.broadcast %cst_16 : f32 to vector<8x64xf32>
    %c0_17 = arith.constant 0 : index
    %c0_18 = arith.constant 0 : index
    %15 = vector.load %arg19[%c0_17, %c0_18] : memref<64x192xf32, #tpu.memory_space<vmem>>, vector<8x192xf32>
    %c0_19 = arith.constant 0 : index
    %c0_20 = arith.constant 0 : index
    %16 = vector.load %arg3[%c0_19, %c0_20] : memref<64x192xf32, #tpu.memory_space<vmem>>, vector<64x192xf32>
    %cst_21 = arith.constant dense<0.000000e+00> : vector<8x192xf32>
    %17 = tpu.matmul %14, %16, %cst_21 {dimension_numbers = #tpu.dot_dimension_numbers<[1], [0], [0], [1], [0, 0, 1, 1], [], []>} : vector<8x64xf32>, vector<64x192xf32>, vector<8x192xf32> -> vector<8x192xf32>
    %c0_22 = arith.constant 0 : index
    %c0_23 = arith.constant 0 : index
    %18 = vector.load %arg5[%c0_22, %c0_23] : memref<1x64xf32, #tpu.memory_space<vmem>>, vector<1x64xf32>
    %19 = vector.extract_strided_slice %15 {offsets = [0, 0], sizes = [8, 128], strides = [1, 1]} : vector<8x192xf32> to vector<8x128xf32>
    %20 = vector.extract_strided_slice %17 {offsets = [0, 0], sizes = [8, 128], strides = [1, 1]} : vector<8x192xf32> to vector<8x128xf32>
    %21 = arith.addf %19, %20 : vector<8x128xf32>
    %22 = arith.negf %21 : vector<8x128xf32>
    %23 = math.exp %22 : vector<8x128xf32>
    %cst_24 = arith.constant 1.000000e+00 : f32
    %24 = vector.broadcast %cst_24 : f32 to vector<8x128xf32>
    %25 = arith.addf %24, %23 : vector<8x128xf32>
    %26 = arith.divf %24, %25 : vector<8x128xf32>
    %27 = vector.extract_strided_slice %26 {offsets = [0, 0], sizes = [8, 64], strides = [1, 1]} : vector<8x128xf32> to vector<8x64xf32>
    %28 = vector.extract_strided_slice %26 {offsets = [0, 64], sizes = [8, 64], strides = [1, 1]} : vector<8x128xf32> to vector<8x64xf32>
    %29 = vector.extract_strided_slice %15 {offsets = [0, 128], sizes = [8, 64], strides = [1, 1]} : vector<8x192xf32> to vector<8x64xf32>
    %30 = vector.extract_strided_slice %17 {offsets = [0, 128], sizes = [8, 64], strides = [1, 1]} : vector<8x192xf32> to vector<8x64xf32>
    %31 = vector.broadcast %18 : vector<1x64xf32> to vector<8x64xf32>
    %32 = arith.addf %30, %31 : vector<8x64xf32>
    %33 = arith.mulf %27, %32 : vector<8x64xf32>
    %34 = arith.addf %29, %33 : vector<8x64xf32>
    %35 = math.tanh %34 : vector<8x64xf32>
    %cst_25 = arith.constant 1.000000e+00 : f32
    %36 = vector.broadcast %cst_25 : f32 to vector<8x64xf32>
    %37 = arith.subf %36, %28 : vector<8x64xf32>
    %38 = arith.mulf %37, %35 : vector<8x64xf32>
    %39 = arith.mulf %28, %14 : vector<8x64xf32>
    %40 = arith.addf %38, %39 : vector<8x64xf32>
    %41 = vector.extract_strided_slice %40 {offsets = [0, 0], sizes = [8, 32], strides = [1, 1]} : vector<8x64xf32> to vector<8x32xf32>
    %c0_26 = arith.constant 0 : index
    %c0_27 = arith.constant 0 : index
    %42 = vector.load %arg17[%c0_26, %c0_27] : memref<64x64xf32, #tpu.memory_space<vmem>>, vector<8x32xf32>
    tpu.vector_store %arg17[%c0_26, %c0_27], %41 {strides = array<i32>} : memref<64x64xf32, #tpu.memory_space<vmem>>, vector<8x32xf32>,
    %43 = vector.extract_strided_slice %40 {offsets = [0, 32], sizes = [8, 32], strides = [1, 1]} : vector<8x64xf32> to vector<8x32xf32>
    %c56 = arith.constant 56 : index
    %c32 = arith.constant 32 : index
    %44 = vector.load %arg17[%c56, %c32] : memref<64x64xf32, #tpu.memory_space<vmem>>, vector<8x32xf32>
    tpu.vector_store %arg17[%c56, %c32], %43 {strides = array<i32>} : memref<64x64xf32, #tpu.memory_space<vmem>>, vector<8x32xf32>,
    %c8 = arith.constant 8 : index
    %c0_28 = arith.constant 0 : index
    %45 = vector.load %arg19[%c8, %c0_28] : memref<64x192xf32, #tpu.memory_space<vmem>>, vector<8x192xf32>
    %c0_29 = arith.constant 0 : index
    %c0_30 = arith.constant 0 : index
    %46 = vector.load %arg3[%c0_29, %c0_30] : memref<64x192xf32, #tpu.memory_space<vmem>>, vector<64x192xf32>
    %cst_31 = arith.constant dense<0.000000e+00> : vector<8x192xf32>
    %47 = tpu.matmul %40, %46, %cst_31 {dimension_numbers = #tpu.dot_dimension_numbers<[1], [0], [0], [1], [0, 0, 1, 1], [], []>} : vector<8x64xf32>, vector<64x192xf32>, vector<8x192xf32> -> vector<8x192xf32>
    %c0_32 = arith.constant 0 : index
    %c0_33 = arith.constant 0 : index
    %48 = vector.load %arg5[%c0_32, %c0_33] : memref<1x64xf32, #tpu.memory_space<vmem>>, vector<1x64xf32>
    %49 = vector.extract_strided_slice %45 {offsets = [0, 0], sizes = [8, 128], strides = [1, 1]} : vector<8x192xf32> to vector<8x128xf32>
    %50 = vector.extract_strided_slice %47 {offsets = [0, 0], sizes = [8, 128], strides = [1, 1]} : vector<8x192xf32> to vector<8x128xf32>
    %51 = arith.addf %49, %50 : vector<8x128xf32>
    %52 = arith.negf %51 : vector<8x128xf32>
    %53 = math.exp %52 : vector<8x128xf32>
    %cst_34 = arith.constant 1.000000e+00 : f32
    %54 = vector.broadcast %cst_34 : f32 to vector<8x128xf32>
    %55 = arith.addf %54, %53 : vector<8x128xf32>
    %56 = arith.divf %54, %55 : vector<8x128xf32>
    %57 = vector.extract_strided_slice %56 {offsets = [0, 0], sizes = [8, 64], strides = [1, 1]} : vector<8x128xf32> to vector<8x64xf32>
    %58 = vector.extract_strided_slice %56 {offsets = [0, 64], sizes = [8, 64], strides = [1, 1]} : vector<8x128xf32> to vector<8x64xf32>
    %59 = vector.extract_strided_slice %45 {offsets = [0, 128], sizes = [8, 64], strides = [1, 1]} : vector<8x192xf32> to vector<8x64xf32>
    %60 = vector.extract_strided_slice %47 {offsets = [0, 128], sizes = [8, 64], strides = [1, 1]} : vector<8x192xf32> to vector<8x64xf32>
    %61 = vector.broadcast %48 : vector<1x64xf32> to vector<8x64xf32>
    %62 = arith.addf %60, %61 : vector<8x64xf32>
    %63 = arith.mulf %57, %62 : vector<8x64xf32>
    %64 = arith.addf %59, %63 : vector<8x64xf32>
    %65 = math.tanh %64 : vector<8x64xf32>
    %cst_35 = arith.constant 1.000000e+00 : f32
    %66 = vector.broadcast %cst_35 : f32 to vector<8x64xf32>
    %67 = arith.subf %66, %58 : vector<8x64xf32>
    %68 = arith.mulf %67, %65 : vector<8x64xf32>
    %69 = arith.mulf %58, %40 : vector<8x64xf32>
    %70 = arith.addf %68, %69 : vector<8x64xf32>
    %71 = vector.extract_strided_slice %70 {offsets = [0, 0], sizes = [8, 32], strides = [1, 1]} : vector<8x64xf32> to vector<8x32xf32>
    %c8_36 = arith.constant 8 : index
    %c0_37 = arith.constant 0 : index
    %72 = vector.load %arg17[%c8_36, %c0_37] : memref<64x64xf32, #tpu.memory_space<vmem>>, vector<8x32xf32>
    tpu.vector_store %arg17[%c8_36, %c0_37], %71 {strides = array<i32>} : memref<64x64xf32, #tpu.memory_space<vmem>>, vector<8x32xf32>,
    %73 = vector.extract_strided_slice %70 {offsets = [0, 32], sizes = [8, 32], strides = [1, 1]} : vector<8x64xf32> to vector<8x32xf32>
    %c48 = arith.constant 48 : index
    %c32_38 = arith.constant 32 : index
    %74 = vector.load %arg17[%c48, %c32_38] : memref<64x64xf32, #tpu.memory_space<vmem>>, vector<8x32xf32>
    tpu.vector_store %arg17[%c48, %c32_38], %73 {strides = array<i32>} : memref<64x64xf32, #tpu.memory_space<vmem>>, vector<8x32xf32>,
    %c16 = arith.constant 16 : index
    %c0_39 = arith.constant 0 : index
    %75 = vector.load %arg19[%c16, %c0_39] : memref<64x192xf32, #tpu.memory_space<vmem>>, vector<8x192xf32>
    %c0_40 = arith.constant 0 : index
    %c0_41 = arith.constant 0 : index
    %76 = vector.load %arg3[%c0_40, %c0_41] : memref<64x192xf32, #tpu.memory_space<vmem>>, vector<64x192xf32>
    %cst_42 = arith.constant dense<0.000000e+00> : vector<8x192xf32>
    %77 = tpu.matmul %70, %76, %cst_42 {dimension_numbers = #tpu.dot_dimension_numbers<[1], [0], [0], [1], [0, 0, 1, 1], [], []>} : vector<8x64xf32>, vector<64x192xf32>, vector<8x192xf32> -> vector<8x192xf32>
    %c0_43 = arith.constant 0 : index
    %c0_44 = arith.constant 0 : index
    %78 = vector.load %arg5[%c0_43, %c0_44] : memref<1x64xf32, #tpu.memory_space<vmem>>, vector<1x64xf32>
    %79 = vector.extract_strided_slice %75 {offsets = [0, 0], sizes = [8, 128], strides = [1, 1]} : vector<8x192xf32> to vector<8x128xf32>
    %80 = vector.extract_strided_slice %77 {offsets = [0, 0], sizes = [8, 128], strides = [1, 1]} : vector<8x192xf32> to vector<8x128xf32>
    %81 = arith.addf %79, %80 : vector<8x128xf32>
    %82 = arith.negf %81 : vector<8x128xf32>
    %83 = math.exp %82 : vector<8x128xf32>
    %cst_45 = arith.constant 1.000000e+00 : f32
    %84 = vector.broadcast %cst_45 : f32 to vector<8x128xf32>
    %85 = arith.addf %84, %83 : vector<8x128xf32>
    %86 = arith.divf %84, %85 : vector<8x128xf32>
    %87 = vector.extract_strided_slice %86 {offsets = [0, 0], sizes = [8, 64], strides = [1, 1]} : vector<8x128xf32> to vector<8x64xf32>
    %88 = vector.extract_strided_slice %86 {offsets = [0, 64], sizes = [8, 64], strides = [1, 1]} : vector<8x128xf32> to vector<8x64xf32>
    %89 = vector.extract_strided_slice %75 {offsets = [0, 128], sizes = [8, 64], strides = [1, 1]} : vector<8x192xf32> to vector<8x64xf32>
    %90 = vector.extract_strided_slice %77 {offsets = [0, 128], sizes = [8, 64], strides = [1, 1]} : vector<8x192xf32> to vector<8x64xf32>
    %91 = vector.broadcast %78 : vector<1x64xf32> to vector<8x64xf32>
    %92 = arith.addf %90, %91 : vector<8x64xf32>
    %93 = arith.mulf %87, %92 : vector<8x64xf32>
    %94 = arith.addf %89, %93 : vector<8x64xf32>
    %95 = math.tanh %94 : vector<8x64xf32>
    %cst_46 = arith.constant 1.000000e+00 : f32
    %96 = vector.broadcast %cst_46 : f32 to vector<8x64xf32>
    %97 = arith.subf %96, %88 : vector<8x64xf32>
    %98 = arith.mulf %97, %95 : vector<8x64xf32>
    %99 = arith.mulf %88, %70 : vector<8x64xf32>
    %100 = arith.addf %98, %99 : vector<8x64xf32>
    %101 = vector.extract_strided_slice %100 {offsets = [0, 0], sizes = [8, 32], strides = [1, 1]} : vector<8x64xf32> to vector<8x32xf32>
    %c16_47 = arith.constant 16 : index
    %c0_48 = arith.constant 0 : index
    %102 = vector.load %arg17[%c16_47, %c0_48] : memref<64x64xf32, #tpu.memory_space<vmem>>, vector<8x32xf32>
    tpu.vector_store %arg17[%c16_47, %c0_48], %101 {strides = array<i32>} : memref<64x64xf32, #tpu.memory_space<vmem>>, vector<8x32xf32>,
    %103 = vector.extract_strided_slice %100 {offsets = [0, 32], sizes = [8, 32], strides = [1, 1]} : vector<8x64xf32> to vector<8x32xf32>
    %c40 = arith.constant 40 : index
    %c32_49 = arith.constant 32 : index
    %104 = vector.load %arg17[%c40, %c32_49] : memref<64x64xf32, #tpu.memory_space<vmem>>, vector<8x32xf32>
    tpu.vector_store %arg17[%c40, %c32_49], %103 {strides = array<i32>} : memref<64x64xf32, #tpu.memory_space<vmem>>, vector<8x32xf32>,
    %c24 = arith.constant 24 : index
    %c0_50 = arith.constant 0 : index
    %105 = vector.load %arg19[%c24, %c0_50] : memref<64x192xf32, #tpu.memory_space<vmem>>, vector<8x192xf32>
    %c0_51 = arith.constant 0 : index
    %c0_52 = arith.constant 0 : index
    %106 = vector.load %arg3[%c0_51, %c0_52] : memref<64x192xf32, #tpu.memory_space<vmem>>, vector<64x192xf32>
    %cst_53 = arith.constant dense<0.000000e+00> : vector<8x192xf32>
    %107 = tpu.matmul %100, %106, %cst_53 {dimension_numbers = #tpu.dot_dimension_numbers<[1], [0], [0], [1], [0, 0, 1, 1], [], []>} : vector<8x64xf32>, vector<64x192xf32>, vector<8x192xf32> -> vector<8x192xf32>
    %c0_54 = arith.constant 0 : index
    %c0_55 = arith.constant 0 : index
    %108 = vector.load %arg5[%c0_54, %c0_55] : memref<1x64xf32, #tpu.memory_space<vmem>>, vector<1x64xf32>
    %109 = vector.extract_strided_slice %105 {offsets = [0, 0], sizes = [8, 128], strides = [1, 1]} : vector<8x192xf32> to vector<8x128xf32>
    %110 = vector.extract_strided_slice %107 {offsets = [0, 0], sizes = [8, 128], strides = [1, 1]} : vector<8x192xf32> to vector<8x128xf32>
    %111 = arith.addf %109, %110 : vector<8x128xf32>
    %112 = arith.negf %111 : vector<8x128xf32>
    %113 = math.exp %112 : vector<8x128xf32>
    %cst_56 = arith.constant 1.000000e+00 : f32
    %114 = vector.broadcast %cst_56 : f32 to vector<8x128xf32>
    %115 = arith.addf %114, %113 : vector<8x128xf32>
    %116 = arith.divf %114, %115 : vector<8x128xf32>
    %117 = vector.extract_strided_slice %116 {offsets = [0, 0], sizes = [8, 64], strides = [1, 1]} : vector<8x128xf32> to vector<8x64xf32>
    %118 = vector.extract_strided_slice %116 {offsets = [0, 64], sizes = [8, 64], strides = [1, 1]} : vector<8x128xf32> to vector<8x64xf32>
    %119 = vector.extract_strided_slice %105 {offsets = [0, 128], sizes = [8, 64], strides = [1, 1]} : vector<8x192xf32> to vector<8x64xf32>
    %120 = vector.extract_strided_slice %107 {offsets = [0, 128], sizes = [8, 64], strides = [1, 1]} : vector<8x192xf32> to vector<8x64xf32>
    %121 = vector.broadcast %108 : vector<1x64xf32> to vector<8x64xf32>
    %122 = arith.addf %120, %121 : vector<8x64xf32>
    %123 = arith.mulf %117, %122 : vector<8x64xf32>
    %124 = arith.addf %119, %123 : vector<8x64xf32>
    %125 = math.tanh %124 : vector<8x64xf32>
    %cst_57 = arith.constant 1.000000e+00 : f32
    %126 = vector.broadcast %cst_57 : f32 to vector<8x64xf32>
    %127 = arith.subf %126, %118 : vector<8x64xf32>
    %128 = arith.mulf %127, %125 : vector<8x64xf32>
    %129 = arith.mulf %118, %100 : vector<8x64xf32>
    %130 = arith.addf %128, %129 : vector<8x64xf32>
    %131 = vector.extract_strided_slice %130 {offsets = [0, 0], sizes = [8, 32], strides = [1, 1]} : vector<8x64xf32> to vector<8x32xf32>
    %c24_58 = arith.constant 24 : index
    %c0_59 = arith.constant 0 : index
    %132 = vector.load %arg17[%c24_58, %c0_59] : memref<64x64xf32, #tpu.memory_space<vmem>>, vector<8x32xf32>
    tpu.vector_store %arg17[%c24_58, %c0_59], %131 {strides = array<i32>} : memref<64x64xf32, #tpu.memory_space<vmem>>, vector<8x32xf32>,
    %133 = vector.extract_strided_slice %130 {offsets = [0, 32], sizes = [8, 32], strides = [1, 1]} : vector<8x64xf32> to vector<8x32xf32>
    %c32_60 = arith.constant 32 : index
    %c32_61 = arith.constant 32 : index
    %134 = vector.load %arg17[%c32_60, %c32_61] : memref<64x64xf32, #tpu.memory_space<vmem>>, vector<8x32xf32>
    tpu.vector_store %arg17[%c32_60, %c32_61], %133 {strides = array<i32>} : memref<64x64xf32, #tpu.memory_space<vmem>>, vector<8x32xf32>,
    %c32_62 = arith.constant 32 : index
    %c0_63 = arith.constant 0 : index
    %135 = vector.load %arg19[%c32_62, %c0_63] : memref<64x192xf32, #tpu.memory_space<vmem>>, vector<8x192xf32>
    %c0_64 = arith.constant 0 : index
    %c0_65 = arith.constant 0 : index
    %136 = vector.load %arg3[%c0_64, %c0_65] : memref<64x192xf32, #tpu.memory_space<vmem>>, vector<64x192xf32>
    %cst_66 = arith.constant dense<0.000000e+00> : vector<8x192xf32>
    %137 = tpu.matmul %130, %136, %cst_66 {dimension_numbers = #tpu.dot_dimension_numbers<[1], [0], [0], [1], [0, 0, 1, 1], [], []>} : vector<8x64xf32>, vector<64x192xf32>, vector<8x192xf32> -> vector<8x192xf32>
    %c0_67 = arith.constant 0 : index
    %c0_68 = arith.constant 0 : index
    %138 = vector.load %arg5[%c0_67, %c0_68] : memref<1x64xf32, #tpu.memory_space<vmem>>, vector<1x64xf32>
    %139 = vector.extract_strided_slice %135 {offsets = [0, 0], sizes = [8, 128], strides = [1, 1]} : vector<8x192xf32> to vector<8x128xf32>
    %140 = vector.extract_strided_slice %137 {offsets = [0, 0], sizes = [8, 128], strides = [1, 1]} : vector<8x192xf32> to vector<8x128xf32>
    %141 = arith.addf %139, %140 : vector<8x128xf32>
    %142 = arith.negf %141 : vector<8x128xf32>
    %143 = math.exp %142 : vector<8x128xf32>
    %cst_69 = arith.constant 1.000000e+00 : f32
    %144 = vector.broadcast %cst_69 : f32 to vector<8x128xf32>
    %145 = arith.addf %144, %143 : vector<8x128xf32>
    %146 = arith.divf %144, %145 : vector<8x128xf32>
    %147 = vector.extract_strided_slice %146 {offsets = [0, 0], sizes = [8, 64], strides = [1, 1]} : vector<8x128xf32> to vector<8x64xf32>
    %148 = vector.extract_strided_slice %146 {offsets = [0, 64], sizes = [8, 64], strides = [1, 1]} : vector<8x128xf32> to vector<8x64xf32>
    %149 = vector.extract_strided_slice %135 {offsets = [0, 128], sizes = [8, 64], strides = [1, 1]} : vector<8x192xf32> to vector<8x64xf32>
    %150 = vector.extract_strided_slice %137 {offsets = [0, 128], sizes = [8, 64], strides = [1, 1]} : vector<8x192xf32> to vector<8x64xf32>
    %151 = vector.broadcast %138 : vector<1x64xf32> to vector<8x64xf32>
    %152 = arith.addf %150, %151 : vector<8x64xf32>
    %153 = arith.mulf %147, %152 : vector<8x64xf32>
    %154 = arith.addf %149, %153 : vector<8x64xf32>
    %155 = math.tanh %154 : vector<8x64xf32>
    %cst_70 = arith.constant 1.000000e+00 : f32
    %156 = vector.broadcast %cst_70 : f32 to vector<8x64xf32>
    %157 = arith.subf %156, %148 : vector<8x64xf32>
    %158 = arith.mulf %157, %155 : vector<8x64xf32>
    %159 = arith.mulf %148, %130 : vector<8x64xf32>
    %160 = arith.addf %158, %159 : vector<8x64xf32>
    %161 = vector.extract_strided_slice %160 {offsets = [0, 0], sizes = [8, 32], strides = [1, 1]} : vector<8x64xf32> to vector<8x32xf32>
    %c32_71 = arith.constant 32 : index
    %c0_72 = arith.constant 0 : index
    %162 = vector.load %arg17[%c32_71, %c0_72] : memref<64x64xf32, #tpu.memory_space<vmem>>, vector<8x32xf32>
    tpu.vector_store %arg17[%c32_71, %c0_72], %161 {strides = array<i32>} : memref<64x64xf32, #tpu.memory_space<vmem>>, vector<8x32xf32>,
    %163 = vector.extract_strided_slice %160 {offsets = [0, 32], sizes = [8, 32], strides = [1, 1]} : vector<8x64xf32> to vector<8x32xf32>
    %c24_73 = arith.constant 24 : index
    %c32_74 = arith.constant 32 : index
    %164 = vector.load %arg17[%c24_73, %c32_74] : memref<64x64xf32, #tpu.memory_space<vmem>>, vector<8x32xf32>
    tpu.vector_store %arg17[%c24_73, %c32_74], %163 {strides = array<i32>} : memref<64x64xf32, #tpu.memory_space<vmem>>, vector<8x32xf32>,
    %c40_75 = arith.constant 40 : index
    %c0_76 = arith.constant 0 : index
    %165 = vector.load %arg19[%c40_75, %c0_76] : memref<64x192xf32, #tpu.memory_space<vmem>>, vector<8x192xf32>
    %c0_77 = arith.constant 0 : index
    %c0_78 = arith.constant 0 : index
    %166 = vector.load %arg3[%c0_77, %c0_78] : memref<64x192xf32, #tpu.memory_space<vmem>>, vector<64x192xf32>
    %cst_79 = arith.constant dense<0.000000e+00> : vector<8x192xf32>
    %167 = tpu.matmul %160, %166, %cst_79 {dimension_numbers = #tpu.dot_dimension_numbers<[1], [0], [0], [1], [0, 0, 1, 1], [], []>} : vector<8x64xf32>, vector<64x192xf32>, vector<8x192xf32> -> vector<8x192xf32>
    %c0_80 = arith.constant 0 : index
    %c0_81 = arith.constant 0 : index
    %168 = vector.load %arg5[%c0_80, %c0_81] : memref<1x64xf32, #tpu.memory_space<vmem>>, vector<1x64xf32>
    %169 = vector.extract_strided_slice %165 {offsets = [0, 0], sizes = [8, 128], strides = [1, 1]} : vector<8x192xf32> to vector<8x128xf32>
    %170 = vector.extract_strided_slice %167 {offsets = [0, 0], sizes = [8, 128], strides = [1, 1]} : vector<8x192xf32> to vector<8x128xf32>
    %171 = arith.addf %169, %170 : vector<8x128xf32>
    %172 = arith.negf %171 : vector<8x128xf32>
    %173 = math.exp %172 : vector<8x128xf32>
    %cst_82 = arith.constant 1.000000e+00 : f32
    %174 = vector.broadcast %cst_82 : f32 to vector<8x128xf32>
    %175 = arith.addf %174, %173 : vector<8x128xf32>
    %176 = arith.divf %174, %175 : vector<8x128xf32>
    %177 = vector.extract_strided_slice %176 {offsets = [0, 0], sizes = [8, 64], strides = [1, 1]} : vector<8x128xf32> to vector<8x64xf32>
    %178 = vector.extract_strided_slice %176 {offsets = [0, 64], sizes = [8, 64], strides = [1, 1]} : vector<8x128xf32> to vector<8x64xf32>
    %179 = vector.extract_strided_slice %165 {offsets = [0, 128], sizes = [8, 64], strides = [1, 1]} : vector<8x192xf32> to vector<8x64xf32>
    %180 = vector.extract_strided_slice %167 {offsets = [0, 128], sizes = [8, 64], strides = [1, 1]} : vector<8x192xf32> to vector<8x64xf32>
    %181 = vector.broadcast %168 : vector<1x64xf32> to vector<8x64xf32>
    %182 = arith.addf %180, %181 : vector<8x64xf32>
    %183 = arith.mulf %177, %182 : vector<8x64xf32>
    %184 = arith.addf %179, %183 : vector<8x64xf32>
    %185 = math.tanh %184 : vector<8x64xf32>
    %cst_83 = arith.constant 1.000000e+00 : f32
    %186 = vector.broadcast %cst_83 : f32 to vector<8x64xf32>
    %187 = arith.subf %186, %178 : vector<8x64xf32>
    %188 = arith.mulf %187, %185 : vector<8x64xf32>
    %189 = arith.mulf %178, %160 : vector<8x64xf32>
    %190 = arith.addf %188, %189 : vector<8x64xf32>
    %191 = vector.extract_strided_slice %190 {offsets = [0, 0], sizes = [8, 32], strides = [1, 1]} : vector<8x64xf32> to vector<8x32xf32>
    %c40_84 = arith.constant 40 : index
    %c0_85 = arith.constant 0 : index
    %192 = vector.load %arg17[%c40_84, %c0_85] : memref<64x64xf32, #tpu.memory_space<vmem>>, vector<8x32xf32>
    tpu.vector_store %arg17[%c40_84, %c0_85], %191 {strides = array<i32>} : memref<64x64xf32, #tpu.memory_space<vmem>>, vector<8x32xf32>,
    %193 = vector.extract_strided_slice %190 {offsets = [0, 32], sizes = [8, 32], strides = [1, 1]} : vector<8x64xf32> to vector<8x32xf32>
    %c16_86 = arith.constant 16 : index
    %c32_87 = arith.constant 32 : index
    %194 = vector.load %arg17[%c16_86, %c32_87] : memref<64x64xf32, #tpu.memory_space<vmem>>, vector<8x32xf32>
    tpu.vector_store %arg17[%c16_86, %c32_87], %193 {strides = array<i32>} : memref<64x64xf32, #tpu.memory_space<vmem>>, vector<8x32xf32>,
    %c48_88 = arith.constant 48 : index
    %c0_89 = arith.constant 0 : index
    %195 = vector.load %arg19[%c48_88, %c0_89] : memref<64x192xf32, #tpu.memory_space<vmem>>, vector<8x192xf32>
    %c0_90 = arith.constant 0 : index
    %c0_91 = arith.constant 0 : index
    %196 = vector.load %arg3[%c0_90, %c0_91] : memref<64x192xf32, #tpu.memory_space<vmem>>, vector<64x192xf32>
    %cst_92 = arith.constant dense<0.000000e+00> : vector<8x192xf32>
    %197 = tpu.matmul %190, %196, %cst_92 {dimension_numbers = #tpu.dot_dimension_numbers<[1], [0], [0], [1], [0, 0, 1, 1], [], []>} : vector<8x64xf32>, vector<64x192xf32>, vector<8x192xf32> -> vector<8x192xf32>
    %c0_93 = arith.constant 0 : index
    %c0_94 = arith.constant 0 : index
    %198 = vector.load %arg5[%c0_93, %c0_94] : memref<1x64xf32, #tpu.memory_space<vmem>>, vector<1x64xf32>
    %199 = vector.extract_strided_slice %195 {offsets = [0, 0], sizes = [8, 128], strides = [1, 1]} : vector<8x192xf32> to vector<8x128xf32>
    %200 = vector.extract_strided_slice %197 {offsets = [0, 0], sizes = [8, 128], strides = [1, 1]} : vector<8x192xf32> to vector<8x128xf32>
    %201 = arith.addf %199, %200 : vector<8x128xf32>
    %202 = arith.negf %201 : vector<8x128xf32>
    %203 = math.exp %202 : vector<8x128xf32>
    %cst_95 = arith.constant 1.000000e+00 : f32
    %204 = vector.broadcast %cst_95 : f32 to vector<8x128xf32>
    %205 = arith.addf %204, %203 : vector<8x128xf32>
    %206 = arith.divf %204, %205 : vector<8x128xf32>
    %207 = vector.extract_strided_slice %206 {offsets = [0, 0], sizes = [8, 64], strides = [1, 1]} : vector<8x128xf32> to vector<8x64xf32>
    %208 = vector.extract_strided_slice %206 {offsets = [0, 64], sizes = [8, 64], strides = [1, 1]} : vector<8x128xf32> to vector<8x64xf32>
    %209 = vector.extract_strided_slice %195 {offsets = [0, 128], sizes = [8, 64], strides = [1, 1]} : vector<8x192xf32> to vector<8x64xf32>
    %210 = vector.extract_strided_slice %197 {offsets = [0, 128], sizes = [8, 64], strides = [1, 1]} : vector<8x192xf32> to vector<8x64xf32>
    %211 = vector.broadcast %198 : vector<1x64xf32> to vector<8x64xf32>
    %212 = arith.addf %210, %211 : vector<8x64xf32>
    %213 = arith.mulf %207, %212 : vector<8x64xf32>
    %214 = arith.addf %209, %213 : vector<8x64xf32>
    %215 = math.tanh %214 : vector<8x64xf32>
    %cst_96 = arith.constant 1.000000e+00 : f32
    %216 = vector.broadcast %cst_96 : f32 to vector<8x64xf32>
    %217 = arith.subf %216, %208 : vector<8x64xf32>
    %218 = arith.mulf %217, %215 : vector<8x64xf32>
    %219 = arith.mulf %208, %190 : vector<8x64xf32>
    %220 = arith.addf %218, %219 : vector<8x64xf32>
    %221 = vector.extract_strided_slice %220 {offsets = [0, 0], sizes = [8, 32], strides = [1, 1]} : vector<8x64xf32> to vector<8x32xf32>
    %c48_97 = arith.constant 48 : index
    %c0_98 = arith.constant 0 : index
    %222 = vector.load %arg17[%c48_97, %c0_98] : memref<64x64xf32, #tpu.memory_space<vmem>>, vector<8x32xf32>
    tpu.vector_store %arg17[%c48_97, %c0_98], %221 {strides = array<i32>} : memref<64x64xf32, #tpu.memory_space<vmem>>, vector<8x32xf32>,
    %223 = vector.extract_strided_slice %220 {offsets = [0, 32], sizes = [8, 32], strides = [1, 1]} : vector<8x64xf32> to vector<8x32xf32>
    %c8_99 = arith.constant 8 : index
    %c32_100 = arith.constant 32 : index
    %224 = vector.load %arg17[%c8_99, %c32_100] : memref<64x64xf32, #tpu.memory_space<vmem>>, vector<8x32xf32>
    tpu.vector_store %arg17[%c8_99, %c32_100], %223 {strides = array<i32>} : memref<64x64xf32, #tpu.memory_space<vmem>>, vector<8x32xf32>,
    %c56_101 = arith.constant 56 : index
    %c0_102 = arith.constant 0 : index
    %225 = vector.load %arg19[%c56_101, %c0_102] : memref<64x192xf32, #tpu.memory_space<vmem>>, vector<8x192xf32>
    %c0_103 = arith.constant 0 : index
    %c0_104 = arith.constant 0 : index
    %226 = vector.load %arg3[%c0_103, %c0_104] : memref<64x192xf32, #tpu.memory_space<vmem>>, vector<64x192xf32>
    %cst_105 = arith.constant dense<0.000000e+00> : vector<8x192xf32>
    %227 = tpu.matmul %220, %226, %cst_105 {dimension_numbers = #tpu.dot_dimension_numbers<[1], [0], [0], [1], [0, 0, 1, 1], [], []>} : vector<8x64xf32>, vector<64x192xf32>, vector<8x192xf32> -> vector<8x192xf32>
    %c0_106 = arith.constant 0 : index
    %c0_107 = arith.constant 0 : index
    %228 = vector.load %arg5[%c0_106, %c0_107] : memref<1x64xf32, #tpu.memory_space<vmem>>, vector<1x64xf32>
    %229 = vector.extract_strided_slice %225 {offsets = [0, 0], sizes = [8, 128], strides = [1, 1]} : vector<8x192xf32> to vector<8x128xf32>
    %230 = vector.extract_strided_slice %227 {offsets = [0, 0], sizes = [8, 128], strides = [1, 1]} : vector<8x192xf32> to vector<8x128xf32>
    %231 = arith.addf %229, %230 : vector<8x128xf32>
    %232 = arith.negf %231 : vector<8x128xf32>
    %233 = math.exp %232 : vector<8x128xf32>
    %cst_108 = arith.constant 1.000000e+00 : f32
    %234 = vector.broadcast %cst_108 : f32 to vector<8x128xf32>
    %235 = arith.addf %234, %233 : vector<8x128xf32>
    %236 = arith.divf %234, %235 : vector<8x128xf32>
    %237 = vector.extract_strided_slice %236 {offsets = [0, 0], sizes = [8, 64], strides = [1, 1]} : vector<8x128xf32> to vector<8x64xf32>
    %238 = vector.extract_strided_slice %236 {offsets = [0, 64], sizes = [8, 64], strides = [1, 1]} : vector<8x128xf32> to vector<8x64xf32>
    %239 = vector.extract_strided_slice %225 {offsets = [0, 128], sizes = [8, 64], strides = [1, 1]} : vector<8x192xf32> to vector<8x64xf32>
    %240 = vector.extract_strided_slice %227 {offsets = [0, 128], sizes = [8, 64], strides = [1, 1]} : vector<8x192xf32> to vector<8x64xf32>
    %241 = vector.broadcast %228 : vector<1x64xf32> to vector<8x64xf32>
    %242 = arith.addf %240, %241 : vector<8x64xf32>
    %243 = arith.mulf %237, %242 : vector<8x64xf32>
    %244 = arith.addf %239, %243 : vector<8x64xf32>
    %245 = math.tanh %244 : vector<8x64xf32>
    %cst_109 = arith.constant 1.000000e+00 : f32
    %246 = vector.broadcast %cst_109 : f32 to vector<8x64xf32>
    %247 = arith.subf %246, %238 : vector<8x64xf32>
    %248 = arith.mulf %247, %245 : vector<8x64xf32>
    %249 = arith.mulf %238, %220 : vector<8x64xf32>
    %250 = arith.addf %248, %249 : vector<8x64xf32>
    %251 = vector.extract_strided_slice %250 {offsets = [0, 0], sizes = [8, 32], strides = [1, 1]} : vector<8x64xf32> to vector<8x32xf32>
    %c56_110 = arith.constant 56 : index
    %c0_111 = arith.constant 0 : index
    %252 = vector.load %arg17[%c56_110, %c0_111] : memref<64x64xf32, #tpu.memory_space<vmem>>, vector<8x32xf32>
    tpu.vector_store %arg17[%c56_110, %c0_111], %251 {strides = array<i32>} : memref<64x64xf32, #tpu.memory_space<vmem>>, vector<8x32xf32>,
    %253 = vector.extract_strided_slice %250 {offsets = [0, 32], sizes = [8, 32], strides = [1, 1]} : vector<8x64xf32> to vector<8x32xf32>
    %c0_112 = arith.constant 0 : index
    %c32_113 = arith.constant 32 : index
    %254 = vector.load %arg17[%c0_112, %c32_113] : memref<64x64xf32, #tpu.memory_space<vmem>>, vector<8x32xf32>
    tpu.vector_store %arg17[%c0_112, %c32_113], %253 {strides = array<i32>} : memref<64x64xf32, #tpu.memory_space<vmem>>, vector<8x32xf32>,
    %c0_114 = arith.constant 0 : index
    %c0_115 = arith.constant 0 : index
    %255 = vector.load %arg6[%c0_114, %c0_115] : memref<64x32xf32, #tpu.memory_space<vmem>>, vector<64x32xf32>
    %cst_116 = arith.constant dense<0.000000e+00> : vector<8x32xf32>
    %256 = tpu.matmul %250, %255, %cst_116 {dimension_numbers = #tpu.dot_dimension_numbers<[1], [0], [0], [1], [0, 0, 1, 1], [], []>} : vector<8x64xf32>, vector<64x32xf32>, vector<8x32xf32> -> vector<8x32xf32>
    %c0_117 = arith.constant 0 : index
    %c0_118 = arith.constant 0 : index
    %257 = vector.load %arg7[%c0_117, %c0_118] : memref<1x32xf32, #tpu.memory_space<vmem>>, vector<1x32xf32>
    %258 = vector.broadcast %257 : vector<1x32xf32> to vector<8x32xf32>
    %259 = arith.addf %256, %258 : vector<8x32xf32>
    %260 = math.tanh %259 : vector<8x32xf32>
    %c0_119 = arith.constant 0 : index
    %c0_120 = arith.constant 0 : index
    %261 = vector.load %arg17[%c0_119, %c0_120] : memref<64x64xf32, #tpu.memory_space<vmem>>, vector<64x64xf32>
    %c0_121 = arith.constant 0 : index
    %c0_122 = arith.constant 0 : index
    %262 = vector.load %arg9[%c0_121, %c0_122] : memref<64x32xf32, #tpu.memory_space<vmem>>, vector<64x32xf32>
    %cst_123 = arith.constant dense<0.000000e+00> : vector<64x32xf32>
    %263 = tpu.matmul %261, %262, %cst_123 {dimension_numbers = #tpu.dot_dimension_numbers<[1], [0], [0], [1], [0, 0, 1, 1], [], []>} : vector<64x64xf32>, vector<64x32xf32>, vector<64x32xf32> -> vector<64x32xf32>
    %c0_124 = arith.constant 0 : index
    %c0_125 = arith.constant 0 : index
    %264 = vector.load %arg21[%c0_124, %c0_125] : memref<64x32xf32, #tpu.memory_space<vmem>>, vector<64x32xf32>
    tpu.vector_store %arg21[%c0_124, %c0_125], %263 {strides = array<i32>} : memref<64x32xf32, #tpu.memory_space<vmem>>, vector<64x32xf32>,
    %265 = tpu.iota {dimensions = array<i32: 0>} : vector<8x8xi32>
    %266 = tpu.iota {dimensions = array<i32: 1>} : vector<8x8xi32>
    %267 = arith.cmpi eq, %265, %266 : vector<8x8xi32>
    %268 = arith.extui %267 : vector<8x8xi1> to vector<8x8xi32>
    %269 = arith.sitofp %268 : vector<8x8xi32> to vector<8x8xf32>
    %270 = tpu.concatenate %269, %269, %269, %269, %269, %269, %269, %269 in 1 : vector<8x8xf32>, vector<8x8xf32>, vector<8x8xf32>, vector<8x8xf32>, vector<8x8xf32>, vector<8x8xf32>, vector<8x8xf32>, vector<8x8xf32> -> vector<8x64xf32>
    %271 = tpu.concatenate %269, %269, %269, %269, %269, %269, %269, %269 in 0 : vector<8x8xf32>, vector<8x8xf32>, vector<8x8xf32>, vector<8x8xf32>, vector<8x8xf32>, vector<8x8xf32>, vector<8x8xf32>, vector<8x8xf32> -> vector<64x8xf32>
    %c0_126 = arith.constant 0 : index
    %c0_127 = arith.constant 0 : index
    %272 = vector.load %arg8[%c0_126, %c0_127] : memref<32x128xf32, #tpu.memory_space<vmem>>, vector<32x128xf32>
    %cst_128 = arith.constant dense<0.000000e+00> : vector<8x128xf32>
    %273 = tpu.matmul %260, %272, %cst_128 {dimension_numbers = #tpu.dot_dimension_numbers<[1], [0], [0], [1], [0, 0, 1, 1], [], []>} : vector<8x32xf32>, vector<32x128xf32>, vector<8x128xf32> -> vector<8x128xf32>
    %274 = vector.extract_strided_slice %273 {offsets = [0, 0], sizes = [8, 32], strides = [1, 1]} : vector<8x128xf32> to vector<8x32xf32>
    %275 = vector.extract_strided_slice %273 {offsets = [0, 32], sizes = [8, 96], strides = [1, 1]} : vector<8x128xf32> to vector<8x96xf32>
    %c0_129 = arith.constant 0 : index
    %c0_130 = arith.constant 0 : index
    %276 = vector.load %arg21[%c0_129, %c0_130] : memref<64x32xf32, #tpu.memory_space<vmem>>, vector<64x32xf32>
    %cst_131 = arith.constant dense<0.000000e+00> : vector<64x32xf32>
    %277 = tpu.matmul %271, %274, %cst_131 {dimension_numbers = #tpu.dot_dimension_numbers<[1], [0], [0], [1], [0, 0, 1, 1], [], []>} : vector<64x8xf32>, vector<8x32xf32>, vector<64x32xf32> -> vector<64x32xf32>
    %278 = arith.addf %276, %277 : vector<64x32xf32>
    %279 = math.tanh %278 : vector<64x32xf32>
    %c0_132 = arith.constant 0 : index
    %c0_133 = arith.constant 0 : index
    %280 = vector.load %arg10[%c0_132, %c0_133] : memref<1x32xf32, #tpu.memory_space<vmem>>, vector<1x32xf32>
    %281 = vector.broadcast %280 : vector<1x32xf32> to vector<64x32xf32>
    %282 = arith.mulf %279, %281 : vector<64x32xf32>
    %cst_134 = arith.constant dense<0.000000e+00> : vector<64xf32>
    %283 = vector.multi_reduction <add>, %282, %cst_134 [1] : vector<64x32xf32> to vector<64xf32>
    %284 = vector.shape_cast %283 : vector<64xf32> to vector<64x1xf32>
    %285 = vector.extract_strided_slice %284 {offsets = [0, 0], sizes = [8, 1], strides = [1, 1]} : vector<64x1xf32> to vector<8x1xf32>
    %286 = vector.extract_strided_slice %284 {offsets = [8, 0], sizes = [8, 1], strides = [1, 1]} : vector<64x1xf32> to vector<8x1xf32>
    %287 = arith.maximumf %285, %286 : vector<8x1xf32>
    %288 = vector.extract_strided_slice %284 {offsets = [16, 0], sizes = [8, 1], strides = [1, 1]} : vector<64x1xf32> to vector<8x1xf32>
    %289 = arith.maximumf %287, %288 : vector<8x1xf32>
    %290 = vector.extract_strided_slice %284 {offsets = [24, 0], sizes = [8, 1], strides = [1, 1]} : vector<64x1xf32> to vector<8x1xf32>
    %291 = arith.maximumf %289, %290 : vector<8x1xf32>
    %292 = vector.extract_strided_slice %284 {offsets = [32, 0], sizes = [8, 1], strides = [1, 1]} : vector<64x1xf32> to vector<8x1xf32>
    %293 = arith.maximumf %291, %292 : vector<8x1xf32>
    %294 = vector.extract_strided_slice %284 {offsets = [40, 0], sizes = [8, 1], strides = [1, 1]} : vector<64x1xf32> to vector<8x1xf32>
    %295 = arith.maximumf %293, %294 : vector<8x1xf32>
    %296 = vector.extract_strided_slice %284 {offsets = [48, 0], sizes = [8, 1], strides = [1, 1]} : vector<64x1xf32> to vector<8x1xf32>
    %297 = arith.maximumf %295, %296 : vector<8x1xf32>
    %298 = vector.extract_strided_slice %284 {offsets = [56, 0], sizes = [8, 1], strides = [1, 1]} : vector<64x1xf32> to vector<8x1xf32>
    %299 = arith.maximumf %297, %298 : vector<8x1xf32>
    %300 = tpu.concatenate %299, %299, %299, %299, %299, %299, %299, %299 in 0 : vector<8x1xf32>, vector<8x1xf32>, vector<8x1xf32>, vector<8x1xf32>, vector<8x1xf32>, vector<8x1xf32>, vector<8x1xf32>, vector<8x1xf32> -> vector<64x1xf32>
    %301 = arith.subf %284, %300 : vector<64x1xf32>
    %302 = math.exp %301 : vector<64x1xf32>
    %c0_135 = arith.constant 0 : index
    %c0_136 = arith.constant 0 : index
    %303 = vector.load %arg17[%c0_135, %c0_136] : memref<64x64xf32, #tpu.memory_space<vmem>>, vector<64x64xf32>
    %304 = vector.broadcast %302 : vector<64x1xf32> to vector<64x64xf32>
    %305 = arith.mulf %304, %303 : vector<64x64xf32>
    %cst_137 = arith.constant dense<0.000000e+00> : vector<8x64xf32>
    %306 = tpu.matmul %270, %305, %cst_137 {dimension_numbers = #tpu.dot_dimension_numbers<[1], [0], [0], [1], [0, 0, 1, 1], [], []>} : vector<8x64xf32>, vector<64x64xf32>, vector<8x64xf32> -> vector<8x64xf32>
    %cst_138 = arith.constant dense<0.000000e+00> : vector<8x1xf32>
    %307 = tpu.matmul %270, %302, %cst_138 {dimension_numbers = #tpu.dot_dimension_numbers<[1], [0], [0], [1], [0, 0, 1, 1], [], []>} : vector<8x64xf32>, vector<64x1xf32>, vector<8x1xf32> -> vector<8x1xf32>
    %308 = vector.broadcast %307 : vector<8x1xf32> to vector<8x64xf32>
    %309 = arith.divf %306, %308 : vector<8x64xf32>
    %c0_139 = arith.constant 0 : index
    %c0_140 = arith.constant 0 : index
    %310 = vector.load %arg20[%c0_139, %c0_140] : memref<48x112xf32, #tpu.memory_space<vmem>>, vector<8x96xf32>
    %c0_141 = arith.constant 0 : index
    %c0_142 = arith.constant 0 : index
    %311 = vector.load %arg13[%c0_141, %c0_142] : memref<64x96xf32, #tpu.memory_space<vmem>>, vector<64x96xf32>
    %cst_143 = arith.constant dense<0.000000e+00> : vector<8x96xf32>
    %312 = tpu.matmul %309, %311, %cst_143 {dimension_numbers = #tpu.dot_dimension_numbers<[1], [0], [0], [1], [0, 0, 1, 1], [], []>} : vector<8x64xf32>, vector<64x96xf32>, vector<8x96xf32> -> vector<8x96xf32>
    %313 = arith.addf %310, %312 : vector<8x96xf32>
    %c0_144 = arith.constant 0 : index
    %c0_145 = arith.constant 0 : index
    %314 = vector.load %arg14[%c0_144, %c0_145] : memref<1x32xf32, #tpu.memory_space<vmem>>, vector<1x32xf32>
    %315 = vector.extract_strided_slice %313 {offsets = [0, 0], sizes = [8, 64], strides = [1, 1]} : vector<8x96xf32> to vector<8x64xf32>
    %316 = vector.extract_strided_slice %275 {offsets = [0, 0], sizes = [8, 64], strides = [1, 1]} : vector<8x96xf32> to vector<8x64xf32>
    %317 = arith.addf %315, %316 : vector<8x64xf32>
    %318 = arith.negf %317 : vector<8x64xf32>
    %319 = math.exp %318 : vector<8x64xf32>
    %cst_146 = arith.constant 1.000000e+00 : f32
    %320 = vector.broadcast %cst_146 : f32 to vector<8x64xf32>
    %321 = arith.addf %320, %319 : vector<8x64xf32>
    %322 = arith.divf %320, %321 : vector<8x64xf32>
    %323 = vector.extract_strided_slice %322 {offsets = [0, 0], sizes = [8, 32], strides = [1, 1]} : vector<8x64xf32> to vector<8x32xf32>
    %324 = vector.extract_strided_slice %322 {offsets = [0, 32], sizes = [8, 32], strides = [1, 1]} : vector<8x64xf32> to vector<8x32xf32>
    %325 = vector.extract_strided_slice %313 {offsets = [0, 64], sizes = [8, 32], strides = [1, 1]} : vector<8x96xf32> to vector<8x32xf32>
    %326 = vector.extract_strided_slice %275 {offsets = [0, 64], sizes = [8, 32], strides = [1, 1]} : vector<8x96xf32> to vector<8x32xf32>
    %327 = vector.broadcast %314 : vector<1x32xf32> to vector<8x32xf32>
    %328 = arith.addf %326, %327 : vector<8x32xf32>
    %329 = arith.mulf %323, %328 : vector<8x32xf32>
    %330 = arith.addf %325, %329 : vector<8x32xf32>
    %331 = math.tanh %330 : vector<8x32xf32>
    %cst_147 = arith.constant 1.000000e+00 : f32
    %332 = vector.broadcast %cst_147 : f32 to vector<8x32xf32>
    %333 = arith.subf %332, %324 : vector<8x32xf32>
    %334 = arith.mulf %333, %331 : vector<8x32xf32>
    %335 = arith.mulf %324, %260 : vector<8x32xf32>
    %336 = arith.addf %334, %335 : vector<8x32xf32>
    %c0_148 = arith.constant 0 : index
    %c0_149 = arith.constant 0 : index
    %337 = vector.load %arg22[%c0_148, %c0_149] : memref<40x96xf32, #tpu.memory_space<vmem>>, vector<8x32xf32>
    tpu.vector_store %arg22[%c0_148, %c0_149], %336 {strides = array<i32>} : memref<40x96xf32, #tpu.memory_space<vmem>>, vector<8x32xf32>,
    %c0_150 = arith.constant 0 : index
    %c32_151 = arith.constant 32 : index
    %338 = vector.load %arg22[%c0_150, %c32_151] : memref<40x96xf32, #tpu.memory_space<vmem>>, vector<8x64xf32>
    tpu.vector_store %arg22[%c0_150, %c32_151], %309 {strides = array<i32>} : memref<40x96xf32, #tpu.memory_space<vmem>>, vector<8x64xf32>,
    %c0_152 = arith.constant 0 : index
    %c0_153 = arith.constant 0 : index
    %339 = vector.load %arg8[%c0_152, %c0_153] : memref<32x128xf32, #tpu.memory_space<vmem>>, vector<32x128xf32>
    %cst_154 = arith.constant dense<0.000000e+00> : vector<8x128xf32>
    %340 = tpu.matmul %336, %339, %cst_154 {dimension_numbers = #tpu.dot_dimension_numbers<[1], [0], [0], [1], [0, 0, 1, 1], [], []>} : vector<8x32xf32>, vector<32x128xf32>, vector<8x128xf32> -> vector<8x128xf32>
    %341 = vector.extract_strided_slice %340 {offsets = [0, 0], sizes = [8, 32], strides = [1, 1]} : vector<8x128xf32> to vector<8x32xf32>
    %342 = vector.extract_strided_slice %340 {offsets = [0, 32], sizes = [8, 96], strides = [1, 1]} : vector<8x128xf32> to vector<8x96xf32>
    %c0_155 = arith.constant 0 : index
    %c0_156 = arith.constant 0 : index
    %343 = vector.load %arg21[%c0_155, %c0_156] : memref<64x32xf32, #tpu.memory_space<vmem>>, vector<64x32xf32>
    %cst_157 = arith.constant dense<0.000000e+00> : vector<64x32xf32>
    %344 = tpu.matmul %271, %341, %cst_157 {dimension_numbers = #tpu.dot_dimension_numbers<[1], [0], [0], [1], [0, 0, 1, 1], [], []>} : vector<64x8xf32>, vector<8x32xf32>, vector<64x32xf32> -> vector<64x32xf32>
    %345 = arith.addf %343, %344 : vector<64x32xf32>
    %346 = math.tanh %345 : vector<64x32xf32>
    %c0_158 = arith.constant 0 : index
    %c0_159 = arith.constant 0 : index
    %347 = vector.load %arg10[%c0_158, %c0_159] : memref<1x32xf32, #tpu.memory_space<vmem>>, vector<1x32xf32>
    %348 = vector.broadcast %347 : vector<1x32xf32> to vector<64x32xf32>
    %349 = arith.mulf %346, %348 : vector<64x32xf32>
    %cst_160 = arith.constant dense<0.000000e+00> : vector<64xf32>
    %350 = vector.multi_reduction <add>, %349, %cst_160 [1] : vector<64x32xf32> to vector<64xf32>
    %351 = vector.shape_cast %350 : vector<64xf32> to vector<64x1xf32>
    %352 = vector.extract_strided_slice %351 {offsets = [0, 0], sizes = [8, 1], strides = [1, 1]} : vector<64x1xf32> to vector<8x1xf32>
    %353 = vector.extract_strided_slice %351 {offsets = [8, 0], sizes = [8, 1], strides = [1, 1]} : vector<64x1xf32> to vector<8x1xf32>
    %354 = arith.maximumf %352, %353 : vector<8x1xf32>
    %355 = vector.extract_strided_slice %351 {offsets = [16, 0], sizes = [8, 1], strides = [1, 1]} : vector<64x1xf32> to vector<8x1xf32>
    %356 = arith.maximumf %354, %355 : vector<8x1xf32>
    %357 = vector.extract_strided_slice %351 {offsets = [24, 0], sizes = [8, 1], strides = [1, 1]} : vector<64x1xf32> to vector<8x1xf32>
    %358 = arith.maximumf %356, %357 : vector<8x1xf32>
    %359 = vector.extract_strided_slice %351 {offsets = [32, 0], sizes = [8, 1], strides = [1, 1]} : vector<64x1xf32> to vector<8x1xf32>
    %360 = arith.maximumf %358, %359 : vector<8x1xf32>
    %361 = vector.extract_strided_slice %351 {offsets = [40, 0], sizes = [8, 1], strides = [1, 1]} : vector<64x1xf32> to vector<8x1xf32>
    %362 = arith.maximumf %360, %361 : vector<8x1xf32>
    %363 = vector.extract_strided_slice %351 {offsets = [48, 0], sizes = [8, 1], strides = [1, 1]} : vector<64x1xf32> to vector<8x1xf32>
    %364 = arith.maximumf %362, %363 : vector<8x1xf32>
    %365 = vector.extract_strided_slice %351 {offsets = [56, 0], sizes = [8, 1], strides = [1, 1]} : vector<64x1xf32> to vector<8x1xf32>
    %366 = arith.maximumf %364, %365 : vector<8x1xf32>
    %367 = tpu.concatenate %366, %366, %366, %366, %366, %366, %366, %366 in 0 : vector<8x1xf32>, vector<8x1xf32>, vector<8x1xf32>, vector<8x1xf32>, vector<8x1xf32>, vector<8x1xf32>, vector<8x1xf32>, vector<8x1xf32> -> vector<64x1xf32>
    %368 = arith.subf %351, %367 : vector<64x1xf32>
    %369 = math.exp %368 : vector<64x1xf32>
    %c0_161 = arith.constant 0 : index
    %c0_162 = arith.constant 0 : index
    %370 = vector.load %arg17[%c0_161, %c0_162] : memref<64x64xf32, #tpu.memory_space<vmem>>, vector<64x64xf32>
    %371 = vector.broadcast %369 : vector<64x1xf32> to vector<64x64xf32>
    %372 = arith.mulf %371, %370 : vector<64x64xf32>
    %cst_163 = arith.constant dense<0.000000e+00> : vector<8x64xf32>
    %373 = tpu.matmul %270, %372, %cst_163 {dimension_numbers = #tpu.dot_dimension_numbers<[1], [0], [0], [1], [0, 0, 1, 1], [], []>} : vector<8x64xf32>, vector<64x64xf32>, vector<8x64xf32> -> vector<8x64xf32>
    %cst_164 = arith.constant dense<0.000000e+00> : vector<8x1xf32>
    %374 = tpu.matmul %270, %369, %cst_164 {dimension_numbers = #tpu.dot_dimension_numbers<[1], [0], [0], [1], [0, 0, 1, 1], [], []>} : vector<8x64xf32>, vector<64x1xf32>, vector<8x1xf32> -> vector<8x1xf32>
    %375 = vector.broadcast %374 : vector<8x1xf32> to vector<8x64xf32>
    %376 = arith.divf %373, %375 : vector<8x64xf32>
    %c8_165 = arith.constant 8 : index
    %c0_166 = arith.constant 0 : index
    %377 = vector.load %arg20[%c8_165, %c0_166] : memref<48x112xf32, #tpu.memory_space<vmem>>, vector<8x96xf32>
    %c0_167 = arith.constant 0 : index
    %c0_168 = arith.constant 0 : index
    %378 = vector.load %arg13[%c0_167, %c0_168] : memref<64x96xf32, #tpu.memory_space<vmem>>, vector<64x96xf32>
    %cst_169 = arith.constant dense<0.000000e+00> : vector<8x96xf32>
    %379 = tpu.matmul %376, %378, %cst_169 {dimension_numbers = #tpu.dot_dimension_numbers<[1], [0], [0], [1], [0, 0, 1, 1], [], []>} : vector<8x64xf32>, vector<64x96xf32>, vector<8x96xf32> -> vector<8x96xf32>
    %380 = arith.addf %377, %379 : vector<8x96xf32>
    %c0_170 = arith.constant 0 : index
    %c0_171 = arith.constant 0 : index
    %381 = vector.load %arg14[%c0_170, %c0_171] : memref<1x32xf32, #tpu.memory_space<vmem>>, vector<1x32xf32>
    %382 = vector.extract_strided_slice %380 {offsets = [0, 0], sizes = [8, 64], strides = [1, 1]} : vector<8x96xf32> to vector<8x64xf32>
    %383 = vector.extract_strided_slice %342 {offsets = [0, 0], sizes = [8, 64], strides = [1, 1]} : vector<8x96xf32> to vector<8x64xf32>
    %384 = arith.addf %382, %383 : vector<8x64xf32>
    %385 = arith.negf %384 : vector<8x64xf32>
    %386 = math.exp %385 : vector<8x64xf32>
    %cst_172 = arith.constant 1.000000e+00 : f32
    %387 = vector.broadcast %cst_172 : f32 to vector<8x64xf32>
    %388 = arith.addf %387, %386 : vector<8x64xf32>
    %389 = arith.divf %387, %388 : vector<8x64xf32>
    %390 = vector.extract_strided_slice %389 {offsets = [0, 0], sizes = [8, 32], strides = [1, 1]} : vector<8x64xf32> to vector<8x32xf32>
    %391 = vector.extract_strided_slice %389 {offsets = [0, 32], sizes = [8, 32], strides = [1, 1]} : vector<8x64xf32> to vector<8x32xf32>
    %392 = vector.extract_strided_slice %380 {offsets = [0, 64], sizes = [8, 32], strides = [1, 1]} : vector<8x96xf32> to vector<8x32xf32>
    %393 = vector.extract_strided_slice %342 {offsets = [0, 64], sizes = [8, 32], strides = [1, 1]} : vector<8x96xf32> to vector<8x32xf32>
    %394 = vector.broadcast %381 : vector<1x32xf32> to vector<8x32xf32>
    %395 = arith.addf %393, %394 : vector<8x32xf32>
    %396 = arith.mulf %390, %395 : vector<8x32xf32>
    %397 = arith.addf %392, %396 : vector<8x32xf32>
    %398 = math.tanh %397 : vector<8x32xf32>
    %cst_173 = arith.constant 1.000000e+00 : f32
    %399 = vector.broadcast %cst_173 : f32 to vector<8x32xf32>
    %400 = arith.subf %399, %391 : vector<8x32xf32>
    %401 = arith.mulf %400, %398 : vector<8x32xf32>
    %402 = arith.mulf %391, %336 : vector<8x32xf32>
    %403 = arith.addf %401, %402 : vector<8x32xf32>
    %c8_174 = arith.constant 8 : index
    %c0_175 = arith.constant 0 : index
    %404 = vector.load %arg22[%c8_174, %c0_175] : memref<40x96xf32, #tpu.memory_space<vmem>>, vector<8x32xf32>
    tpu.vector_store %arg22[%c8_174, %c0_175], %403 {strides = array<i32>} : memref<40x96xf32, #tpu.memory_space<vmem>>, vector<8x32xf32>,
    %c8_176 = arith.constant 8 : index
    %c32_177 = arith.constant 32 : index
    %405 = vector.load %arg22[%c8_176, %c32_177] : memref<40x96xf32, #tpu.memory_space<vmem>>, vector<8x64xf32>
    tpu.vector_store %arg22[%c8_176, %c32_177], %376 {strides = array<i32>} : memref<40x96xf32, #tpu.memory_space<vmem>>, vector<8x64xf32>,
    %c0_178 = arith.constant 0 : index
    %c0_179 = arith.constant 0 : index
    %406 = vector.load %arg8[%c0_178, %c0_179] : memref<32x128xf32, #tpu.memory_space<vmem>>, vector<32x128xf32>
    %cst_180 = arith.constant dense<0.000000e+00> : vector<8x128xf32>
    %407 = tpu.matmul %403, %406, %cst_180 {dimension_numbers = #tpu.dot_dimension_numbers<[1], [0], [0], [1], [0, 0, 1, 1], [], []>} : vector<8x32xf32>, vector<32x128xf32>, vector<8x128xf32> -> vector<8x128xf32>
    %408 = vector.extract_strided_slice %407 {offsets = [0, 0], sizes = [8, 32], strides = [1, 1]} : vector<8x128xf32> to vector<8x32xf32>
    %409 = vector.extract_strided_slice %407 {offsets = [0, 32], sizes = [8, 96], strides = [1, 1]} : vector<8x128xf32> to vector<8x96xf32>
    %c0_181 = arith.constant 0 : index
    %c0_182 = arith.constant 0 : index
    %410 = vector.load %arg21[%c0_181, %c0_182] : memref<64x32xf32, #tpu.memory_space<vmem>>, vector<64x32xf32>
    %cst_183 = arith.constant dense<0.000000e+00> : vector<64x32xf32>
    %411 = tpu.matmul %271, %408, %cst_183 {dimension_numbers = #tpu.dot_dimension_numbers<[1], [0], [0], [1], [0, 0, 1, 1], [], []>} : vector<64x8xf32>, vector<8x32xf32>, vector<64x32xf32> -> vector<64x32xf32>
    %412 = arith.addf %410, %411 : vector<64x32xf32>
    %413 = math.tanh %412 : vector<64x32xf32>
    %c0_184 = arith.constant 0 : index
    %c0_185 = arith.constant 0 : index
    %414 = vector.load %arg10[%c0_184, %c0_185] : memref<1x32xf32, #tpu.memory_space<vmem>>, vector<1x32xf32>
    %415 = vector.broadcast %414 : vector<1x32xf32> to vector<64x32xf32>
    %416 = arith.mulf %413, %415 : vector<64x32xf32>
    %cst_186 = arith.constant dense<0.000000e+00> : vector<64xf32>
    %417 = vector.multi_reduction <add>, %416, %cst_186 [1] : vector<64x32xf32> to vector<64xf32>
    %418 = vector.shape_cast %417 : vector<64xf32> to vector<64x1xf32>
    %419 = vector.extract_strided_slice %418 {offsets = [0, 0], sizes = [8, 1], strides = [1, 1]} : vector<64x1xf32> to vector<8x1xf32>
    %420 = vector.extract_strided_slice %418 {offsets = [8, 0], sizes = [8, 1], strides = [1, 1]} : vector<64x1xf32> to vector<8x1xf32>
    %421 = arith.maximumf %419, %420 : vector<8x1xf32>
    %422 = vector.extract_strided_slice %418 {offsets = [16, 0], sizes = [8, 1], strides = [1, 1]} : vector<64x1xf32> to vector<8x1xf32>
    %423 = arith.maximumf %421, %422 : vector<8x1xf32>
    %424 = vector.extract_strided_slice %418 {offsets = [24, 0], sizes = [8, 1], strides = [1, 1]} : vector<64x1xf32> to vector<8x1xf32>
    %425 = arith.maximumf %423, %424 : vector<8x1xf32>
    %426 = vector.extract_strided_slice %418 {offsets = [32, 0], sizes = [8, 1], strides = [1, 1]} : vector<64x1xf32> to vector<8x1xf32>
    %427 = arith.maximumf %425, %426 : vector<8x1xf32>
    %428 = vector.extract_strided_slice %418 {offsets = [40, 0], sizes = [8, 1], strides = [1, 1]} : vector<64x1xf32> to vector<8x1xf32>
    %429 = arith.maximumf %427, %428 : vector<8x1xf32>
    %430 = vector.extract_strided_slice %418 {offsets = [48, 0], sizes = [8, 1], strides = [1, 1]} : vector<64x1xf32> to vector<8x1xf32>
    %431 = arith.maximumf %429, %430 : vector<8x1xf32>
    %432 = vector.extract_strided_slice %418 {offsets = [56, 0], sizes = [8, 1], strides = [1, 1]} : vector<64x1xf32> to vector<8x1xf32>
    %433 = arith.maximumf %431, %432 : vector<8x1xf32>
    %434 = tpu.concatenate %433, %433, %433, %433, %433, %433, %433, %433 in 0 : vector<8x1xf32>, vector<8x1xf32>, vector<8x1xf32>, vector<8x1xf32>, vector<8x1xf32>, vector<8x1xf32>, vector<8x1xf32>, vector<8x1xf32> -> vector<64x1xf32>
    %435 = arith.subf %418, %434 : vector<64x1xf32>
    %436 = math.exp %435 : vector<64x1xf32>
    %c0_187 = arith.constant 0 : index
    %c0_188 = arith.constant 0 : index
    %437 = vector.load %arg17[%c0_187, %c0_188] : memref<64x64xf32, #tpu.memory_space<vmem>>, vector<64x64xf32>
    %438 = vector.broadcast %436 : vector<64x1xf32> to vector<64x64xf32>
    %439 = arith.mulf %438, %437 : vector<64x64xf32>
    %cst_189 = arith.constant dense<0.000000e+00> : vector<8x64xf32>
    %440 = tpu.matmul %270, %439, %cst_189 {dimension_numbers = #tpu.dot_dimension_numbers<[1], [0], [0], [1], [0, 0, 1, 1], [], []>} : vector<8x64xf32>, vector<64x64xf32>, vector<8x64xf32> -> vector<8x64xf32>
    %cst_190 = arith.constant dense<0.000000e+00> : vector<8x1xf32>
    %441 = tpu.matmul %270, %436, %cst_190 {dimension_numbers = #tpu.dot_dimension_numbers<[1], [0], [0], [1], [0, 0, 1, 1], [], []>} : vector<8x64xf32>, vector<64x1xf32>, vector<8x1xf32> -> vector<8x1xf32>
    %442 = vector.broadcast %441 : vector<8x1xf32> to vector<8x64xf32>
    %443 = arith.divf %440, %442 : vector<8x64xf32>
    %c16_191 = arith.constant 16 : index
    %c0_192 = arith.constant 0 : index
    %444 = vector.load %arg20[%c16_191, %c0_192] : memref<48x112xf32, #tpu.memory_space<vmem>>, vector<8x96xf32>
    %c0_193 = arith.constant 0 : index
    %c0_194 = arith.constant 0 : index
    %445 = vector.load %arg13[%c0_193, %c0_194] : memref<64x96xf32, #tpu.memory_space<vmem>>, vector<64x96xf32>
    %cst_195 = arith.constant dense<0.000000e+00> : vector<8x96xf32>
    %446 = tpu.matmul %443, %445, %cst_195 {dimension_numbers = #tpu.dot_dimension_numbers<[1], [0], [0], [1], [0, 0, 1, 1], [], []>} : vector<8x64xf32>, vector<64x96xf32>, vector<8x96xf32> -> vector<8x96xf32>
    %447 = arith.addf %444, %446 : vector<8x96xf32>
    %c0_196 = arith.constant 0 : index
    %c0_197 = arith.constant 0 : index
    %448 = vector.load %arg14[%c0_196, %c0_197] : memref<1x32xf32, #tpu.memory_space<vmem>>, vector<1x32xf32>
    %449 = vector.extract_strided_slice %447 {offsets = [0, 0], sizes = [8, 64], strides = [1, 1]} : vector<8x96xf32> to vector<8x64xf32>
    %450 = vector.extract_strided_slice %409 {offsets = [0, 0], sizes = [8, 64], strides = [1, 1]} : vector<8x96xf32> to vector<8x64xf32>
    %451 = arith.addf %449, %450 : vector<8x64xf32>
    %452 = arith.negf %451 : vector<8x64xf32>
    %453 = math.exp %452 : vector<8x64xf32>
    %cst_198 = arith.constant 1.000000e+00 : f32
    %454 = vector.broadcast %cst_198 : f32 to vector<8x64xf32>
    %455 = arith.addf %454, %453 : vector<8x64xf32>
    %456 = arith.divf %454, %455 : vector<8x64xf32>
    %457 = vector.extract_strided_slice %456 {offsets = [0, 0], sizes = [8, 32], strides = [1, 1]} : vector<8x64xf32> to vector<8x32xf32>
    %458 = vector.extract_strided_slice %456 {offsets = [0, 32], sizes = [8, 32], strides = [1, 1]} : vector<8x64xf32> to vector<8x32xf32>
    %459 = vector.extract_strided_slice %447 {offsets = [0, 64], sizes = [8, 32], strides = [1, 1]} : vector<8x96xf32> to vector<8x32xf32>
    %460 = vector.extract_strided_slice %409 {offsets = [0, 64], sizes = [8, 32], strides = [1, 1]} : vector<8x96xf32> to vector<8x32xf32>
    %461 = vector.broadcast %448 : vector<1x32xf32> to vector<8x32xf32>
    %462 = arith.addf %460, %461 : vector<8x32xf32>
    %463 = arith.mulf %457, %462 : vector<8x32xf32>
    %464 = arith.addf %459, %463 : vector<8x32xf32>
    %465 = math.tanh %464 : vector<8x32xf32>
    %cst_199 = arith.constant 1.000000e+00 : f32
    %466 = vector.broadcast %cst_199 : f32 to vector<8x32xf32>
    %467 = arith.subf %466, %458 : vector<8x32xf32>
    %468 = arith.mulf %467, %465 : vector<8x32xf32>
    %469 = arith.mulf %458, %403 : vector<8x32xf32>
    %470 = arith.addf %468, %469 : vector<8x32xf32>
    %c16_200 = arith.constant 16 : index
    %c0_201 = arith.constant 0 : index
    %471 = vector.load %arg22[%c16_200, %c0_201] : memref<40x96xf32, #tpu.memory_space<vmem>>, vector<8x32xf32>
    tpu.vector_store %arg22[%c16_200, %c0_201], %470 {strides = array<i32>} : memref<40x96xf32, #tpu.memory_space<vmem>>, vector<8x32xf32>,
    %c16_202 = arith.constant 16 : index
    %c32_203 = arith.constant 32 : index
    %472 = vector.load %arg22[%c16_202, %c32_203] : memref<40x96xf32, #tpu.memory_space<vmem>>, vector<8x64xf32>
    tpu.vector_store %arg22[%c16_202, %c32_203], %443 {strides = array<i32>} : memref<40x96xf32, #tpu.memory_space<vmem>>, vector<8x64xf32>,
    %c0_204 = arith.constant 0 : index
    %c0_205 = arith.constant 0 : index
    %473 = vector.load %arg8[%c0_204, %c0_205] : memref<32x128xf32, #tpu.memory_space<vmem>>, vector<32x128xf32>
    %cst_206 = arith.constant dense<0.000000e+00> : vector<8x128xf32>
    %474 = tpu.matmul %470, %473, %cst_206 {dimension_numbers = #tpu.dot_dimension_numbers<[1], [0], [0], [1], [0, 0, 1, 1], [], []>} : vector<8x32xf32>, vector<32x128xf32>, vector<8x128xf32> -> vector<8x128xf32>
    %475 = vector.extract_strided_slice %474 {offsets = [0, 0], sizes = [8, 32], strides = [1, 1]} : vector<8x128xf32> to vector<8x32xf32>
    %476 = vector.extract_strided_slice %474 {offsets = [0, 32], sizes = [8, 96], strides = [1, 1]} : vector<8x128xf32> to vector<8x96xf32>
    %c0_207 = arith.constant 0 : index
    %c0_208 = arith.constant 0 : index
    %477 = vector.load %arg21[%c0_207, %c0_208] : memref<64x32xf32, #tpu.memory_space<vmem>>, vector<64x32xf32>
    %cst_209 = arith.constant dense<0.000000e+00> : vector<64x32xf32>
    %478 = tpu.matmul %271, %475, %cst_209 {dimension_numbers = #tpu.dot_dimension_numbers<[1], [0], [0], [1], [0, 0, 1, 1], [], []>} : vector<64x8xf32>, vector<8x32xf32>, vector<64x32xf32> -> vector<64x32xf32>
    %479 = arith.addf %477, %478 : vector<64x32xf32>
    %480 = math.tanh %479 : vector<64x32xf32>
    %c0_210 = arith.constant 0 : index
    %c0_211 = arith.constant 0 : index
    %481 = vector.load %arg10[%c0_210, %c0_211] : memref<1x32xf32, #tpu.memory_space<vmem>>, vector<1x32xf32>
    %482 = vector.broadcast %481 : vector<1x32xf32> to vector<64x32xf32>
    %483 = arith.mulf %480, %482 : vector<64x32xf32>
    %cst_212 = arith.constant dense<0.000000e+00> : vector<64xf32>
    %484 = vector.multi_reduction <add>, %483, %cst_212 [1] : vector<64x32xf32> to vector<64xf32>
    %485 = vector.shape_cast %484 : vector<64xf32> to vector<64x1xf32>
    %486 = vector.extract_strided_slice %485 {offsets = [0, 0], sizes = [8, 1], strides = [1, 1]} : vector<64x1xf32> to vector<8x1xf32>
    %487 = vector.extract_strided_slice %485 {offsets = [8, 0], sizes = [8, 1], strides = [1, 1]} : vector<64x1xf32> to vector<8x1xf32>
    %488 = arith.maximumf %486, %487 : vector<8x1xf32>
    %489 = vector.extract_strided_slice %485 {offsets = [16, 0], sizes = [8, 1], strides = [1, 1]} : vector<64x1xf32> to vector<8x1xf32>
    %490 = arith.maximumf %488, %489 : vector<8x1xf32>
    %491 = vector.extract_strided_slice %485 {offsets = [24, 0], sizes = [8, 1], strides = [1, 1]} : vector<64x1xf32> to vector<8x1xf32>
    %492 = arith.maximumf %490, %491 : vector<8x1xf32>
    %493 = vector.extract_strided_slice %485 {offsets = [32, 0], sizes = [8, 1], strides = [1, 1]} : vector<64x1xf32> to vector<8x1xf32>
    %494 = arith.maximumf %492, %493 : vector<8x1xf32>
    %495 = vector.extract_strided_slice %485 {offsets = [40, 0], sizes = [8, 1], strides = [1, 1]} : vector<64x1xf32> to vector<8x1xf32>
    %496 = arith.maximumf %494, %495 : vector<8x1xf32>
    %497 = vector.extract_strided_slice %485 {offsets = [48, 0], sizes = [8, 1], strides = [1, 1]} : vector<64x1xf32> to vector<8x1xf32>
    %498 = arith.maximumf %496, %497 : vector<8x1xf32>
    %499 = vector.extract_strided_slice %485 {offsets = [56, 0], sizes = [8, 1], strides = [1, 1]} : vector<64x1xf32> to vector<8x1xf32>
    %500 = arith.maximumf %498, %499 : vector<8x1xf32>
    %501 = tpu.concatenate %500, %500, %500, %500, %500, %500, %500, %500 in 0 : vector<8x1xf32>, vector<8x1xf32>, vector<8x1xf32>, vector<8x1xf32>, vector<8x1xf32>, vector<8x1xf32>, vector<8x1xf32>, vector<8x1xf32> -> vector<64x1xf32>
    %502 = arith.subf %485, %501 : vector<64x1xf32>
    %503 = math.exp %502 : vector<64x1xf32>
    %c0_213 = arith.constant 0 : index
    %c0_214 = arith.constant 0 : index
    %504 = vector.load %arg17[%c0_213, %c0_214] : memref<64x64xf32, #tpu.memory_space<vmem>>, vector<64x64xf32>
    %505 = vector.broadcast %503 : vector<64x1xf32> to vector<64x64xf32>
    %506 = arith.mulf %505, %504 : vector<64x64xf32>
    %cst_215 = arith.constant dense<0.000000e+00> : vector<8x64xf32>
    %507 = tpu.matmul %270, %506, %cst_215 {dimension_numbers = #tpu.dot_dimension_numbers<[1], [0], [0], [1], [0, 0, 1, 1], [], []>} : vector<8x64xf32>, vector<64x64xf32>, vector<8x64xf32> -> vector<8x64xf32>
    %cst_216 = arith.constant dense<0.000000e+00> : vector<8x1xf32>
    %508 = tpu.matmul %270, %503, %cst_216 {dimension_numbers = #tpu.dot_dimension_numbers<[1], [0], [0], [1], [0, 0, 1, 1], [], []>} : vector<8x64xf32>, vector<64x1xf32>, vector<8x1xf32> -> vector<8x1xf32>
    %509 = vector.broadcast %508 : vector<8x1xf32> to vector<8x64xf32>
    %510 = arith.divf %507, %509 : vector<8x64xf32>
    %c24_217 = arith.constant 24 : index
    %c0_218 = arith.constant 0 : index
    %511 = vector.load %arg20[%c24_217, %c0_218] : memref<48x112xf32, #tpu.memory_space<vmem>>, vector<8x96xf32>
    %c0_219 = arith.constant 0 : index
    %c0_220 = arith.constant 0 : index
    %512 = vector.load %arg13[%c0_219, %c0_220] : memref<64x96xf32, #tpu.memory_space<vmem>>, vector<64x96xf32>
    %cst_221 = arith.constant dense<0.000000e+00> : vector<8x96xf32>
    %513 = tpu.matmul %510, %512, %cst_221 {dimension_numbers = #tpu.dot_dimension_numbers<[1], [0], [0], [1], [0, 0, 1, 1], [], []>} : vector<8x64xf32>, vector<64x96xf32>, vector<8x96xf32> -> vector<8x96xf32>
    %514 = arith.addf %511, %513 : vector<8x96xf32>
    %c0_222 = arith.constant 0 : index
    %c0_223 = arith.constant 0 : index
    %515 = vector.load %arg14[%c0_222, %c0_223] : memref<1x32xf32, #tpu.memory_space<vmem>>, vector<1x32xf32>
    %516 = vector.extract_strided_slice %514 {offsets = [0, 0], sizes = [8, 64], strides = [1, 1]} : vector<8x96xf32> to vector<8x64xf32>
    %517 = vector.extract_strided_slice %476 {offsets = [0, 0], sizes = [8, 64], strides = [1, 1]} : vector<8x96xf32> to vector<8x64xf32>
    %518 = arith.addf %516, %517 : vector<8x64xf32>
    %519 = arith.negf %518 : vector<8x64xf32>
    %520 = math.exp %519 : vector<8x64xf32>
    %cst_224 = arith.constant 1.000000e+00 : f32
    %521 = vector.broadcast %cst_224 : f32 to vector<8x64xf32>
    %522 = arith.addf %521, %520 : vector<8x64xf32>
    %523 = arith.divf %521, %522 : vector<8x64xf32>
    %524 = vector.extract_strided_slice %523 {offsets = [0, 0], sizes = [8, 32], strides = [1, 1]} : vector<8x64xf32> to vector<8x32xf32>
    %525 = vector.extract_strided_slice %523 {offsets = [0, 32], sizes = [8, 32], strides = [1, 1]} : vector<8x64xf32> to vector<8x32xf32>
    %526 = vector.extract_strided_slice %514 {offsets = [0, 64], sizes = [8, 32], strides = [1, 1]} : vector<8x96xf32> to vector<8x32xf32>
    %527 = vector.extract_strided_slice %476 {offsets = [0, 64], sizes = [8, 32], strides = [1, 1]} : vector<8x96xf32> to vector<8x32xf32>
    %528 = vector.broadcast %515 : vector<1x32xf32> to vector<8x32xf32>
    %529 = arith.addf %527, %528 : vector<8x32xf32>
    %530 = arith.mulf %524, %529 : vector<8x32xf32>
    %531 = arith.addf %526, %530 : vector<8x32xf32>
    %532 = math.tanh %531 : vector<8x32xf32>
    %cst_225 = arith.constant 1.000000e+00 : f32
    %533 = vector.broadcast %cst_225 : f32 to vector<8x32xf32>
    %534 = arith.subf %533, %525 : vector<8x32xf32>
    %535 = arith.mulf %534, %532 : vector<8x32xf32>
    %536 = arith.mulf %525, %470 : vector<8x32xf32>
    %537 = arith.addf %535, %536 : vector<8x32xf32>
    %c24_226 = arith.constant 24 : index
    %c0_227 = arith.constant 0 : index
    %538 = vector.load %arg22[%c24_226, %c0_227] : memref<40x96xf32, #tpu.memory_space<vmem>>, vector<8x32xf32>
    tpu.vector_store %arg22[%c24_226, %c0_227], %537 {strides = array<i32>} : memref<40x96xf32, #tpu.memory_space<vmem>>, vector<8x32xf32>,
    %c24_228 = arith.constant 24 : index
    %c32_229 = arith.constant 32 : index
    %539 = vector.load %arg22[%c24_228, %c32_229] : memref<40x96xf32, #tpu.memory_space<vmem>>, vector<8x64xf32>
    tpu.vector_store %arg22[%c24_228, %c32_229], %510 {strides = array<i32>} : memref<40x96xf32, #tpu.memory_space<vmem>>, vector<8x64xf32>,
    %c0_230 = arith.constant 0 : index
    %c0_231 = arith.constant 0 : index
    %540 = vector.load %arg8[%c0_230, %c0_231] : memref<32x128xf32, #tpu.memory_space<vmem>>, vector<32x128xf32>
    %cst_232 = arith.constant dense<0.000000e+00> : vector<8x128xf32>
    %541 = tpu.matmul %537, %540, %cst_232 {dimension_numbers = #tpu.dot_dimension_numbers<[1], [0], [0], [1], [0, 0, 1, 1], [], []>} : vector<8x32xf32>, vector<32x128xf32>, vector<8x128xf32> -> vector<8x128xf32>
    %542 = vector.extract_strided_slice %541 {offsets = [0, 0], sizes = [8, 32], strides = [1, 1]} : vector<8x128xf32> to vector<8x32xf32>
    %543 = vector.extract_strided_slice %541 {offsets = [0, 32], sizes = [8, 96], strides = [1, 1]} : vector<8x128xf32> to vector<8x96xf32>
    %c0_233 = arith.constant 0 : index
    %c0_234 = arith.constant 0 : index
    %544 = vector.load %arg21[%c0_233, %c0_234] : memref<64x32xf32, #tpu.memory_space<vmem>>, vector<64x32xf32>
    %cst_235 = arith.constant dense<0.000000e+00> : vector<64x32xf32>
    %545 = tpu.matmul %271, %542, %cst_235 {dimension_numbers = #tpu.dot_dimension_numbers<[1], [0], [0], [1], [0, 0, 1, 1], [], []>} : vector<64x8xf32>, vector<8x32xf32>, vector<64x32xf32> -> vector<64x32xf32>
    %546 = arith.addf %544, %545 : vector<64x32xf32>
    %547 = math.tanh %546 : vector<64x32xf32>
    %c0_236 = arith.constant 0 : index
    %c0_237 = arith.constant 0 : index
    %548 = vector.load %arg10[%c0_236, %c0_237] : memref<1x32xf32, #tpu.memory_space<vmem>>, vector<1x32xf32>
    %549 = vector.broadcast %548 : vector<1x32xf32> to vector<64x32xf32>
    %550 = arith.mulf %547, %549 : vector<64x32xf32>
    %cst_238 = arith.constant dense<0.000000e+00> : vector<64xf32>
    %551 = vector.multi_reduction <add>, %550, %cst_238 [1] : vector<64x32xf32> to vector<64xf32>
    %552 = vector.shape_cast %551 : vector<64xf32> to vector<64x1xf32>
    %553 = vector.extract_strided_slice %552 {offsets = [0, 0], sizes = [8, 1], strides = [1, 1]} : vector<64x1xf32> to vector<8x1xf32>
    %554 = vector.extract_strided_slice %552 {offsets = [8, 0], sizes = [8, 1], strides = [1, 1]} : vector<64x1xf32> to vector<8x1xf32>
    %555 = arith.maximumf %553, %554 : vector<8x1xf32>
    %556 = vector.extract_strided_slice %552 {offsets = [16, 0], sizes = [8, 1], strides = [1, 1]} : vector<64x1xf32> to vector<8x1xf32>
    %557 = arith.maximumf %555, %556 : vector<8x1xf32>
    %558 = vector.extract_strided_slice %552 {offsets = [24, 0], sizes = [8, 1], strides = [1, 1]} : vector<64x1xf32> to vector<8x1xf32>
    %559 = arith.maximumf %557, %558 : vector<8x1xf32>
    %560 = vector.extract_strided_slice %552 {offsets = [32, 0], sizes = [8, 1], strides = [1, 1]} : vector<64x1xf32> to vector<8x1xf32>
    %561 = arith.maximumf %559, %560 : vector<8x1xf32>
    %562 = vector.extract_strided_slice %552 {offsets = [40, 0], sizes = [8, 1], strides = [1, 1]} : vector<64x1xf32> to vector<8x1xf32>
    %563 = arith.maximumf %561, %562 : vector<8x1xf32>
    %564 = vector.extract_strided_slice %552 {offsets = [48, 0], sizes = [8, 1], strides = [1, 1]} : vector<64x1xf32> to vector<8x1xf32>
    %565 = arith.maximumf %563, %564 : vector<8x1xf32>
    %566 = vector.extract_strided_slice %552 {offsets = [56, 0], sizes = [8, 1], strides = [1, 1]} : vector<64x1xf32> to vector<8x1xf32>
    %567 = arith.maximumf %565, %566 : vector<8x1xf32>
    %568 = tpu.concatenate %567, %567, %567, %567, %567, %567, %567, %567 in 0 : vector<8x1xf32>, vector<8x1xf32>, vector<8x1xf32>, vector<8x1xf32>, vector<8x1xf32>, vector<8x1xf32>, vector<8x1xf32>, vector<8x1xf32> -> vector<64x1xf32>
    %569 = arith.subf %552, %568 : vector<64x1xf32>
    %570 = math.exp %569 : vector<64x1xf32>
    %c0_239 = arith.constant 0 : index
    %c0_240 = arith.constant 0 : index
    %571 = vector.load %arg17[%c0_239, %c0_240] : memref<64x64xf32, #tpu.memory_space<vmem>>, vector<64x64xf32>
    %572 = vector.broadcast %570 : vector<64x1xf32> to vector<64x64xf32>
    %573 = arith.mulf %572, %571 : vector<64x64xf32>
    %cst_241 = arith.constant dense<0.000000e+00> : vector<8x64xf32>
    %574 = tpu.matmul %270, %573, %cst_241 {dimension_numbers = #tpu.dot_dimension_numbers<[1], [0], [0], [1], [0, 0, 1, 1], [], []>} : vector<8x64xf32>, vector<64x64xf32>, vector<8x64xf32> -> vector<8x64xf32>
    %cst_242 = arith.constant dense<0.000000e+00> : vector<8x1xf32>
    %575 = tpu.matmul %270, %570, %cst_242 {dimension_numbers = #tpu.dot_dimension_numbers<[1], [0], [0], [1], [0, 0, 1, 1], [], []>} : vector<8x64xf32>, vector<64x1xf32>, vector<8x1xf32> -> vector<8x1xf32>
    %576 = vector.broadcast %575 : vector<8x1xf32> to vector<8x64xf32>
    %577 = arith.divf %574, %576 : vector<8x64xf32>
    %c32_243 = arith.constant 32 : index
    %c0_244 = arith.constant 0 : index
    %578 = vector.load %arg20[%c32_243, %c0_244] : memref<48x112xf32, #tpu.memory_space<vmem>>, vector<8x96xf32>
    %c0_245 = arith.constant 0 : index
    %c0_246 = arith.constant 0 : index
    %579 = vector.load %arg13[%c0_245, %c0_246] : memref<64x96xf32, #tpu.memory_space<vmem>>, vector<64x96xf32>
    %cst_247 = arith.constant dense<0.000000e+00> : vector<8x96xf32>
    %580 = tpu.matmul %577, %579, %cst_247 {dimension_numbers = #tpu.dot_dimension_numbers<[1], [0], [0], [1], [0, 0, 1, 1], [], []>} : vector<8x64xf32>, vector<64x96xf32>, vector<8x96xf32> -> vector<8x96xf32>
    %581 = arith.addf %578, %580 : vector<8x96xf32>
    %c0_248 = arith.constant 0 : index
    %c0_249 = arith.constant 0 : index
    %582 = vector.load %arg14[%c0_248, %c0_249] : memref<1x32xf32, #tpu.memory_space<vmem>>, vector<1x32xf32>
    %583 = vector.extract_strided_slice %581 {offsets = [0, 0], sizes = [8, 64], strides = [1, 1]} : vector<8x96xf32> to vector<8x64xf32>
    %584 = vector.extract_strided_slice %543 {offsets = [0, 0], sizes = [8, 64], strides = [1, 1]} : vector<8x96xf32> to vector<8x64xf32>
    %585 = arith.addf %583, %584 : vector<8x64xf32>
    %586 = arith.negf %585 : vector<8x64xf32>
    %587 = math.exp %586 : vector<8x64xf32>
    %cst_250 = arith.constant 1.000000e+00 : f32
    %588 = vector.broadcast %cst_250 : f32 to vector<8x64xf32>
    %589 = arith.addf %588, %587 : vector<8x64xf32>
    %590 = arith.divf %588, %589 : vector<8x64xf32>
    %591 = vector.extract_strided_slice %590 {offsets = [0, 0], sizes = [8, 32], strides = [1, 1]} : vector<8x64xf32> to vector<8x32xf32>
    %592 = vector.extract_strided_slice %590 {offsets = [0, 32], sizes = [8, 32], strides = [1, 1]} : vector<8x64xf32> to vector<8x32xf32>
    %593 = vector.extract_strided_slice %581 {offsets = [0, 64], sizes = [8, 32], strides = [1, 1]} : vector<8x96xf32> to vector<8x32xf32>
    %594 = vector.extract_strided_slice %543 {offsets = [0, 64], sizes = [8, 32], strides = [1, 1]} : vector<8x96xf32> to vector<8x32xf32>
    %595 = vector.broadcast %582 : vector<1x32xf32> to vector<8x32xf32>
    %596 = arith.addf %594, %595 : vector<8x32xf32>
    %597 = arith.mulf %591, %596 : vector<8x32xf32>
    %598 = arith.addf %593, %597 : vector<8x32xf32>
    %599 = math.tanh %598 : vector<8x32xf32>
    %cst_251 = arith.constant 1.000000e+00 : f32
    %600 = vector.broadcast %cst_251 : f32 to vector<8x32xf32>
    %601 = arith.subf %600, %592 : vector<8x32xf32>
    %602 = arith.mulf %601, %599 : vector<8x32xf32>
    %603 = arith.mulf %592, %537 : vector<8x32xf32>
    %604 = arith.addf %602, %603 : vector<8x32xf32>
    %c32_252 = arith.constant 32 : index
    %c0_253 = arith.constant 0 : index
    %605 = vector.load %arg22[%c32_252, %c0_253] : memref<40x96xf32, #tpu.memory_space<vmem>>, vector<8x32xf32>
    tpu.vector_store %arg22[%c32_252, %c0_253], %604 {strides = array<i32>} : memref<40x96xf32, #tpu.memory_space<vmem>>, vector<8x32xf32>,
    %c32_254 = arith.constant 32 : index
    %c32_255 = arith.constant 32 : index
    %606 = vector.load %arg22[%c32_254, %c32_255] : memref<40x96xf32, #tpu.memory_space<vmem>>, vector<8x64xf32>
    tpu.vector_store %arg22[%c32_254, %c32_255], %577 {strides = array<i32>} : memref<40x96xf32, #tpu.memory_space<vmem>>, vector<8x64xf32>,
    %c0_256 = arith.constant 0 : index
    %c0_257 = arith.constant 0 : index
    %607 = vector.load %arg22[%c0_256, %c0_257] : memref<40x96xf32, #tpu.memory_space<vmem>>, vector<40x96xf32>
    %c0_258 = arith.constant 0 : index
    %c0_259 = arith.constant 0 : index
    %608 = vector.load %arg15[%c0_258, %c0_259] : memref<96x16xf32, #tpu.memory_space<vmem>>, vector<96x16xf32>
    %cst_260 = arith.constant dense<0.000000e+00> : vector<40x16xf32>
    %609 = tpu.matmul %607, %608, %cst_260 {dimension_numbers = #tpu.dot_dimension_numbers<[1], [0], [0], [1], [0, 0, 1, 1], [], []>} : vector<40x96xf32>, vector<96x16xf32>, vector<40x16xf32> -> vector<40x16xf32>
    %c0_261 = arith.constant 0 : index
    %c96 = arith.constant 96 : index
    %610 = vector.load %arg20[%c0_261, %c96] : memref<48x112xf32, #tpu.memory_space<vmem>>, vector<40x16xf32>
    %611 = arith.addf %609, %610 : vector<40x16xf32>
    %c0_262 = arith.constant 0 : index
    %c0_263 = arith.constant 0 : index
    %612 = vector.load %arg16[%c0_262, %c0_263] : memref<1x16xf32, #tpu.memory_space<vmem>>, vector<1x16xf32>
    %613 = vector.broadcast %612 : vector<1x16xf32> to vector<40x16xf32>
    %614 = arith.addf %611, %613 : vector<40x16xf32>
    %cst_264 = arith.constant 0.000000e+00 : f32
    %615 = vector.broadcast %cst_264 : f32 to vector<8x16xf32>
    %c0_265 = arith.constant 0 : index
    %c0_266 = arith.constant 0 : index
    %616 = vector.load %arg18[%c0_265, %c0_266] : memref<48x16xf32, #tpu.memory_space<vmem>>, vector<8x16xf32>
    tpu.vector_store %arg18[%c0_265, %c0_266], %615 {strides = array<i32>} : memref<48x16xf32, #tpu.memory_space<vmem>>, vector<8x16xf32>,
    %c8_267 = arith.constant 8 : index
    %c0_268 = arith.constant 0 : index
    %617 = vector.load %arg18[%c8_267, %c0_268] : memref<48x16xf32, #tpu.memory_space<vmem>>, vector<40x16xf32>
    tpu.vector_store %arg18[%c8_267, %c0_268], %614 {strides = array<i32>} : memref<48x16xf32, #tpu.memory_space<vmem>>, vector<40x16xf32>,
    return
  }
}

</mosaic_0001>

<bundles_post_ra>
// kernel: tpu_custom_call.1
= control target key start
LH: loop header
LB: loop body
LE: loop exit
PB: predicated region body
PF: predicated region fallthrough
CT: control target
= control target key end

     0   :  { %s5033_s0 = inlined_call_operand.vmem [shape: f32[64,32], index: 0, kind: input, shape index: {}]   ;;  %s5034_s1 = inlined_call_operand.vmem [shape: f32[48,16], index: 1, kind: input, shape index: {}]   ;;  %s5035_s2 = inlined_call_operand.vmem [shape: f32[32,192], index: 2, kind: input, shape index: {}]   ;;  %s5036_s3 = inlined_call_operand.vmem [shape: f32[64,192], index: 3, kind: input, shape index: {}]   ;;  %s5037_s4 = inlined_call_operand.vmem [shape: f32[1,192], index: 4, kind: input, shape index: {}]   ;;  %s5038_s5 = inlined_call_operand.vmem [shape: f32[1,64], index: 5, kind: input, shape index: {}]   ;;  %s5039_s6 = inlined_call_operand.vmem [shape: f32[64,32], index: 6, kind: input, shape index: {}]   ;;  %s5040_s7 = inlined_call_operand.vmem [shape: f32[1,32], index: 7, kind: input, shape index: {}]   ;;  %s5041_s8 = inlined_call_operand.vmem [shape: f32[32,128], index: 8, kind: input, shape index: {}]   ;;  %s5042_s9 = inlined_call_operand.vmem [shape: f32[64,32], index: 9, kind: input, shape index: {}]   ;;  %s5043_s10 = inlined_call_operand.vmem [shape: f32[1,32], index: 10, kind: input, shape index: {}]   ;;  %s5044_s11 = inlined_call_operand.vmem [shape: f32[16,112], index: 11, kind: input, shape index: {}]   ;;  %s5045_s12 = inlined_call_operand.vmem [shape: f32[1,112], index: 12, kind: input, shape index: {}]   ;;  %s5046_s13 = inlined_call_operand.vmem [shape: f32[64,96], index: 13, kind: input, shape index: {}]   ;;  %s5047_s14 = inlined_call_operand.vmem [shape: f32[1,32], index: 14, kind: input, shape index: {}]   ;;  %s5048_s15 = inlined_call_operand.vmem [shape: f32[96,16], index: 15, kind: input, shape index: {}]   ;;  %s5049_s16 = inlined_call_operand.vmem [shape: f32[1,16], index: 16, kind: input, shape index: {}]   ;;  %s5050_s17 = inlined_call_operand.hbm [shape: f32[64,64], index: 17, kind: output, shape index: {0}]   ;;  %s5051_s18 = inlined_call_operand.vmem [shape: f32[48,16], index: 18, kind: output, shape index: {1}]  }
   0x1   :  { %5055 = sst [smem:[#allocation9_spill]] %s5033_s0 }
   0x2   :  { %5056 = sst [smem:[#allocation10_spill]] %s5034_s1 }
   0x3   :  { %5057 = sst [smem:[#allocation11_spill]] %s5035_s2 }
   0x4   :  { %s5058_s29 = sld [smem:[#allocation11_spill]]  ;;  %v3784_v1 = vld [vmem:[%s5036_s3 + $0x70] sm:$0xff]  ;;  %vm217_vm0 = vcmask 130048   ;;  %v3793_v3 = vld [vmem:[%s5036_s3 + $0x60] sm:$0xff]  ;;  %v3670_v4 = vmov 0.0   ;;  %vm81_vm1 = vcmask 261120  }
   0x5   :  { %307 = vmatpush.msra.mxu3 %v3784_v1  ;;  %3200 = vst.msk [vmem:[%s5051_s18] sm:$0xff] %vm217_vm0, %v3670_v4  ;;  %v3806_v6 = vld [vmem:[%s5036_s3 + $0x50] sm:$0xff]  ;;  %v3815_v8 = vld [vmem:[%s5036_s3 + $0x40] sm:$0xff]  ;;  %s5059_s20 = sld [smem:[#allocation9_spill]]  ;;  %v3856_v15 = vld [vmem:[%s5036_s3 + $0x78] sm:$0xff] }
   0x6   :  { %v3826_v10 = vld [vmem:[%s5036_s3 + $0x30] sm:$0xff]  ;;  %v3834_v11 = vld [vmem:[%s5036_s3 + $0x20] sm:$0xff] }
   0x7   :  { %308 = vmatpush.msra.mxu3 %v3793_v3  ;;  %v3839_v12 = vld [vmem:[%s5036_s3 + $0x10] sm:$0xff]  ;;  %v3845_v13 = vld [vmem:[%s5036_s3] sm:$0xff] }
   0x9   :  { %309 = vmatpush.msra.mxu3 %v3806_v6 }
   0xa   :  { %v73_v0 = vld [vmem:[%s5058_s29 + $0x30] sm:$0xff]  ;;  %v71_v2 = vld [vmem:[%s5058_s29 + $0x20] sm:$0xff] }
   0xb   :  { %118 = vmatpush.msra.mxu0 %v73_v0  ;;  %v69_v5 = vld [vmem:[%s5058_s29 + $0x10] sm:$0xff]  ;;  %v67_v7 = vld [vmem:[%s5058_s29] sm:$0xff]  ;;  %310 = vmatpush.msra.mxu3 %v3815_v8  ;;  %v3851_v14 = vld [vmem:[%s5059_s20 + $0x8] sm:$0xff] }
   0xc   :  { %v3821_v9 = vld [vmem:[%s5059_s20] sm:$0xff] }
   0xd   :  { %119 = vmatpush.msra.mxu0 %v71_v2  ;;  %311 = vmatpush.msra.mxu3 %v3826_v10 }
   0xf   :  { %120 = vmatpush.msra.mxu0 %v69_v5  ;;  %312 = vmatpush.msra.mxu3 %v3834_v11 }
  0x11   :  { %121 = vmatpush.msra.mxu0 %v67_v7  ;;  %313 = vmatpush.msra.mxu3 %v3839_v12 }
  0x12   :  { %3228 = vmatmul.msk.f32.vlgmr.msra.gmra.mxu0 %vm81_vm1, %v3821_v9 }
  0x13   :  { %314 = vmatpush.msra.mxu3 %v3845_v13 }
  0x14   :  { %24 = vsyncpa [#allocation7], 0  ;;  %315 = vmatmul.f32.vlgmr.msra.gmra.mxu3 %v3670_v4  ;;  %v3866_v16 = vld [vmem:[%s5036_s3 + $0x68] sm:$0xff]  ;;  %v3872_v17 = vld [vmem:[%s5036_s3 + $0x58] sm:$0xff]  ;;  %vm189_vm3 = vcmask 523264   ;;  %s3671_s28 = smov 64  }
  0x15   :  { %327 = vmatpush.msrb.mxu3 %v3856_v15  ;;  %v3878_v18 = vld [vmem:[%s5036_s3 + $0x48] sm:$0xff]  ;;  %v61_v19 = vld [vmem:[%s5059_s20 + $0x10] sm:$0xff]  ;;  %v3887_v20 = vld [vmem:[%s5036_s3 + $0x38] sm:$0xff]  ;;  %s5060_s22 = sld [smem:[#allocation10_spill]]  ;;  %vm271_vm7 = vcmask 916480   ;;  %vm380_vm8 = vcmask 523520  }
  0x16   :  { %v3894_v21 = vld [vmem:[%s5036_s3 + $0x28] sm:$0xff]  ;;  %v3900_v22 = vld [vmem:[%s5036_s3 + $0x18] sm:$0xff]  ;;  %v63_v29 = vld [vmem:[%s5059_s20 + $0x20] sm:$0xff]  ;;  %s3674_s27 = smov 8   ;;  %s3675_s30 = smov 32  }
  0x17   :  { %328 = vmatpush.msrb.mxu3 %v3866_v16  ;;  %v3906_v23 = vld [vmem:[%s5036_s3 + $0x8] sm:$0xff]  ;;  %v62_v24 = vld [vmem:[%s5059_s20 + $0x18] sm:$0xff]  ;;  %v65_v31 = vld [vmem:[%s5059_s20 + $0x30] sm:$0xff]  ;;  %s3677_s1 = smov 56   ;;  %s3680_s21 = smov 96  }
  0x18   :  { %v74_v25 = vld [vmem:[%s5058_s29 + $0x38] sm:$0xff]  ;;  %v72_v26 = vld [vmem:[%s5058_s29 + $0x28] sm:$0xff]  ;;  %v75_v33 = vld [vmem:[%s5037_s4] sm:$0x3]  ;;  %s3682_s2 = smov 128  }
  0x19   :  { %329 = vmatpush.msrb.mxu3 %v3872_v17  ;;  %159 = vmatpush.msrb.mxu0 %v74_v25  ;;  %v70_v27 = vld [vmem:[%s5058_s29 + $0x18] sm:$0xff]  ;;  %v68_v28 = vld [vmem:[%s5058_s29 + $0x8] sm:$0xff]  ;;  %v77_v34 = vperm.slane %v75_v33, 0  ;;  %v4016_v60 = vperm.slane %v75_v33, 1  ;;  %v3373_v2 = vld [vmem:[%s5038_s5] ss:$0 sm:$0xff] }
  0x1a   :  { %3229 = vmatmul.msk.f32.gmra.mxu0 %vm81_vm1, %v3851_v14  ;;  %3352 = vmatpush.msra.mxu1 %v74_v25  ;;  %v64_v30 = vld [vmem:[%s5059_s20 + $0x28] sm:$0xff]  ;;  %v66_v32 = vld [vmem:[%s5059_s20 + $0x38] sm:$0xff]  ;;  %s3212_s29 = sshll.u32 %s5050_s17, 4  ;;  %s3213_s29 = int_to_ptr.hbm [resolvable:$true] %s3212_s29 }
  0x1b   :  { %330 = vmatpush.msrb.mxu3 %v3878_v18  ;;  %160 = vmatpush.msrb.mxu0 %v72_v26  ;;  %v207_v33 = vld [vmem:[%s5060_s22 + $0x10] sm:$0xff] }
  0x1c   :  { %3353 = vmatpush.msra.mxu1 %v72_v26 }
  0x1d   :  { %331 = vmatpush.msrb.mxu3 %v3887_v20  ;;  %161 = vmatpush.msrb.mxu0 %v70_v27 }
  0x1e   :  { %3354 = vmatpush.msra.mxu1 %v70_v27 }
  0x1f   :  { %332 = vmatpush.msrb.mxu3 %v3894_v21  ;;  %162 = vmatpush.msrb.mxu0 %v68_v28 }
  0x20   :  { %3355 = vmatpush.msra.mxu1 %v68_v28 }
  0x21   :  { %333 = vmatpush.msrb.mxu3 %v3900_v22  ;;  %3238 = vmatmul.msk.f32.vlgmr.msra.gmra.mxu1 %vm81_vm1, %v61_v19 }
  0x22   :  { %3230 = vmatmul.msk.f32.gmra.mxu0 %vm81_vm1, %v61_v19  ;;  %634 = vmatpush.msrb.mxu1 %v3856_v15 }
  0x23   :  { %334 = vmatpush.msrb.mxu3 %v3906_v23  ;;  %614 = vmatpush.msra.mxu0 %v3784_v1 }
  0x24   :  { %335 = vmatmul.f32.vlgmr.msrb.gmra.mxu3 %v3670_v4  ;;  %635 = vmatpush.msrb.mxu1 %v3866_v16 }
  0x25   :  { %410 = vmatpush.msra.mxu3 %v3784_v1  ;;  %615 = vmatpush.msra.mxu0 %v3793_v3 }
  0x26   :  { %636 = vmatpush.msrb.mxu1 %v3872_v17 }
  0x27   :  { %411 = vmatpush.msra.mxu3 %v3793_v3  ;;  %616 = vmatpush.msra.mxu0 %v3806_v6 }
  0x28   :  { %637 = vmatpush.msrb.mxu1 %v3878_v18 }
  0x29   :  { %412 = vmatpush.msra.mxu3 %v3806_v6  ;;  %3239 = vmatmul.msk.f32.gmra.mxu1 %vm81_vm1, %v62_v24 }
  0x2a   :  { %3231 = vmatmul.msk.f32.gmra.mxu0 %vm81_vm1, %v62_v24  ;;  %638 = vmatpush.msrb.mxu1 %v3887_v20 }
  0x2b   :  { %413 = vmatpush.msra.mxu3 %v3815_v8  ;;  %617 = vmatpush.msra.mxu0 %v3815_v8 }
  0x2c   :  { %639 = vmatpush.msrb.mxu1 %v3894_v21 }
  0x2d   :  { %414 = vmatpush.msra.mxu3 %v3826_v10  ;;  %618 = vmatpush.msra.mxu0 %v3826_v10 }
  0x2e   :  { %640 = vmatpush.msrb.mxu1 %v3900_v22 }
  0x2f   :  { %415 = vmatpush.msra.mxu3 %v3834_v11  ;;  %619 = vmatpush.msra.mxu0 %v3834_v11 }
  0x30   :  { %641 = vmatpush.msrb.mxu1 %v3906_v23 }
  0x31   :  { %416 = vmatpush.msra.mxu3 %v3839_v12  ;;  %620 = vmatpush.msra.mxu0 %v3839_v12 }
  0x32   :  { %3232 = vmatmul.msk.f32.gmra.mxu0 %vm81_vm1, %v63_v29  ;;  %3240 = vmatmul.msk.f32.gmra.mxu1 %vm81_vm1, %v63_v29  ;;  %v212_v29 = vld [vmem:[%s5044_s11 + $0x8] sm:$0xff] }
  0x33   :  { %417 = vmatpush.msra.mxu3 %v3845_v13  ;;  %621 = vmatpush.msra.mxu0 %v3845_v13 }
  0x34   :  { %838 = vmatpush.msra.mxu1 %v3856_v15  ;;  %250 = vmatpush.msra.mxu2 %v212_v29 }
  0x35   :  { %512 = vmatpush.msrb.mxu3 %v3784_v1 }
  0x36   :  { %839 = vmatpush.msra.mxu1 %v3866_v16 }
  0x37   :  { %513 = vmatpush.msrb.mxu3 %v3793_v3 }
  0x38   :  { %840 = vmatpush.msra.mxu1 %v3872_v17 }
  0x39   :  { %514 = vmatpush.msrb.mxu3 %v3806_v6 }
  0x3a   :  { %3233 = vmatmul.msk.f32.gmra.mxu0 %vm81_vm1, %v64_v30  ;;  %3241 = vmatmul.msk.f32.gmra.mxu1 %vm81_vm1, %v64_v30  ;;  %v211_v30 = vld [vmem:[%s5044_s11] sm:$0xff] }
  0x3b   :  { %515 = vmatpush.msrb.mxu3 %v3815_v8  ;;  %841 = vmatpush.msra.mxu1 %v3878_v18 }
  0x3c   :  { %251 = vmatpush.msra.mxu2 %v211_v30 }
  0x3d   :  { %516 = vmatpush.msrb.mxu3 %v3826_v10  ;;  %842 = vmatpush.msra.mxu1 %v3887_v20 }
  0x3e   :  { %430 = vmatpush.msrb.mxu2 %v3856_v15 }
  0x3f   :  { %517 = vmatpush.msrb.mxu3 %v3834_v11  ;;  %843 = vmatpush.msra.mxu1 %v3894_v21 }
  0x40   :  { %431 = vmatpush.msrb.mxu2 %v3866_v16 }
  0x41   :  { %518 = vmatpush.msrb.mxu3 %v3839_v12  ;;  %844 = vmatpush.msra.mxu1 %v3900_v22 }
  0x42   :  { %3234 = vmatmul.msk.f32.gmra.mxu0 %vm81_vm1, %v65_v31  ;;  %3242 = vmatmul.msk.f32.gmra.mxu1 %vm81_vm1, %v65_v31  ;;  %v205_v31 = vld [vmem:[%s5060_s22] sm:$0xff] }
  0x43   :  { %519 = vmatpush.msrb.mxu3 %v3845_v13  ;;  %845 = vmatpush.msra.mxu1 %v3906_v23 }
  0x44   :  { %3244 = vmatmul.msk.f32.vlgmr.msra.gmra.mxu2 %vm217_vm0, %v205_v31 }
  0x45   :  { %432 = vmatpush.msrb.mxu2 %v3872_v17 }
  0x47   :  { %433 = vmatpush.msrb.mxu2 %v3878_v18 }
  0x49   :  { %434 = vmatpush.msrb.mxu2 %v3887_v20 }
  0x4a   :  { %3235 = vmatmul.msk.f32.gmra.mxu0 %vm81_vm1, %v66_v32  ;;  %3243 = vmatmul.msk.f32.gmra.mxu1 %vm81_vm1, %v66_v32  ;;  %v206_v32 = vld [vmem:[%s5060_s22 + $0x8] sm:$0xff] }
  0x4b   :  { %435 = vmatpush.msrb.mxu2 %v3894_v21 }
  0x4c   :  { %3245 = vmatmul.msk.f32.gmra.mxu2 %vm217_vm0, %v206_v32 }
  0x4d   :  { %436 = vmatpush.msrb.mxu2 %v3900_v22 }
  0x4f   :  { %437 = vmatpush.msrb.mxu2 %v3906_v23 }
  0x51   :  { %532 = vmatpush.msra.mxu2 %v3856_v15 }
  0x52   :  { %3236 = vmatmul.msk.f32.vlgmr.msrb.gmra.mxu0 %vm81_vm1, %v3821_v9 }
  0x53   :  { %818 = vmatpush.msrb.mxu0 %v3784_v1  ;;  %533 = vmatpush.msra.mxu2 %v3866_v16 }
  0x54   :  { %3246 = vmatmul.msk.f32.gmra.mxu2 %vm217_vm0, %v207_v33 }
  0x55   :  { %819 = vmatpush.msrb.mxu0 %v3793_v3  ;;  %534 = vmatpush.msra.mxu2 %v3872_v17 }
  0x57   :  { %820 = vmatpush.msrb.mxu0 %v3806_v6  ;;  %535 = vmatpush.msra.mxu2 %v3878_v18 }
  0x59   :  { %821 = vmatpush.msrb.mxu0 %v3815_v8  ;;  %536 = vmatpush.msra.mxu2 %v3887_v20 }
  0x5a   :  { %3237 = vmatmul.msk.f32.gmra.mxu0 %vm81_vm1, %v3851_v14 }
  0x5b   :  { %822 = vmatpush.msrb.mxu0 %v3826_v10  ;;  %537 = vmatpush.msra.mxu2 %v3894_v21 }
  0x5d   :  { %823 = vmatpush.msrb.mxu0 %v3834_v11  ;;  %538 = vmatpush.msra.mxu2 %v3900_v22 }
  0x5f   :  { %824 = vmatpush.msrb.mxu0 %v3839_v12  ;;  %539 = vmatpush.msra.mxu2 %v3906_v23 }
  0x61   :  { %825 = vmatpush.msrb.mxu0 %v3845_v13 }
  0x8f   :  { %v123_v35 = vpop.f32.mrf.mxu0 }
  0x90   :  { %v124_v36 = vadd.f32 %v123_v35, %v77_v34 }
  0x97   :  { %v126_v37 = vpop.f32.mrf.mxu0  ;;  %v316_v41 = vpop.f32.mrf.mxu3 }
  0x98   :  { %v4004_v38 = vadd.f32 %v126_v37, %v77_v34  ;;  %v340_v42 = vadd.f32 %v316_v41, %v124_v36 }
  0x9a   :  { %v3250_v44 = vmul.f32 -1.442695, %v340_v42  ;;  %v209_v42 = vld [vmem:[%s5060_s22 + $0x20] sm:$0xff] }
  0x9c   :  { %3394 = vpow2.f32 %v3250_v44  ;;  %v3374_v44 = vld [vmem:[%s5045_s12] ss:$0 sm:$0xff]  ;;  %s3676_s12 = smov 40  }
  0x9f   :  { %v129_v39 = vpop.f32.mrf.mxu0 }
  0xa0   :  { %v4006_v40 = vadd.f32 %v129_v39, %v77_v34 }
  0xa2   :  { %v3395_v48 = vpop.eup %3394 }
  0xa3   :  { %v344_v49 = vadd.f32 1.0, %v3395_v48 }
  0xa5   :  { %3396 = vrcp.f32 %v344_v49  ;;  %v356_v62 = vand.u32 2147483648, %v344_v49  ;;  %vm350_vm4 = vweird.f32 %v344_v49  ;;  %v354_v0 = vand.u32 2147483647, %v344_v49 }
  0xa7   :  { %v132_v43 = vpop.f32.mrf.mxu0  ;;  %v336_v7 = vpop.f32.mrf.mxu3  ;;  %v357_v14 = vor.u32 1.1754944e-38, %v356_v62  ;;  %vm355_vm6 = vcmp.eq.f32.partialorder %v354_v0, 8.507059e+37 }
  0xa8   :  { %v4008_v45 = vadd.f32 %v132_v43, %v77_v34  ;;  %v363_v19 = vadd.f32 %v3373_v2, %v336_v7  ;;  %v210_v43 = vld [vmem:[%s5060_s22 + $0x28] sm:$0xff] }
  0xab   :  { %v3397_v52 = vpop.eup %3396 }
  0xac   :  { %v346_v55 = vmul.f32 %v3397_v52, %v344_v49  ;;  %vm351_vm2 = vweird.f32 %v3397_v52 }
  0xad   :  { %vm352_vm5 = vmor %vm350_vm4, %vm351_vm2 }
  0xae   :  { %v347_v56 = vsub.f32 1.0, %v346_v55 }
  0xaf   :  { %v135_v46 = vpop.f32.mrf.mxu0 }
  0xb0   :  { %v4010_v47 = vadd.f32 %v135_v46, %v77_v34  ;;  %v348_v59 = vmul.f32 %v3397_v52, %v347_v56 }
  0xb2   :  { %v349_v61 = vadd.f32 %v3397_v52, %v348_v59 }
  0xb4   :  { %v353_v9 = vsel %vm352_vm5, %v3397_v52, %v349_v61 }
  0xb5   :  { %v358_v24 = vsel %vm355_vm6, %v357_v14, %v353_v9 }
  0xb6   :  { %v364_v25 = vmul.f32 %v363_v19, %v358_v24  ;;  %v367_v35 = vsub.f32 1.0, %v358_v24  ;;  %v373_v37 = vmul.f32 0.0, %v358_v24 }
  0xb7   :  { %v138_v50 = vpop.f32.mrf.mxu0 }
  0xb8   :  { %v4012_v51 = vadd.f32 %v138_v50, %v77_v34 }
  0xbf   :  { %v141_v53 = vpop.f32.mrf.mxu0 }
  0xc0   :  { %v4014_v54 = vadd.f32 %v141_v53, %v77_v34 }
  0xc7   :  { %v144_v57 = vpop.f32.mrf.mxu0  ;;  %v253_v46 = vpop.f32.mrf.mxu2 }
  0xc8   :  { %v145_v58 = vadd.f32 %v144_v57, %v77_v34  ;;  %v208_v34 = vld [vmem:[%s5060_s22 + $0x18] sm:$0xff]  ;;  %v254_v48 = vadd.f32 %v3374_v44, %v253_v46  ;;  %s3681_s22 = smov [#allocation6]  }
  0xc9   :  { %3247 = vmatmul.msk.f32.gmra.mxu2 %vm217_vm0, %v208_v34 }
  0xca   :  { %203 = vst [vmem:[#allocation2 + $0x70] sm:$0xff] %v145_v58  ;;  %v3375_v58 = vld [vmem:[%s5038_s5] ss:$0 sm:$0xff] }
  0xcb   :  { %272 = vst.msk [vmem:[#allocation3] sm:$0xff] %vm271_vm7, %v254_v48 }
  0xcf   :  { %v164_v63 = vpop.f32.mrf.mxu0  ;;  %v256_v49 = vpop.f32.mrf.mxu2 }
  0xd0   :  { %v165_v5 = vadd.f32 %v164_v63, %v4016_v60  ;;  %v257_v50 = vadd.f32 %v3374_v44, %v256_v49 }
  0xd1   :  { %3248 = vmatmul.msk.f32.gmra.mxu2 %vm217_vm0, %v209_v42 }
  0xd2   :  { %190 = vst.msk [vmem:[#allocation2 + $0x8] sm:$0xff] %vm189_vm3, %v165_v5 }
  0xd3   :  { %273 = vst.msk [vmem:[#allocation3 + $0x8] sm:$0xff] %vm271_vm7, %v257_v50 }
  0xd7   :  { %v259_v53 = vpop.f32.mrf.mxu2 }
  0xd8   :  { %v260_v55 = vadd.f32 %v3374_v44, %v259_v53 }
  0xd9   :  { %v279_v26 = vld [vmem:[#allocation2 + $0x8] sm:$0xff]  ;;  %3249 = vmatmul.msk.f32.gmra.mxu2 %vm217_vm0, %v210_v43  ;;  %v3376_v43 = vld [vmem:[%s5038_s5] ss:$0 sm:$0xff] }
  0xda   :  { %v365_v27 = vadd.f32 %v364_v25, %v279_v26  ;;  %274 = vst.msk [vmem:[#allocation3 + $0x10] sm:$0xff] %vm271_vm7, %v260_v55 }
  0xdc   :  { %3398 = vtanh.f32 %v365_v27 }
  0xe2   :  { %v3399_v28 = vpop.eup %3398 }
  0xe3   :  { %369 = vrot.lane.b32.xlu0 %v3399_v28, %s3671_s28  ;;  %v170_v28 = vpop.f32.mrf.mxu1 }
  0xe4   :  { %v171_v29 = vadd.f32 %v170_v28, %v4016_v60 }
  0xe6   :  { %194 = vst.msk [vmem:[#allocation2 + $0x28] sm:$0xff] %vm189_vm3, %v171_v29 }
 0x155   :  { %v370_v36 = vpop.permute.xlu0 %369 }
 0x156   :  { %v372_v39 = vmul.f32 %v370_v36, %v367_v35 }
 0x158   :  { %v4059_v41 = vadd.f32 %v373_v37, %v372_v39 }
 0x15a   :  { %376 = vrot.lane.b32.xlu0 %v4059_v41, %s3671_s28 }
 0x1cc   :  { %v377_v52 = vpop.permute.xlu0 %376 }
 0x1cd   :  { %379 = vst.msk [vmem:[#allocation6] sm:$0xff] %vm81_vm1, %v377_v52  ;;  %3251 = vmatmul.msk.f32.vlgmr.msra.gmra.mxu3 %vm189_vm3, %v377_v52  ;;  %3252 = vmatmul.msk.f32.vlgmr.msrb.gmra.mxu2 %vm189_vm3, %v377_v52 }
 0x1ce   :  { %381 = vst.msk [vmem:[#allocation6 + $0x38] sm:$0xff] %vm380_vm8, %v377_v52  ;;  %716 = vmatpush.msra.mxu3 %v3784_v1  ;;  %736 = vmatpush.msrb.mxu2 %v3856_v15  ;;  %v262_v1 = vpop.f32.mrf.mxu2  ;;  %v485_v52 = vld [vmem:[#allocation2 + $0x28] sm:$0xff] }
 0x1d0   :  { %717 = vmatpush.msra.mxu3 %v3793_v3  ;;  %737 = vmatpush.msrb.mxu2 %v3866_v16  ;;  %v263_v3 = vadd.f32 %v3374_v44, %v262_v1 }
 0x1d2   :  { %718 = vmatpush.msra.mxu3 %v3806_v6  ;;  %738 = vmatpush.msrb.mxu2 %v3872_v17  ;;  %275 = vst.msk [vmem:[#allocation3 + $0x18] sm:$0xff] %vm271_vm7, %v263_v3 }
 0x1d4   :  { %719 = vmatpush.msra.mxu3 %v3815_v8  ;;  %739 = vmatpush.msrb.mxu2 %v3878_v18 }
 0x1d6   :  { %720 = vmatpush.msra.mxu3 %v3826_v10  ;;  %740 = vmatpush.msrb.mxu2 %v3887_v20  ;;  %v265_v6 = vpop.f32.mrf.mxu2 }
 0x1d7   :  { %v266_v8 = vadd.f32 %v3374_v44, %v265_v6 }
 0x1d8   :  { %721 = vmatpush.msra.mxu3 %v3834_v11  ;;  %741 = vmatpush.msrb.mxu2 %v3894_v21  ;;  %v167_v11 = vpop.f32.mrf.mxu0 }
 0x1d9   :  { %276 = vst.msk [vmem:[#allocation3 + $0x20] sm:$0xff] %vm271_vm7, %v266_v8  ;;  %v168_v15 = vadd.f32 %v167_v11, %v4016_v60 }
 0x1da   :  { %722 = vmatpush.msra.mxu3 %v3839_v12  ;;  %742 = vmatpush.msrb.mxu2 %v3900_v22 }
 0x1db   :  { %192 = vst.msk [vmem:[#allocation2 + $0x18] sm:$0xff] %vm189_vm3, %v168_v15  ;;  %v173_v15 = vpop.f32.mrf.mxu1 }
 0x1dc   :  { %723 = vmatpush.msra.mxu3 %v3845_v13  ;;  %743 = vmatpush.msrb.mxu2 %v3906_v23 }
 0x1de   :  { %v268_v10 = vpop.f32.mrf.mxu2 }
 0x1e2   :  { %v383_v2 = vld [vmem:[#allocation2 + $0x18] sm:$0xff] }
 0x250   :  { %v419_v16 = vpop.f32.mrf.mxu3  ;;  %v439_v59 = vpop.f32.mrf.mxu2 }
 0x251   :  { %v443_v12 = vadd.f32 %v419_v16, %v4004_v38  ;;  %v466_v63 = vadd.f32 %v3375_v58, %v439_v59  ;;  %v174_v16 = vadd.f32 %v173_v15, %v4016_v60 }
 0x253   :  { %v3253_v17 = vmul.f32 -1.442695, %v443_v12  ;;  %196 = vst.msk [vmem:[#allocation2 + $0x38] sm:$0xff] %vm189_vm3, %v174_v16  ;;  %v176_v12 = vpop.f32.mrf.mxu1 }
 0x255   :  { %3400 = vpow2.f32 %v3253_v17  ;;  %v177_v17 = vadd.f32 %v176_v12, %v4016_v60 }
 0x257   :  { %198 = vst.msk [vmem:[#allocation2 + $0x48] sm:$0xff] %vm189_vm3, %v177_v17 }
 0x25b   :  { %v3401_v18 = vpop.eup %3400 }
 0x25c   :  { %v447_v20 = vadd.f32 1.0, %v3401_v18  ;;  %v179_v18 = vpop.f32.mrf.mxu1 }
 0x25e   :  { %3402 = vrcp.f32 %v447_v20  ;;  %v459_v23 = vand.u32 2147483648, %v447_v20  ;;  %v457_v57 = vand.u32 2147483647, %v447_v20  ;;  %vm453_vm10 = vweird.f32 %v447_v20 }
 0x260   :  { %v460_v38 = vor.u32 1.1754944e-38, %v459_v23  ;;  %vm458_vm12 = vcmp.eq.f32.partialorder %v457_v57, 8.507059e+37 }
 0x264   :  { %v3403_v13 = vpop.eup %3402 }
 0x265   :  { %v449_v21 = vmul.f32 %v3403_v13, %v447_v20  ;;  %vm454_vm9 = vweird.f32 %v3403_v13  ;;  %v180_v20 = vadd.f32 %v179_v18, %v4016_v60 }
 0x266   :  { %vm455_vm11 = vmor %vm453_vm10, %vm454_vm9 }
 0x267   :  { %v450_v22 = vsub.f32 1.0, %v449_v21  ;;  %200 = vst.msk [vmem:[#allocation2 + $0x58] sm:$0xff] %vm189_vm3, %v180_v20 }
 0x269   :  { %v451_v56 = vmul.f32 %v3403_v13, %v450_v22 }
 0x26b   :  { %v452_v61 = vadd.f32 %v3403_v13, %v451_v56 }
 0x26d   :  { %v456_v62 = vsel %vm455_vm11, %v3403_v13, %v452_v61  ;;  %v182_v13 = vpop.f32.mrf.mxu1 }
 0x26e   :  { %v461_v0 = vsel %vm458_vm12, %v460_v38, %v456_v62  ;;  %v183_v21 = vadd.f32 %v182_v13, %v4016_v60 }
 0x26f   :  { %v467_v5 = vmul.f32 %v466_v63, %v461_v0  ;;  %v470_v14 = vsub.f32 1.0, %v461_v0  ;;  %v476_v24 = vmul.f32 %v461_v0, %v4059_v41 }
 0x270   :  { %202 = vst.msk [vmem:[#allocation2 + $0x68] sm:$0xff] %vm189_vm3, %v183_v21 }
 0x271   :  { %v468_v7 = vadd.f32 %v467_v5, %v383_v2 }
 0x273   :  { %3404 = vtanh.f32 %v468_v7 }
 0x275   :  { %v185_v23 = vpop.f32.mrf.mxu1 }
 0x276   :  { %v186_v56 = vadd.f32 %v185_v23, %v4016_v60  ;;  %v3377_v60 = vld [vmem:[%s5038_s5] ss:$0 sm:$0xff] }
 0x278   :  { %204 = vst.msk [vmem:[#allocation2 + $0x78] sm:$0xff] %vm189_vm3, %v186_v56 }
 0x279   :  { %v3405_v9 = vpop.eup %3404 }
 0x27a   :  { %472 = vrot.lane.b32.xlu1 %v3405_v9, %s3671_s28 }
 0x2ec   :  { %v473_v19 = vpop.permute.xlu1 %472 }
 0x2ed   :  { %v475_v25 = vmul.f32 %v473_v19, %v470_v14 }
 0x2ef   :  { %v477_v26 = vadd.f32 %v476_v24, %v475_v25 }
 0x2f1   :  { %479 = vrot.lane.b32.xlu1 %v477_v26, %s3671_s28 }
 0x363   :  { %v480_v27 = vpop.permute.xlu1 %479 }
 0x364   :  { %482 = vst.msk [vmem:[#allocation6 + $0x8] sm:$0xff] %vm81_vm1, %v480_v27  ;;  %3254 = vmatmul.msk.f32.vlgmr.msrb.gmra.mxu3 %vm189_vm3, %v480_v27  ;;  %3255 = vmatmul.msk.f32.vlgmr.msra.gmra.mxu2 %vm189_vm3, %v480_v27 }
 0x365   :  { %483 = vst.msk [vmem:[#allocation6 + $0x30] sm:$0xff] %vm380_vm8, %v480_v27  ;;  %v587_v27 = vld [vmem:[#allocation2 + $0x38] sm:$0xff] }
 0x3e7   :  { %v521_v30 = vpop.f32.mrf.mxu3  ;;  %v541_v44 = vpop.f32.mrf.mxu2 }
 0x3e8   :  { %v545_v31 = vadd.f32 %v521_v30, %v4006_v40  ;;  %v568_v49 = vadd.f32 %v3376_v43, %v541_v44 }
 0x3ea   :  { %v3256_v32 = vmul.f32 -1.442695, %v545_v31 }
 0x3ec   :  { %3406 = vpow2.f32 %v3256_v32 }
 0x3f2   :  { %v3407_v33 = vpop.eup %3406 }
 0x3f3   :  { %v549_v34 = vadd.f32 1.0, %v3407_v33 }
 0x3f5   :  { %3408 = vrcp.f32 %v549_v34  ;;  %v561_v39 = vand.u32 2147483648, %v549_v34  ;;  %v559_v42 = vand.u32 2147483647, %v549_v34  ;;  %vm555_vm14 = vweird.f32 %v549_v34 }
 0x3f7   :  { %v562_v40 = vor.u32 1.1754944e-38, %v561_v39  ;;  %vm560_vm2 = vcmp.eq.f32.partialorder %v559_v42, 8.507059e+37 }
 0x3fb   :  { %v3409_v35 = vpop.eup %3408 }
 0x3fc   :  { %v551_v36 = vmul.f32 %v3409_v35, %v549_v34  ;;  %vm556_vm13 = vweird.f32 %v3409_v35 }
 0x3fd   :  { %vm557_vm15 = vmor %vm555_vm14, %vm556_vm13 }
 0x3fe   :  { %v552_v37 = vsub.f32 1.0, %v551_v36 }
 0x400   :  { %v553_v41 = vmul.f32 %v3409_v35, %v552_v37 }
 0x402   :  { %v554_v46 = vadd.f32 %v3409_v35, %v553_v41 }
 0x404   :  { %v558_v48 = vsel %vm557_vm15, %v3409_v35, %v554_v46 }
 0x405   :  { %v563_v50 = vsel %vm560_vm2, %v562_v40, %v558_v48 }
 0x406   :  { %v569_v53 = vmul.f32 %v568_v49, %v563_v50  ;;  %v572_v3 = vsub.f32 1.0, %v563_v50  ;;  %v578_v8 = vmul.f32 %v563_v50, %v477_v26  ;;  %v3378_v50 = vld [vmem:[%s5038_s5] ss:$0 sm:$0xff] }
 0x408   :  { %v570_v55 = vadd.f32 %v569_v53, %v485_v52 }
 0x40a   :  { %3410 = vtanh.f32 %v570_v55 }
 0x410   :  { %v3411_v1 = vpop.eup %3410 }
 0x411   :  { %574 = vrot.lane.b32.xlu2 %v3411_v1, %s3671_s28 }
 0x46b   :  { %v575_v6 = vpop.permute.xlu2 %574 }
 0x46c   :  { %v577_v10 = vmul.f32 %v575_v6, %v572_v3 }
 0x46e   :  { %v579_v11 = vadd.f32 %v578_v8, %v577_v10  ;;  %v689_v8 = vld [vmem:[#allocation2 + $0x48] sm:$0xff] }
 0x470   :  { %581 = vrot.lane.b32.xlu2 %v579_v11, %s3671_s28 }
 0x4ca   :  { %v582_v22 = vpop.permute.xlu2 %581 }
 0x4cb   :  { %584 = vst.msk [vmem:[#allocation6 + $0x10] sm:$0xff] %vm81_vm1, %v582_v22  ;;  %3257 = vmatmul.msk.f32.vlgmr.msra.gmra.mxu0 %vm189_vm3, %v582_v22  ;;  %3258 = vmatmul.msk.f32.vlgmr.msrb.gmra.mxu1 %vm189_vm3, %v582_v22 }
 0x4cc   :  { %585 = vst.msk [vmem:[#allocation6 + $0x28] sm:$0xff] %vm380_vm8, %v582_v22 }
 0x548   :  { %v623_v57 = vpop.f32.mrf.mxu0  ;;  %v643_v9 = vpop.f32.mrf.mxu1 }
 0x549   :  { %v647_v58 = vadd.f32 %v623_v57, %v4008_v45  ;;  %v670_v24 = vadd.f32 %v3377_v60, %v643_v9 }
 0x54b   :  { %v3259_v59 = vmul.f32 -1.442695, %v647_v58 }
 0x54d   :  { %3412 = vpow2.f32 %v3259_v59 }
 0x553   :  { %v3413_v61 = vpop.eup %3412 }
 0x554   :  { %v651_v38 = vadd.f32 1.0, %v3413_v61 }
 0x556   :  { %3414 = vrcp.f32 %v651_v38  ;;  %v663_v2 = vand.u32 2147483648, %v651_v38  ;;  %v661_v7 = vand.u32 2147483647, %v651_v38  ;;  %vm657_vm5 = vweird.f32 %v651_v38 }
 0x558   :  { %v664_v45 = vor.u32 1.1754944e-38, %v663_v2  ;;  %vm662_vm7 = vcmp.eq.f32.partialorder %v661_v7, 8.507059e+37 }
 0x55c   :  { %v3415_v62 = vpop.eup %3414 }
 0x55d   :  { %v653_v63 = vmul.f32 %v3415_v62, %v651_v38  ;;  %vm658_vm4 = vweird.f32 %v3415_v62 }
 0x55e   :  { %vm659_vm6 = vmor %vm657_vm5, %vm658_vm4 }
 0x55f   :  { %v654_v0 = vsub.f32 1.0, %v653_v63  ;;  %v3379_v63 = vld [vmem:[%s5038_s5] ss:$0 sm:$0xff] }
 0x561   :  { %v655_v5 = vmul.f32 %v3415_v62, %v654_v0 }
 0x563   :  { %v656_v14 = vadd.f32 %v3415_v62, %v655_v5 }
 0x565   :  { %v660_v19 = vsel %vm659_vm6, %v3415_v62, %v656_v14  ;;  %v791_v14 = vld [vmem:[#allocation2 + $0x58] sm:$0xff] }
 0x566   :  { %v665_v25 = vsel %vm662_vm7, %v664_v45, %v660_v19 }
 0x567   :  { %v671_v26 = vmul.f32 %v670_v24, %v665_v25  ;;  %v674_v30 = vsub.f32 1.0, %v665_v25  ;;  %v680_v32 = vmul.f32 %v665_v25, %v579_v11  ;;  %v908_v24 = vld [vmem:[%s5036_s3 + $0x70] sm:$0xff]  ;;  %v909_v25 = vld [vmem:[%s5036_s3 + $0x78] sm:$0xff] }
 0x568   :  { %920 = vmatpush.msrb.mxu3 %v908_v24  ;;  %940 = vmatpush.msra.mxu2 %v909_v25 }
 0x569   :  { %v672_v28 = vadd.f32 %v671_v26, %v587_v27  ;;  %v906_v26 = vld [vmem:[%s5036_s3 + $0x60] sm:$0xff]  ;;  %v907_v27 = vld [vmem:[%s5036_s3 + $0x68] sm:$0xff]  ;;  %1022 = vmatpush.msra.mxu0 %v908_v24  ;;  %1042 = vmatpush.msrb.mxu1 %v909_v25 }
 0x56a   :  { %921 = vmatpush.msrb.mxu3 %v906_v26  ;;  %941 = vmatpush.msra.mxu2 %v907_v27 }
 0x56b   :  { %3416 = vtanh.f32 %v672_v28  ;;  %v904_v28 = vld [vmem:[%s5036_s3 + $0x50] sm:$0xff]  ;;  %1023 = vmatpush.msra.mxu0 %v906_v26  ;;  %1043 = vmatpush.msrb.mxu1 %v907_v27 }
 0x56c   :  { %922 = vmatpush.msrb.mxu3 %v904_v28 }
 0x56d   :  { %1024 = vmatpush.msra.mxu0 %v904_v28 }
 0x571   :  { %v3417_v29 = vpop.eup %3416 }
 0x572   :  { %676 = vrot.lane.b32.xlu0 %v3417_v29, %s3671_s28  ;;  %v905_v29 = vld [vmem:[%s5036_s3 + $0x58] sm:$0xff] }
 0x573   :  { %942 = vmatpush.msra.mxu2 %v905_v29  ;;  %1044 = vmatpush.msrb.mxu1 %v905_v29 }
 0x5e4   :  { %v677_v31 = vpop.permute.xlu0 %676 }
 0x5e5   :  { %v679_v33 = vmul.f32 %v677_v31, %v674_v30  ;;  %v902_v30 = vld [vmem:[%s5036_s3 + $0x40] sm:$0xff]  ;;  %v903_v31 = vld [vmem:[%s5036_s3 + $0x48] sm:$0xff] }
 0x5e6   :  { %923 = vmatpush.msrb.mxu3 %v902_v30  ;;  %943 = vmatpush.msra.mxu2 %v903_v31 }
 0x5e7   :  { %v681_v34 = vadd.f32 %v680_v32, %v679_v33  ;;  %v900_v32 = vld [vmem:[%s5036_s3 + $0x30] sm:$0xff]  ;;  %v901_v33 = vld [vmem:[%s5036_s3 + $0x38] sm:$0xff]  ;;  %1025 = vmatpush.msra.mxu0 %v902_v30  ;;  %1045 = vmatpush.msrb.mxu1 %v903_v31 }
 0x5e8   :  { %924 = vmatpush.msrb.mxu3 %v900_v32  ;;  %944 = vmatpush.msra.mxu2 %v901_v33  ;;  %v995_v31 = vld [vmem:[#allocation2 + $0x78] sm:$0xff] }
 0x5e9   :  { %683 = vrot.lane.b32.xlu1 %v681_v34, %s3671_s28  ;;  %1026 = vmatpush.msra.mxu0 %v900_v32 }
 0x5ea   :  { %1046 = vmatpush.msrb.mxu1 %v901_v33 }
 0x65b   :  { %v684_v35 = vpop.permute.xlu1 %683 }
 0x65c   :  { %686 = vst.msk [vmem:[#allocation6 + $0x18] sm:$0xff] %vm81_vm1, %v684_v35  ;;  %3260 = vmatmul.msk.f32.vlgmr.msra.gmra.mxu3 %vm189_vm3, %v684_v35  ;;  %3261 = vmatmul.msk.f32.vlgmr.msrb.gmra.mxu2 %vm189_vm3, %v684_v35 }
 0x65d   :  { %687 = vst.msk [vmem:[#allocation6 + $0x20] sm:$0xff] %vm380_vm8, %v684_v35  ;;  %v899_v35 = vld [vmem:[%s5036_s3 + $0x28] sm:$0xff] }
 0x65e   :  { %945 = vmatpush.msra.mxu2 %v899_v35  ;;  %1047 = vmatpush.msrb.mxu1 %v899_v35  ;;  %v1102_v35 = vld [vmem:[%s5039_s6 + $0x30] sm:$0xff] }
 0x6df   :  { %v725_v36 = vpop.f32.mrf.mxu3  ;;  %v745_v52 = vpop.f32.mrf.mxu2 }
 0x6e0   :  { %v749_v37 = vadd.f32 %v725_v36, %v4010_v47  ;;  %v772_v1 = vadd.f32 %v3378_v50, %v745_v52  ;;  %v896_v36 = vld [vmem:[%s5036_s3 + $0x10] sm:$0xff] }
 0x6e2   :  { %v3262_v39 = vmul.f32 -1.442695, %v749_v37  ;;  %v897_v37 = vld [vmem:[%s5036_s3 + $0x18] sm:$0xff] }
 0x6e3   :  { %946 = vmatpush.msra.mxu2 %v897_v37  ;;  %1048 = vmatpush.msrb.mxu1 %v897_v37  ;;  %v1101_v37 = vld [vmem:[%s5039_s6 + $0x28] sm:$0xff] }
 0x6e4   :  { %3418 = vpow2.f32 %v3262_v39  ;;  %v894_v39 = vld [vmem:[%s5036_s3] sm:$0xff] }
 0x6ea   :  { %v3419_v41 = vpop.eup %3418 }
 0x6eb   :  { %v753_v42 = vadd.f32 1.0, %v3419_v41  ;;  %v895_v41 = vld [vmem:[%s5036_s3 + $0x8] sm:$0xff] }
 0x6ec   :  { %947 = vmatpush.msra.mxu2 %v895_v41  ;;  %1049 = vmatpush.msrb.mxu1 %v895_v41  ;;  %v1144_v41 = vld [vmem:[%s5042_s9 + $0x28] sm:$0xff] }
 0x6ed   :  { %3420 = vrcp.f32 %v753_v42  ;;  %v765_v40 = vand.u32 2147483648, %v753_v42  ;;  %v763_v49 = vand.u32 2147483647, %v753_v42  ;;  %vm759_vm10 = vweird.f32 %v753_v42 }
 0x6ef   :  { %v766_v47 = vor.u32 1.1754944e-38, %v765_v40  ;;  %vm764_vm12 = vcmp.eq.f32.partialorder %v763_v49, 8.507059e+37 }
 0x6f3   :  { %v3421_v43 = vpop.eup %3420 }
 0x6f4   :  { %v755_v44 = vmul.f32 %v3421_v43, %v753_v42  ;;  %vm760_vm9 = vweird.f32 %v3421_v43 }
 0x6f5   :  { %vm761_vm11 = vmor %vm759_vm10, %vm760_vm9 }
 0x6f6   :  { %v756_v46 = vsub.f32 1.0, %v755_v44 }
 0x6f8   :  { %v757_v48 = vmul.f32 %v3421_v43, %v756_v46 }
 0x6fa   :  { %v758_v53 = vadd.f32 %v3421_v43, %v757_v48 }
 0x6fc   :  { %v762_v55 = vsel %vm761_vm11, %v3421_v43, %v758_v53 }
 0x6fd   :  { %v767_v3 = vsel %vm764_vm12, %v766_v47, %v762_v55 }
 0x6fe   :  { %v773_v6 = vmul.f32 %v772_v1, %v767_v3  ;;  %v776_v15 = vsub.f32 1.0, %v767_v3  ;;  %v782_v12 = vmul.f32 %v767_v3, %v681_v34  ;;  %v898_v34 = vld [vmem:[%s5036_s3 + $0x20] sm:$0xff] }
 0x6ff   :  { %925 = vmatpush.msrb.mxu3 %v898_v34  ;;  %1027 = vmatpush.msra.mxu0 %v898_v34  ;;  %v1103_v34 = vld [vmem:[%s5039_s6 + $0x38] sm:$0xff] }
 0x700   :  { %v774_v10 = vadd.f32 %v773_v6, %v689_v8 }
 0x701   :  { %926 = vmatpush.msrb.mxu3 %v896_v36  ;;  %1028 = vmatpush.msra.mxu0 %v896_v36  ;;  %v1146_v36 = vld [vmem:[%s5042_s9 + $0x38] sm:$0xff] }
 0x702   :  { %3422 = vtanh.f32 %v774_v10  ;;  %1179 = vmatpush.msrb.mxu2 %v1146_v36 }
 0x703   :  { %927 = vmatpush.msrb.mxu3 %v894_v39  ;;  %1029 = vmatpush.msra.mxu0 %v894_v39  ;;  %v1145_v39 = vld [vmem:[%s5042_s9 + $0x30] sm:$0xff] }
 0x704   :  { %1180 = vmatpush.msrb.mxu2 %v1145_v39 }
 0x705   :  { %1118 = vmatpush.msra.mxu3 %v1103_v34 }
 0x706   :  { %1181 = vmatpush.msrb.mxu2 %v1144_v41 }
 0x707   :  { %1119 = vmatpush.msra.mxu3 %v1102_v35 }
 0x708   :  { %v3423_v11 = vpop.eup %3422 }
 0x709   :  { %778 = vrot.lane.b32.xlu2 %v3423_v11, %s3671_s28  ;;  %v3380_v11 = vld [vmem:[%s5038_s5] ss:$0 sm:$0xff]  ;;  %1120 = vmatpush.msra.mxu3 %v1101_v37 }
 0x763   :  { %v779_v16 = vpop.permute.xlu2 %778 }
 0x764   :  { %v781_v17 = vmul.f32 %v779_v16, %v776_v15 }
 0x766   :  { %v4152_v18 = vadd.f32 %v782_v12, %v781_v17 }
 0x768   :  { %785 = vrot.lane.b32.xlu0 %v4152_v18, %s3671_s28 }
 0x7da   :  { %v786_v20 = vpop.permute.xlu0 %785 }
 0x7db   :  { %788 = vst.msk [vmem:[#allocation6 + $0x20] sm:$0xff] %vm81_vm1, %v786_v20  ;;  %3263 = vmatmul.msk.f32.vlgmr.msrb.gmra.mxu0 %vm189_vm3, %v786_v20  ;;  %3264 = vmatmul.msk.f32.vlgmr.msra.gmra.mxu1 %vm189_vm3, %v786_v20 }
 0x7dc   :  { %789 = vst.msk [vmem:[#allocation6 + $0x18] sm:$0xff] %vm380_vm8, %v786_v20 }
 0x858   :  { %v827_v13 = vpop.f32.mrf.mxu0  ;;  %v847_v0 = vpop.f32.mrf.mxu1 }
 0x859   :  { %v851_v21 = vadd.f32 %v827_v13, %v4012_v51  ;;  %v874_v7 = vadd.f32 %v3379_v63, %v847_v0  ;;  %v893_v13 = vld [vmem:[#allocation2 + $0x68] sm:$0xff] }
 0x85b   :  { %v3265_v22 = vmul.f32 -1.442695, %v851_v21 }
 0x85d   :  { %3424 = vpow2.f32 %v3265_v22 }
 0x863   :  { %v3425_v23 = vpop.eup %3424 }
 0x864   :  { %v855_v56 = vadd.f32 1.0, %v3425_v23 }
 0x866   :  { %3426 = vrcp.f32 %v855_v56  ;;  %v867_v61 = vand.u32 2147483648, %v855_v56  ;;  %v865_v62 = vand.u32 2147483647, %v855_v56  ;;  %vm861_vm14 = vweird.f32 %v855_v56 }
 0x868   :  { %v868_v51 = vor.u32 1.1754944e-38, %v867_v61  ;;  %vm866_vm2 = vcmp.eq.f32.partialorder %v865_v62, 8.507059e+37 }
 0x86c   :  { %v3427_v57 = vpop.eup %3426 }
 0x86d   :  { %v857_v58 = vmul.f32 %v3427_v57, %v855_v56  ;;  %vm862_vm13 = vweird.f32 %v3427_v57 }
 0x86e   :  { %vm863_vm15 = vmor %vm861_vm14, %vm862_vm13  ;;  %vm1249_vm13 = vcmask 64512   ;;  %vm1252_vm14 = vcmask 195584  }
 0x86f   :  { %v858_v59 = vsub.f32 1.0, %v857_v58 }
 0x871   :  { %v859_v38 = vmul.f32 %v3427_v57, %v858_v59 }
 0x873   :  { %v860_v2 = vadd.f32 %v3427_v57, %v859_v38  ;;  %v994_v38 = vld [vmem:[#allocation2 + $0x70] sm:$0xff] }
 0x875   :  { %v864_v5 = vsel %vm863_vm15, %v3427_v57, %v860_v2  ;;  %vm1255_vm15 = vcmask 326656  }
 0x876   :  { %v869_v60 = vsel %vm866_vm2, %v868_v51, %v864_v5  ;;  %vm1257_vm2 = vcmask 392192  }
 0x877   :  { %v875_v9 = vmul.f32 %v874_v7, %v869_v60  ;;  %v878_v42 = vsub.f32 1.0, %v869_v60  ;;  %v884_v44 = vmul.f32 %v869_v60, %v4152_v18 }
 0x879   :  { %v876_v45 = vadd.f32 %v875_v9, %v791_v14 }
 0x87b   :  { %3428 = vtanh.f32 %v876_v45 }
 0x881   :  { %v3429_v19 = vpop.eup %3428 }
 0x882   :  { %880 = vrot.lane.b32.xlu1 %v3429_v19, %s3671_s28  ;;  %v3381_v19 = vld [vmem:[%s5038_s5] ss:$0 sm:$0xff]  ;;  %s3673_s5 = smov 16  }
 0x8f4   :  { %v881_v43 = vpop.permute.xlu1 %880 }
 0x8f5   :  { %v883_v46 = vmul.f32 %v881_v43, %v878_v42  ;;  %v1100_v42 = vld [vmem:[%s5039_s6 + $0x20] sm:$0xff] }
 0x8f6   :  { %v1143_v43 = vld [vmem:[%s5042_s9 + $0x20] sm:$0xff]  ;;  %1121 = vmatpush.msra.mxu3 %v1100_v42 }
 0x8f7   :  { %v885_v40 = vadd.f32 %v884_v44, %v883_v46  ;;  %v1099_v44 = vld [vmem:[%s5039_s6 + $0x18] sm:$0xff]  ;;  %v1098_v46 = vld [vmem:[%s5039_s6 + $0x10] sm:$0xff]  ;;  %1182 = vmatpush.msrb.mxu2 %v1143_v43 }
 0x8f8   :  { %1122 = vmatpush.msra.mxu3 %v1099_v44 }
 0x8f9   :  { %887 = vrot.lane.b32.xlu2 %v885_v40, %s3671_s28 }
 0x8fa   :  { %1123 = vmatpush.msra.mxu3 %v1098_v46 }
 0x953   :  { %v888_v48 = vpop.permute.xlu2 %887 }
 0x954   :  { %890 = vst.msk [vmem:[#allocation6 + $0x28] sm:$0xff] %vm81_vm1, %v888_v48  ;;  %3266 = vmatmul.msk.f32.vlgmr.msrb.gmra.mxu3 %vm189_vm3, %v888_v48  ;;  %3267 = vmatmul.msk.f32.vlgmr.msra.gmra.mxu2 %vm189_vm3, %v888_v48 }
 0x955   :  { %891 = vst.msk [vmem:[#allocation6 + $0x10] sm:$0xff] %vm380_vm8, %v888_v48  ;;  %v1096_v48 = vld [vmem:[%s5039_s6] sm:$0xff] }
 0x9d7   :  { %v929_v49 = vpop.f32.mrf.mxu3  ;;  %v949_v15 = vpop.f32.mrf.mxu2 }
 0x9d8   :  { %v953_v50 = vadd.f32 %v929_v49, %v4014_v54  ;;  %v976_v17 = vadd.f32 %v3380_v11, %v949_v15  ;;  %v4297_v15 = vld [vmem:[#allocation6 + $0x10] sm:$0xff] }
 0x9da   :  { %v3268_v52 = vmul.f32 -1.442695, %v953_v50 }
 0x9dc   :  { %3430 = vpow2.f32 %v3268_v52 }
 0x9e2   :  { %v3431_v53 = vpop.eup %3430 }
 0x9e3   :  { %v957_v47 = vadd.f32 1.0, %v3431_v53 }
 0x9e5   :  { %3432 = vrcp.f32 %v957_v47  ;;  %v969_v6 = vand.u32 2147483648, %v957_v47  ;;  %v967_v10 = vand.u32 2147483647, %v957_v47  ;;  %vm963_vm5 = vweird.f32 %v957_v47 }
 0x9e7   :  { %v970_v54 = vor.u32 1.1754944e-38, %v969_v6  ;;  %vm968_vm7 = vcmp.eq.f32.partialorder %v967_v10, 8.507059e+37  ;;  %v1139_v6 = vld [vmem:[%s5042_s9] sm:$0xff] }
 0x9eb   :  { %v3433_v55 = vpop.eup %3432 }
 0x9ec   :  { %v959_v1 = vmul.f32 %v3433_v55, %v957_v47  ;;  %vm964_vm4 = vweird.f32 %v3433_v55 }
 0x9ed   :  { %vm965_vm6 = vmor %vm963_vm5, %vm964_vm4  ;;  %vm1259_vm4 = vcmask 457728  }
 0x9ee   :  { %v960_v3 = vsub.f32 1.0, %v959_v1  ;;  %v1141_v1 = vld [vmem:[%s5042_s9 + $0x10] sm:$0xff] }
 0x9f0   :  { %v961_v8 = vmul.f32 %v3433_v55, %v960_v3  ;;  %v1140_v3 = vld [vmem:[%s5042_s9 + $0x8] sm:$0xff] }
 0x9f2   :  { %v962_v16 = vadd.f32 %v3433_v55, %v961_v8 }
 0x9f4   :  { %v966_v12 = vsel %vm965_vm6, %v3433_v55, %v962_v16  ;;  %v1142_v55 = vld [vmem:[%s5042_s9 + $0x18] sm:$0xff]  ;;  %v4301_v16 = vld [vmem:[#allocation6 + $0x18] sm:$0xff]  ;;  %s3210_s9 = sshll.u32 %s3681_s22, 4  ;;  %s3211_s9 = int_to_ptr.vmem [resolvable:$true] %s3210_s9 }
 0x9f5   :  { %v971_v18 = vsel %vm968_vm7, %v970_v54, %v966_v12  ;;  %1183 = vmatpush.msrb.mxu2 %v1142_v55  ;;  %v4305_v54 = vld [vmem:[#allocation6 + $0x20] sm:$0xff]  ;;  %v4309_v12 = vld [vmem:[#allocation6 + $0x28] sm:$0xff] }
 0x9f6   :  { %v977_v20 = vmul.f32 %v976_v17, %v971_v18  ;;  %v980_v23 = vsub.f32 1.0, %v971_v18  ;;  %v986_v57 = vmul.f32 %v971_v18, %v885_v40  ;;  %v1097_v40 = vld [vmem:[%s5039_s6 + $0x8] sm:$0xff]  ;;  %s3678_s6 = smov 48  }
 0x9f7   :  { %1124 = vmatpush.msra.mxu3 %v1097_v40  ;;  %1184 = vmatpush.msrb.mxu2 %v1141_v1 }
 0x9f8   :  { %v978_v21 = vadd.f32 %v977_v20, %v893_v13  ;;  %v4324_v20 = vld [vmem:[%s5041_s8 + $0x18] sm:$0xff]  ;;  %v4329_v13 = vld [vmem:[%s5041_s8 + $0x10] sm:$0xff] }
 0x9f9   :  { %1125 = vmatpush.msra.mxu3 %v1096_v48  ;;  %1185 = vmatpush.msrb.mxu2 %v1140_v3 }
 0x9fa   :  { %3434 = vtanh.f32 %v978_v21  ;;  %1280 = vmatpush.msrb.mxu0 %v4324_v20  ;;  %v4335_v21 = vld [vmem:[%s5041_s8 + $0x8] sm:$0xff] }
 0x9fb   :  { %1186 = vmatpush.msrb.mxu2 %v1139_v6 }
 0x9fc   :  { %1281 = vmatpush.msrb.mxu0 %v4329_v13 }
 0x9fe   :  { %1282 = vmatpush.msrb.mxu0 %v4335_v21 }
 0xa00   :  { %v3435_v22 = vpop.eup %3434 }
 0xa01   :  { %982 = vrot.lane.b32.xlu0 %v3435_v22, %s3671_s28  ;;  %v4342_v22 = vld [vmem:[%s5041_s8] sm:$0xff] }
 0xa02   :  { %1283 = vmatpush.msrb.mxu0 %v4342_v22 }
 0xa73   :  { %v983_v56 = vpop.permute.xlu0 %982 }
 0xa74   :  { %v985_v58 = vmul.f32 %v983_v56, %v980_v23  ;;  %v3382_v23 = vld [vmem:[%s5040_s7] ss:$0 sm:$0xff]  ;;  %s3672_s7 = smov 24  }
 0xa76   :  { %v4224_v59 = vadd.f32 %v986_v57, %v985_v58 }
 0xa78   :  { %989 = vrot.lane.b32.xlu1 %v4224_v59, %s3671_s28 }
 0xaea   :  { %v990_v61 = vpop.permute.xlu1 %989 }
 0xaeb   :  { %992 = vst.msk [vmem:[#allocation6 + $0x30] sm:$0xff] %vm81_vm1, %v990_v61  ;;  %3269 = vmatmul.msk.f32.vlgmr.msra.gmra.mxu0 %vm189_vm3, %v990_v61  ;;  %3270 = vmatmul.msk.f32.vlgmr.msrb.gmra.mxu1 %vm189_vm3, %v990_v61 }
 0xaec   :  { %993 = vst.msk [vmem:[#allocation6 + $0x8] sm:$0xff] %vm380_vm8, %v990_v61 }
 0xaf2   :  { %v4313_v17 = vld [vmem:[#allocation6 + $0x30] sm:$0xff] }
 0xaf3   :  { %v4293_v11 = vld [vmem:[#allocation6 + $0x8] sm:$0xff] }
 0xb68   :  { %v1031_v62 = vpop.f32.mrf.mxu0  ;;  %v1051_v24 = vpop.f32.mrf.mxu1 }
 0xb69   :  { %v1055_v63 = vadd.f32 %v1031_v62, %v994_v38  ;;  %v1078_v28 = vadd.f32 %v3381_v19, %v1051_v24  ;;  %v3383_v24 = vld [vmem:[%s5043_s10] ss:$0 sm:$0xff] }
 0xb6b   :  { %v3271_v0 = vmul.f32 -1.442695, %v1055_v63 }
 0xb6d   :  { %3436 = vpow2.f32 %v3271_v0 }
 0xb73   :  { %v3437_v2 = vpop.eup %3436 }
 0xb74   :  { %v1059_v51 = vadd.f32 1.0, %v3437_v2  ;;  %v1220_v2 = vlaneseq }
 0xb76   :  { %3438 = vrcp.f32 %v1059_v51  ;;  %v1071_v9 = vand.u32 2147483648, %v1059_v51  ;;  %v1069_v45 = vand.u32 2147483647, %v1059_v51  ;;  %vm1065_vm10 = vweird.f32 %v1059_v51 }
 0xb78   :  { %v1072_v26 = vor.u32 1.1754944e-38, %v1071_v9  ;;  %vm1070_vm12 = vcmp.eq.f32.partialorder %v1069_v45, 8.507059e+37 }
 0xb7c   :  { %v3439_v5 = vpop.eup %3438 }
 0xb7d   :  { %v1061_v7 = vmul.f32 %v3439_v5, %v1059_v51  ;;  %vm1066_vm9 = vweird.f32 %v3439_v5 }
 0xb7e   :  { %vm1067_vm11 = vmor %vm1065_vm10, %vm1066_vm9 }
 0xb7f   :  { %v1062_v60 = vsub.f32 1.0, %v1061_v7  ;;  %v1223_v7 = vand.u32 127, %v1220_v2 }
 0xb81   :  { %v1063_v14 = vmul.f32 %v3439_v5, %v1062_v60 }
 0xb83   :  { %v1064_v25 = vadd.f32 %v3439_v5, %v1063_v14 }
 0xb85   :  { %v1068_v27 = vsel %vm1067_vm11, %v3439_v5, %v1064_v25  ;;  %v1221_v5 = vshrl.u32 %v1220_v2, 7 }
 0xb86   :  { %v1073_v29 = vsel %vm1070_vm12, %v1072_v26, %v1068_v27 }
 0xb87   :  { %v1079_v30 = vmul.f32 %v1078_v28, %v1073_v29  ;;  %v1082_v49 = vsub.f32 1.0, %v1073_v29  ;;  %v1088_v52 = vmul.f32 %v1073_v29, %v4224_v59 }
 0xb89   :  { %v1080_v32 = vadd.f32 %v1079_v30, %v995_v31 }
 0xb8b   :  { %3440 = vtanh.f32 %v1080_v32 }
 0xb91   :  { %v3441_v33 = vpop.eup %3440 }
 0xb92   :  { %1084 = vrot.lane.b32.xlu2 %v3441_v33, %s3671_s28 }
 0xbec   :  { %v1085_v50 = vpop.permute.xlu2 %1084 }
 0xbed   :  { %v1087_v53 = vmul.f32 %v1085_v50, %v1082_v49 }
 0xbef   :  { %v1089_v47 = vadd.f32 %v1088_v52, %v1087_v53 }
 0xbf1   :  { %1091 = vrot.lane.b32.xlu0 %v1089_v47, %s3671_s28 }
 0xc63   :  { %v1092_v8 = vpop.permute.xlu0 %1091 }
 0xc64   :  { %1094 = vst.msk [vmem:[#allocation6 + $0x38] sm:$0xff] %vm81_vm1, %v1092_v8  ;;  %3272 = vmatmul.msk.f32.vlgmr.msra.gmra.mxu3 %vm189_vm3, %v1092_v8 }
 0xc65   :  { %1095 = vst.msk [vmem:[#allocation6] sm:$0xff] %vm380_vm8, %v1092_v8  ;;  %vm1224_vm8 = vcmp.eq.s32.totalorder %v1221_v5, %v1223_v7 }
 0xc66   :  { %v4360_v60 = vsel %vm1224_vm8, 1.0, %v3670_v4  ;;  %3218 = dma.vmem_to_hbm [thread:$0]  %s3211_s9, 1024, %s3213_s29, [#allocation7], %s3682_s2, %s3682_s2, %s3674_s27  }
 0xc67   :  { %1234 = vrot.lane.b32.xlu1 %v4360_v60, %s3672_s7  ;;  %1231 = vrot.lane.b32.xlu0 %v4360_v60, %s3673_s5 }
 0xc68   :  { %1228 = vrot.lane.b32.xlu2 %v4360_v60, %s3674_s27 }
 0xc6b   :  { %v4317_v18 = vld [vmem:[#allocation6 + $0x38] sm:$0xff] }
 0xc6c   :  { %v4289_v10 = vld [vmem:[#allocation6] sm:$0xff] }
 0xc6d   :  { %3273 = vmatmul.msk.f32.vlgmr.msrb.gmra.mxu2 %vm189_vm3, %v4289_v10 }
 0xc6f   :  { %1237 = vrot.lane.b32.xlu0 %v4360_v60, %s3675_s30 }
 0xc75   :  { %3274 = vmatmul.msk.f32.gmra.mxu2 %vm189_vm3, %v4293_v11 }
 0xc7d   :  { %3275 = vmatmul.msk.f32.gmra.mxu2 %vm189_vm3, %v4297_v15 }
 0xc85   :  { %3276 = vmatmul.msk.f32.gmra.mxu2 %vm189_vm3, %v4301_v16 }
 0xc8d   :  { %3277 = vmatmul.msk.f32.gmra.mxu2 %vm189_vm3, %v4305_v54 }
 0xc95   :  { %3278 = vmatmul.msk.f32.gmra.mxu2 %vm189_vm3, %v4309_v12 }
 0xc9d   :  { %3279 = vmatmul.msk.f32.gmra.mxu2 %vm189_vm3, %v4313_v17 }
 0xca5   :  { %3280 = vmatmul.msk.f32.gmra.mxu2 %vm189_vm3, %v4317_v18 }
 0xce7   :  { %v1127_v56 = vpop.f32.mrf.mxu3 }
 0xce8   :  { %v1128_v57 = vadd.f32 %v3382_v23, %v1127_v56 }
 0xcea   :  { %3442 = vtanh.f32 %v1128_v57 }
 0xcf0   :  { %v4348_v58 = vpop.eup %3442  ;;  %v1188_v59 = vpop.f32.mrf.mxu2 }
 0xcf1   :  { %1212 = vst.msk [vmem:[#allocation4] sm:$0xff] %vm81_vm1, %v1188_v59  ;;  %3282 = vmatmul.msk.f32.vlgmr.msrb.gmra.mxu0 %vm81_vm1, %v4348_v58 }
 0xcf8   :  { %v1191_v61 = vpop.f32.mrf.mxu2  ;;  %v4388_v14 = vld [vmem:[#allocation4] sm:$0xff] }
 0xcf9   :  { %1213 = vst.msk [vmem:[#allocation4 + $0x8] sm:$0xff] %vm81_vm1, %v1191_v61 }
 0xd00   :  { %v1194_v38 = vpop.f32.mrf.mxu2  ;;  %v4394_v25 = vld [vmem:[#allocation4 + $0x8] sm:$0xff] }
 0xd01   :  { %1214 = vst.msk [vmem:[#allocation4 + $0x10] sm:$0xff] %vm81_vm1, %v1194_v38 }
 0xd08   :  { %v1197_v62 = vpop.f32.mrf.mxu2  ;;  %v4398_v31 = vld [vmem:[#allocation4 + $0x10] sm:$0xff] }
 0xd09   :  { %1215 = vst.msk [vmem:[#allocation4 + $0x18] sm:$0xff] %vm81_vm1, %v1197_v62 }
 0xd10   :  { %v1200_v63 = vpop.f32.mrf.mxu2  ;;  %v4402_v37 = vld [vmem:[#allocation4 + $0x18] sm:$0xff] }
 0xd11   :  { %1216 = vst.msk [vmem:[#allocation4 + $0x20] sm:$0xff] %vm81_vm1, %v1200_v63 }
 0xd18   :  { %v1203_v0 = vpop.f32.mrf.mxu2  ;;  %v4406_v46 = vld [vmem:[#allocation4 + $0x20] sm:$0xff] }
 0xd19   :  { %1217 = vst.msk [vmem:[#allocation4 + $0x28] sm:$0xff] %vm81_vm1, %v1203_v0 }
 0xd20   :  { %v1206_v51 = vpop.f32.mrf.mxu2  ;;  %v4410_v53 = vld [vmem:[#allocation4 + $0x28] sm:$0xff] }
 0xd21   :  { %1218 = vst.msk [vmem:[#allocation4 + $0x30] sm:$0xff] %vm81_vm1, %v1206_v51 }
 0xd28   :  { %v1209_v9 = vpop.f32.mrf.mxu2  ;;  %v4414_v8 = vld [vmem:[#allocation4 + $0x30] sm:$0xff] }
 0xd29   :  { %1219 = vst.msk [vmem:[#allocation4 + $0x38] sm:$0xff] %vm81_vm1, %v1209_v9 }
 0xd30   :  { %v4418_v38 = vld [vmem:[#allocation4 + $0x38] sm:$0xff] }
 0xd6e   :  { %v4369_v4 = vpop.f32.mrf.mxu0 }
 0xd6f   :  { %1313 = vmatpush.msra.mxu1 %v4369_v4 }
 0xd70   :  { %3283 = vmatmul.msk.f32.vlgmr.msra.gmra.mxu1 %vm1249_vm13, %v4360_v60 }
 0xd78   :  { %3284 = vmatmul.msk.f32.gmra.mxu1 %vm1249_vm13, %v4360_v60 }
 0xd80   :  { %3285 = vmatmul.msk.f32.gmra.mxu1 %vm1249_vm13, %v4360_v60 }
 0xd88   :  { %3286 = vmatmul.msk.f32.gmra.mxu1 %vm1249_vm13, %v4360_v60 }
 0xd90   :  { %3287 = vmatmul.msk.f32.gmra.mxu1 %vm1249_vm13, %v4360_v60 }
 0xd98   :  { %3288 = vmatmul.msk.f32.gmra.mxu1 %vm1249_vm13, %v4360_v60 }
 0xda0   :  { %3289 = vmatmul.msk.f32.gmra.mxu1 %vm1249_vm13, %v4360_v60 }
 0xda8   :  { %3290 = vmatmul.msk.f32.gmra.mxu1 %vm1249_vm13, %v4360_v60 }
 0xded   :  { %v1315_v45 = vpop.f32.mrf.mxu1 }
 0xdee   :  { %v1339_v19 = vadd.f32 %v1315_v45, %v4388_v14  ;;  %v1232_v45 = vpop.permute.xlu0 %1231 }
 0xdf0   :  { %3444 = vtanh.f32 %v1339_v19  ;;  %v1229_v19 = vpop.permute.xlu2 %1228 }
 0xdf5   :  { %v1318_v26 = vpop.f32.mrf.mxu1 }
 0xdf6   :  { %v3445_v27 = vpop.eup %3444  ;;  %v1340_v28 = vadd.f32 %v1318_v26, %v4394_v25  ;;  %v1235_v26 = vpop.permute.xlu1 %1234 }
 0xdf7   :  { %v1359_v29 = vmul.f32 %v3445_v27, %v3383_v24  ;;  %v3679_v27 = vmov 0  }
 0xdf8   :  { %3446 = vtanh.f32 %v1340_v28  ;;  %3372 = vset.pattern.permute.xlu0 %v3679_v27  ;;  %3371 = vset.pattern.permute.xlu1 %v3679_v27  ;;  %v4426_v28 = vpop.permute.xlu0 %1237 }
 0xdf9   :  { %v1367_v30 = vsel %vm81_vm1, %v1359_v29, 0.0  ;;  %3370 = vset.pattern.permute.xlu2 %v3679_v27 }
 0xdfa   :  { %1368 = vadd.xlane.f32.xlu1 %v1367_v30 }
 0xdfd   :  { %v1321_v32 = vpop.f32.mrf.mxu1 }
 0xdfe   :  { %v3447_v33 = vpop.eup %3446  ;;  %v1341_v34 = vadd.f32 %v1321_v32, %v4398_v31 }
 0xdff   :  { %v1360_v35 = vmul.f32 %v3447_v33, %v3383_v24 }
 0xe00   :  { %3448 = vtanh.f32 %v1341_v34 }
 0xe01   :  { %v1370_v36 = vsel %vm81_vm1, %v1360_v35, 0.0 }
 0xe02   :  { %1371 = vadd.xlane.f32.xlu2 %v1370_v36 }
 0xe05   :  { %v1324_v39 = vpop.f32.mrf.mxu1 }
 0xe06   :  { %v3449_v41 = vpop.eup %3448  ;;  %v1342_v42 = vadd.f32 %v1324_v39, %v4402_v37 }
 0xe07   :  { %v1361_v43 = vmul.f32 %v3449_v41, %v3383_v24 }
 0xe08   :  { %3450 = vtanh.f32 %v1342_v42 }
 0xe09   :  { %v1373_v44 = vsel %vm81_vm1, %v1361_v43, 0.0 }
 0xe0a   :  { %1374 = vadd.xlane.f32.xlu0 %v1373_v44 }
 0xe0d   :  { %v1327_v40 = vpop.f32.mrf.mxu1 }
 0xe0e   :  { %v3451_v48 = vpop.eup %3450  ;;  %v1343_v49 = vadd.f32 %v1327_v40, %v4406_v46 }
 0xe0f   :  { %v1362_v50 = vmul.f32 %v3451_v48, %v3383_v24 }
 0xe10   :  { %3452 = vtanh.f32 %v1343_v49 }
 0xe11   :  { %v1376_v52 = vsel %vm81_vm1, %v1362_v50, 0.0 }
 0xe12   :  { %1377 = vadd.xlane.f32.xlu2 %v1376_v52 }
 0xe15   :  { %v1330_v47 = vpop.f32.mrf.mxu1 }
 0xe16   :  { %v3453_v55 = vpop.eup %3452  ;;  %v1344_v1 = vadd.f32 %v1330_v47, %v4410_v53 }
 0xe17   :  { %v1363_v3 = vmul.f32 %v3453_v55, %v3383_v24 }
 0xe18   :  { %3454 = vtanh.f32 %v1344_v1 }
 0xe19   :  { %v1379_v6 = vsel %vm81_vm1, %v1363_v3, 0.0 }
 0xe1a   :  { %1380 = vadd.xlane.f32.xlu1 %v1379_v6 }
 0xe1d   :  { %v1333_v23 = vpop.f32.mrf.mxu1 }
 0xe1e   :  { %v3455_v56 = vpop.eup %3454  ;;  %v1345_v57 = vadd.f32 %v1333_v23, %v4414_v8 }
 0xe1f   :  { %v1364_v59 = vmul.f32 %v3455_v56, %v3383_v24 }
 0xe20   :  { %3456 = vtanh.f32 %v1345_v57 }
 0xe21   :  { %v1382_v61 = vsel %vm81_vm1, %v1364_v59, 0.0 }
 0xe22   :  { %1383 = vadd.xlane.f32.xlu2 %v1382_v61 }
 0xe25   :  { %v1336_v62 = vpop.f32.mrf.mxu1 }
 0xe26   :  { %v3457_v63 = vpop.eup %3456  ;;  %v1346_v0 = vadd.f32 %v1336_v62, %v4418_v38 }
 0xe27   :  { %v1365_v2 = vmul.f32 %v3457_v63, %v3383_v24 }
 0xe28   :  { %3458 = vtanh.f32 %v1346_v0 }
 0xe29   :  { %v1385_v51 = vsel %vm81_vm1, %v1365_v2, 0.0 }
 0xe2a   :  { %1386 = vadd.xlane.f32.xlu0 %v1385_v51  ;;  %v1250_v51 = vsel %vm1249_vm13, %v4360_v60, %v1229_v19 }
 0xe2e   :  { %v3459_v5 = vpop.eup %3458 }
 0xe2f   :  { %v1366_v7 = vmul.f32 %v3459_v5, %v3383_v24 }
 0xe31   :  { %v1388_v9 = vsel %vm81_vm1, %v1366_v7, 0.0 }
 0xe32   :  { %1389 = vadd.xlane.f32.xlu1 %v1388_v9  ;;  %v1251_v9 = vsel %vm217_vm0, %v1250_v51, %v1232_v45 }
 0xe3a   :  { %1240 = vrot.lane.b32.xlu2 %v4360_v60, %s3676_s12 }
 0xe3e   :  { %1246 = vrot.lane.b32.xlu0 %v4360_v60, %s3677_s1 }
 0xe4b   :  { %1243 = vrot.lane.b32.xlu1 %v4360_v60, %s3678_s6 }
 0xe6d   :  { %v1369_v29 = vpop.xlane.xlu1 %1368 }
 0xe75   :  { %v1372_v24 = vpop.xlane.xlu2 %1371 }
 0xe76   :  { %v1391_v33 = vmax.f32 %v1369_v29, %v1372_v24 }
 0xe7d   :  { %v1375_v32 = vpop.xlane.xlu0 %1374 }
 0xe7e   :  { %v1392_v34 = vmax.f32 %v1391_v33, %v1375_v32 }
 0xe85   :  { %v1378_v30 = vpop.xlane.xlu2 %1377 }
 0xe86   :  { %v1393_v36 = vmax.f32 %v1392_v34, %v1378_v30 }
 0xe8d   :  { %v1381_v35 = vpop.xlane.xlu1 %1380 }
 0xe8e   :  { %v1394_v41 = vmax.f32 %v1393_v36, %v1381_v35 }
 0xe95   :  { %v1384_v39 = vpop.xlane.xlu2 %1383 }
 0xe96   :  { %v1395_v43 = vmax.f32 %v1394_v41, %v1384_v39 }
 0xe9d   :  { %v1387_v42 = vpop.xlane.xlu0 %1386  ;;  %v1241_v19 = vpop.permute.xlu2 %1240 }
 0xe9e   :  { %v1396_v44 = vmax.f32 %v1395_v43, %v1387_v42 }
 0xea5   :  { %v1390_v40 = vpop.xlane.xlu1 %1389 }
 0xea6   :  { %v1397_v48 = vmax.f32 %v1396_v44, %v1390_v40 }
 0xea8   :  { %v1405_v49 = vsub.f32 %v1390_v40, %v1397_v48  ;;  %v1404_v50 = vsub.f32 %v1387_v42, %v1397_v48  ;;  %v1403_v52 = vsub.f32 %v1384_v39, %v1397_v48  ;;  %v1402_v3 = vsub.f32 %v1381_v35, %v1397_v48 }
 0xea9   :  { %v1401_v6 = vsub.f32 %v1378_v30, %v1397_v48  ;;  %v1398_v23 = vsub.f32 %v1369_v29, %v1397_v48  ;;  %v1400_v57 = vsub.f32 %v1375_v32, %v1397_v48  ;;  %v1399_v61 = vsub.f32 %v1372_v24, %v1397_v48 }
 0xeaa   :  { %v1420_v47 = vmul.f32 1.442695, %v1405_v49  ;;  %v1418_v55 = vmul.f32 1.442695, %v1404_v50  ;;  %v1416_v1 = vmul.f32 1.442695, %v1403_v52  ;;  %v1253_v24 = vsel %vm1252_vm14, %v1251_v9, %v1235_v26 }
 0xeab   :  { %v1414_v56 = vmul.f32 1.442695, %v1402_v3  ;;  %v1412_v59 = vmul.f32 1.442695, %v1401_v6  ;;  %v1406_v62 = vmul.f32 1.442695, %v1398_v23  ;;  %v1254_v33 = vsel %vm81_vm1, %v1253_v24, %v4426_v28 }
 0xeac   :  { %3460 = vpow2.f32 %v1420_v47  ;;  %v1410_v0 = vmul.f32 1.442695, %v1400_v57  ;;  %v1408_v7 = vmul.f32 1.442695, %v1399_v61  ;;  %v1256_v45 = vsel %vm1255_vm15, %v1254_v33, %v1241_v19  ;;  %v3384_v28 = vld [vmem:[%s5047_s14] ss:$0 sm:$0xff] }
 0xead   :  { %3462 = vpow2.f32 %v1418_v55  ;;  %v4469_v57 = vld [vmem:[%s5046_s13 + $0x30] sm:$0xff] }
 0xeae   :  { %3464 = vpow2.f32 %v1416_v1  ;;  %v4497_v61 = vld [vmem:[%s5046_s13 + $0x10] sm:$0xff] }
 0xeaf   :  { %3466 = vpow2.f32 %v1414_v56  ;;  %v4464_v56 = vld [vmem:[%s5046_s13 + $0x38] sm:$0xff] }
 0xeb0   :  { %3468 = vpow2.f32 %v1412_v59  ;;  %v1247_v26 = vpop.permute.xlu0 %1246  ;;  %1931 = vmatpush.msrb.mxu1 %v4464_v56  ;;  %v4490_v59 = vld [vmem:[%s5046_s13 + $0x18] sm:$0xff] }
 0xeb1   :  { %3470 = vpow2.f32 %v1406_v62  ;;  %v4506_v62 = vld [vmem:[%s5046_s13 + $0x8] sm:$0xff] }
 0xeb2   :  { %v3461_v63 = vpop.eup %3460  ;;  %3472 = vpow2.f32 %v1410_v0  ;;  %1932 = vmatpush.msrb.mxu1 %v4469_v57 }
 0xeb3   :  { %v3463_v2 = vpop.eup %3462  ;;  %1467 = vperm.xlu2 %3370, %v3461_v63   ;;  %1509 = vmatpush.msrb.mxu3 %v3461_v63  ;;  %3474 = vpow2.f32 %v1408_v7  ;;  %v4511_v63 = vld [vmem:[%s5046_s13] sm:$0xff] }
 0xeb4   :  { %v3465_v5 = vpop.eup %3464  ;;  %1462 = vperm.xlu1 %3371, %v3463_v2  }
 0xeb5   :  { %1457 = vperm.xlu0 %3372, %v3465_v5   ;;  %1510 = vmatpush.msrb.mxu3 %v3463_v2  ;;  %v3467_v27 = vpop.eup %3466 }
 0xeb6   :  { %v3469_v29 = vpop.eup %3468 }
 0xeb7   :  { %1511 = vmatpush.msrb.mxu3 %v3465_v5  ;;  %v3471_v30 = vpop.eup %3470 }
 0xeb8   :  { %v3473_v32 = vpop.eup %3472 }
 0xeb9   :  { %1512 = vmatpush.msrb.mxu3 %v3467_v27  ;;  %v3475_v35 = vpop.eup %3474 }
 0xebb   :  { %1452 = vperm.xlu2 %3370, %v3467_v27   ;;  %1513 = vmatpush.msrb.mxu3 %v3469_v29 }
 0xebc   :  { %1447 = vperm.xlu1 %3371, %v3469_v29  }
 0xebd   :  { %1432 = vperm.xlu0 %3372, %v3471_v30   ;;  %1514 = vmatpush.msrb.mxu3 %v3473_v32  ;;  %v1244_v34 = vpop.permute.xlu1 %1243 }
 0xebe   :  { %v1258_v36 = vsel %vm1257_vm2, %v1256_v45, %v1244_v34  ;;  %v1541_v45 = vld [vmem:[#allocation3] sm:$0xff] }
 0xebf   :  { %1515 = vmatpush.msrb.mxu3 %v3475_v35  ;;  %v4433_v39 = vsel %vm1259_vm4, %v1258_v36, %v1247_v26 }
 0xec1   :  { %1516 = vmatpush.msrb.mxu3 %v3471_v30 }
 0xec2   :  { %3292 = vmatmul.msk.f32.vlgmr.msrb.gmra.mxu3 %vm189_vm3, %v4433_v39 }
 0xec3   :  { %1442 = vperm.xlu2 %3370, %v3473_v32   ;;  %1655 = vmatpush.msra.mxu3 %v4324_v20 }
 0xec4   :  { %1437 = vperm.xlu1 %3371, %v3475_v35  }
 0xec5   :  { %1576 = vrot.lane.b32.xlu0 %v4369_v4, %s3680_s21  ;;  %1656 = vmatpush.msra.mxu3 %v4329_v13 }
 0xec7   :  { %1657 = vmatpush.msra.mxu3 %v4335_v21 }
 0xec9   :  { %1658 = vmatpush.msra.mxu3 %v4342_v22 }
 0xecc   :  { %1601 = vrot.lane.b32.xlu1 %v3384_v28, %s3680_s21 }
 0xf0d   :  { %v1468_v41 = vpop.permute.xlu2 %1467 }
 0xf0e   :  { %v1477_v20 = vmul.f32 %v1468_v41, %v4317_v18 }
 0xf10   :  { %1489 = vmatpush.msra.mxu0 %v1477_v20 }
 0xf15   :  { %v1453_v42 = vpop.permute.xlu2 %1452 }
 0xf16   :  { %v1474_v21 = vmul.f32 %v1453_v42, %v4305_v54 }
 0xf1d   :  { %v1443_v48 = vpop.permute.xlu2 %1442 }
 0xf1e   :  { %v1472_v50 = vmul.f32 %v1443_v48, %v4297_v15 }
 0xf26   :  { %v1463_v43 = vpop.permute.xlu1 %1462 }
 0xf27   :  { %v1458_v44 = vpop.permute.xlu0 %1457  ;;  %v1476_v40 = vmul.f32 %v1463_v43, %v4313_v17 }
 0xf28   :  { %v1475_v13 = vmul.f32 %v1458_v44, %v4309_v12 }
 0xf29   :  { %1490 = vmatpush.msra.mxu0 %v1476_v40 }
 0xf2b   :  { %1491 = vmatpush.msra.mxu0 %v1475_v13 }
 0xf2d   :  { %1492 = vmatpush.msra.mxu0 %v1474_v21 }
 0xf2e   :  { %v1448_v22 = vpop.permute.xlu1 %1447 }
 0xf2f   :  { %v1473_v49 = vmul.f32 %v1448_v22, %v4301_v16  ;;  %v1433_v52 = vpop.permute.xlu0 %1432 }
 0xf30   :  { %v1470_v1 = vmul.f32 %v1433_v52, %v4289_v10 }
 0xf31   :  { %1493 = vmatpush.msra.mxu0 %v1473_v49 }
 0xf33   :  { %1494 = vmatpush.msra.mxu0 %v1472_v50 }
 0xf36   :  { %v1438_v47 = vpop.permute.xlu1 %1437 }
 0xf37   :  { %v1471_v55 = vmul.f32 %v1438_v47, %v4293_v11  ;;  %v1577_v36 = vpop.permute.xlu0 %1576 }
 0xf39   :  { %1495 = vmatpush.msra.mxu0 %v1471_v55 }
 0xf3b   :  { %1496 = vmatpush.msra.mxu0 %v1470_v1 }
 0xf3c   :  { %3291 = vmatmul.msk.f32.vlgmr.msra.gmra.mxu0 %vm189_vm3, %v4433_v39 }
 0xf3d   :  { %1561 = vmatpush.msrb.mxu0 %v4464_v56 }
 0xf3e   :  { %v1602_v6 = vpop.permute.xlu1 %1601 }
 0xf3f   :  { %v1604_v23 = vadd.f32 %v1602_v6, %v4369_v4  ;;  %v4476_v4 = vld [vmem:[%s5046_s13 + $0x28] sm:$0xff]  ;;  %1562 = vmatpush.msrb.mxu0 %v4469_v57 }
 0xf40   :  { %1933 = vmatpush.msrb.mxu1 %v4476_v4 }
 0xf41   :  { %1563 = vmatpush.msrb.mxu0 %v4476_v4 }
 0xf45   :  { %v1518_v3 = vpop.f32.mrf.mxu3 }
 0xf46   :  { %1523 = vperm.xlu2 %3370, %v1518_v3  }
 0xf4e   :  { %1606 = vrot.lane.b32.xlu2 %v1604_v23, %s3675_s30 }
 0xf56   :  { %1622 = vrot.lane.b32.xlu2 %v4348_v58, %s3675_s30  ;;  %v4485_v58 = vld [vmem:[%s5046_s13 + $0x20] sm:$0xff] }
 0xf57   :  { %1564 = vmatpush.msrb.mxu0 %v4485_v58  ;;  %1934 = vmatpush.msrb.mxu1 %v4485_v58 }
 0xf59   :  { %1565 = vmatpush.msrb.mxu0 %v4490_v59  ;;  %1935 = vmatpush.msrb.mxu1 %v4490_v59 }
 0xf5b   :  { %1566 = vmatpush.msrb.mxu0 %v4497_v61  ;;  %1936 = vmatpush.msrb.mxu1 %v4497_v61 }
 0xf5d   :  { %1567 = vmatpush.msrb.mxu0 %v4506_v62  ;;  %1937 = vmatpush.msrb.mxu1 %v4506_v62 }
 0xf5f   :  { %1568 = vmatpush.msrb.mxu0 %v4511_v63  ;;  %1938 = vmatpush.msrb.mxu1 %v4511_v63 }
 0xfa0   :  { %v1524_v0 = vpop.permute.xlu2 %1523 }
 0xfa1   :  { %3476 = vrcp.f32 %v1524_v0  ;;  %v1537_v27 = vand.u32 2147483648, %v1524_v0  ;;  %vm1531_vm6 = vweird.f32 %v1524_v0  ;;  %v1535_v24 = vand.u32 2147483647, %v1524_v0 }
 0xfa3   :  { %v1538_v19 = vor.u32 1.1754944e-38, %v1537_v27  ;;  %vm1536_vm9 = vcmp.eq.f32.partialorder %v1535_v24, 8.507059e+37 }
 0xfa7   :  { %v3477_v2 = vpop.eup %3476 }
 0xfa8   :  { %v1527_v51 = vmul.f32 %v3477_v2, %v1524_v0  ;;  %vm1532_vm5 = vweird.f32 %v3477_v2  ;;  %v1607_v50 = vpop.permute.xlu2 %1606 }
 0xfa9   :  { %vm1533_vm7 = vmor %vm1531_vm6, %vm1532_vm5 }
 0xfaa   :  { %v1528_v5 = vsub.f32 1.0, %v1527_v51 }
 0xfac   :  { %v1529_v7 = vmul.f32 %v3477_v2, %v1528_v5 }
 0xfae   :  { %v1530_v9 = vadd.f32 %v3477_v2, %v1529_v7 }
 0xfb0   :  { %v1534_v29 = vsel %vm1533_vm7, %v3477_v2, %v1530_v9  ;;  %v1623_v23 = vpop.permute.xlu2 %1622 }
 0xfb1   :  { %v1539_v32 = vsel %vm1536_vm9, %v1538_v19, %v1534_v29 }
 0xfb9   :  { %v1498_v30 = vpop.f32.mrf.mxu0 }
 0xfba   :  { %v4517_v33 = vmul.f32 %v1539_v32, %v1498_v30  ;;  %v3385_v30 = vld [vmem:[%s5043_s10] ss:$0 sm:$0xff] }
 0xfbc   :  { %3293 = vmatmul.msk.f32.vlgmr.msrb.gmra.mxu0 %vm189_vm3, %v4517_v33 }
0x1039   :  { %v1570_v34 = vpop.f32.mrf.mxu0 }
0x103a   :  { %v1573_v35 = vadd.f32 %v1570_v34, %v1541_v45 }
0x103c   :  { %v1579_v26 = vadd.f32 %v1577_v36, %v1573_v35 }
0x103e   :  { %v3294_v28 = vmul.f32 -1.442695, %v1579_v26 }
0x1040   :  { %3478 = vpow2.f32 %v3294_v28 }
0x1046   :  { %v3479_v41 = vpop.eup %3478 }
0x1047   :  { %v1583_v20 = vadd.f32 1.0, %v3479_v41 }
0x1049   :  { %3480 = vrcp.f32 %v1583_v20  ;;  %v1595_v40 = vand.u32 2147483648, %v1583_v20  ;;  %v1593_v21 = vand.u32 2147483647, %v1583_v20  ;;  %vm1589_vm11 = vweird.f32 %v1583_v20 }
0x104b   :  { %v1596_v22 = vor.u32 1.1754944e-38, %v1595_v40  ;;  %vm1594_vm8 = vcmp.eq.f32.partialorder %v1593_v21, 8.507059e+37 }
0x104f   :  { %v3481_v42 = vpop.eup %3480 }
0x1050   :  { %v1585_v43 = vmul.f32 %v3481_v42, %v1583_v20  ;;  %vm1590_vm10 = vweird.f32 %v3481_v42 }
0x1051   :  { %vm1591_vm12 = vmor %vm1589_vm11, %vm1590_vm10 }
0x1052   :  { %v1586_v44 = vsub.f32 1.0, %v1585_v43 }
0x1054   :  { %v1587_v13 = vmul.f32 %v3481_v42, %v1586_v44 }
0x1056   :  { %v1588_v48 = vadd.f32 %v3481_v42, %v1587_v13 }
0x1058   :  { %v1592_v49 = vsel %vm1591_vm12, %v3481_v42, %v1588_v48 }
0x1059   :  { %v1597_v52 = vsel %vm1594_vm8, %v1596_v22, %v1592_v49 }
0x105a   :  { %v1609_v47 = vmul.f32 %v1607_v50, %v1597_v52  ;;  %v1616_v6 = vsub.f32 1.0, %v1597_v52  ;;  %v1625_v51 = vmul.f32 %v1623_v23, %v1597_v52 }
0x105c   :  { %1611 = vrot.lane.b32.xlu1 %v1609_v47, %s3671_s28 }
0x10ce   :  { %v1612_v55 = vpop.permute.xlu1 %1611 }
0x10cf   :  { %v1614_v1 = vadd.f32 %v1612_v55, %v1573_v35 }
0x10d1   :  { %3482 = vtanh.f32 %v1614_v1 }
0x10d7   :  { %v3483_v3 = vpop.eup %3482 }
0x10d8   :  { %1618 = vrot.lane.b32.xlu0 %v3483_v3, %s3680_s21 }
0x114a   :  { %v1619_v0 = vpop.permute.xlu0 %1618 }
0x114b   :  { %v1621_v2 = vmul.f32 %v1619_v0, %v1616_v6 }
0x114d   :  { %v4523_v5 = vadd.f32 %v1625_v51, %v1621_v2 }
0x114f   :  { %1628 = vrot.lane.b32.xlu1 %v4523_v5, %s3680_s21 }
0x11c1   :  { %v1629_v7 = vpop.permute.xlu1 %1628 }
0x11c2   :  { %1631 = vst.msk [vmem:[#allocation5] sm:$0xff] %vm81_vm1, %v1629_v7  ;;  %3295 = vmatmul.msk.f32.vlgmr.msra.gmra.mxu3 %vm81_vm1, %v1629_v7 }
0x1245   :  { %v4529_v9 = vpop.f32.mrf.mxu3 }
0x1246   :  { %1686 = vmatpush.msra.mxu2 %v4529_v9  ;;  %3356 = vmatpush.msrb.mxu3 %v4529_v9 }
0x1247   :  { %3296 = vmatmul.msk.f32.vlgmr.msra.gmra.mxu2 %vm1249_vm13, %v4360_v60  ;;  %3299 = vmatmul.msk.f32.vlgmr.msrb.gmra.mxu3 %vm1249_vm13, %v4360_v60 }
0x124f   :  { %3297 = vmatmul.msk.f32.gmra.mxu2 %vm1249_vm13, %v4360_v60  ;;  %3300 = vmatmul.msk.f32.gmra.mxu3 %vm1249_vm13, %v4360_v60 }
0x1257   :  { %3298 = vmatmul.msk.f32.gmra.mxu2 %vm1249_vm13, %v4360_v60  ;;  %3301 = vmatmul.msk.f32.gmra.mxu3 %vm1249_vm13, %v4360_v60 }
0x125f   :  { %3302 = vmatmul.msk.f32.gmra.mxu3 %vm1249_vm13, %v4360_v60 }
0x1267   :  { %3303 = vmatmul.msk.f32.gmra.mxu3 %vm1249_vm13, %v4360_v60 }
0x12ca   :  { %v1688_v27 = vpop.f32.mrf.mxu2  ;;  %v1697_v24 = vpop.f32.mrf.mxu3 }
0x12cb   :  { %v1712_v29 = vadd.f32 %v1688_v27, %v4388_v14  ;;  %v1715_v19 = vadd.f32 %v1697_v24, %v4402_v37 }
0x12cd   :  { %3484 = vtanh.f32 %v1712_v29 }
0x12ce   :  { %3486 = vtanh.f32 %v1715_v19 }
0x12d2   :  { %v1691_v32 = vpop.f32.mrf.mxu2  ;;  %v1700_v45 = vpop.f32.mrf.mxu3 }
0x12d3   :  { %v3485_v34 = vpop.eup %3484  ;;  %v1713_v35 = vadd.f32 %v1691_v32, %v4394_v25  ;;  %v1716_v26 = vadd.f32 %v1700_v45, %v4406_v46 }
0x12d4   :  { %v1732_v36 = vmul.f32 %v3485_v34, %v3385_v30  ;;  %v3487_v14 = vpop.eup %3486 }
0x12d5   :  { %3488 = vtanh.f32 %v1713_v35  ;;  %v1735_v20 = vmul.f32 %v3487_v14, %v3385_v30 }
0x12d6   :  { %v1740_v28 = vsel %vm81_vm1, %v1732_v36, 0.0  ;;  %3490 = vtanh.f32 %v1716_v26 }
0x12d7   :  { %1741 = vadd.xlane.f32.xlu0 %v1740_v28  ;;  %v1749_v25 = vsel %vm81_vm1, %v1735_v20, 0.0 }
0x12da   :  { %v1694_v37 = vpop.f32.mrf.mxu2  ;;  %v1703_v41 = vpop.f32.mrf.mxu3 }
0x12db   :  { %v3489_v42 = vpop.eup %3488  ;;  %v1714_v43 = vadd.f32 %v1694_v37, %v4398_v31  ;;  %v1717_v40 = vadd.f32 %v1703_v41, %v4410_v53 }
0x12dc   :  { %v1733_v44 = vmul.f32 %v3489_v42, %v3385_v30  ;;  %v3491_v46 = vpop.eup %3490 }
0x12dd   :  { %3492 = vtanh.f32 %v1714_v43  ;;  %v1736_v48 = vmul.f32 %v3491_v46, %v3385_v30 }
0x12de   :  { %v1743_v13 = vsel %vm81_vm1, %v1733_v44, 0.0  ;;  %3494 = vtanh.f32 %v1717_v40 }
0x12df   :  { %1750 = vadd.xlane.f32.xlu0 %v1749_v25  ;;  %1744 = vadd.xlane.f32.xlu2 %v1743_v13  ;;  %v1752_v31 = vsel %vm81_vm1, %v1736_v48, 0.0 }
0x12e2   :  { %v1706_v21 = vpop.f32.mrf.mxu3 }
0x12e3   :  { %v3493_v22 = vpop.eup %3492  ;;  %v1718_v49 = vadd.f32 %v1706_v21, %v4414_v8 }
0x12e4   :  { %v1734_v50 = vmul.f32 %v3493_v22, %v3385_v30  ;;  %v3495_v53 = vpop.eup %3494 }
0x12e5   :  { %3496 = vtanh.f32 %v1718_v49  ;;  %v1737_v55 = vmul.f32 %v3495_v53, %v3385_v30 }
0x12e6   :  { %v1746_v52 = vsel %vm81_vm1, %v1734_v50, 0.0 }
0x12e7   :  { %1753 = vadd.xlane.f32.xlu2 %v1752_v31  ;;  %1747 = vadd.xlane.f32.xlu1 %v1746_v52  ;;  %v1755_v8 = vsel %vm81_vm1, %v1737_v55, 0.0 }
0x12ea   :  { %v1709_v47 = vpop.f32.mrf.mxu3 }
0x12eb   :  { %v3497_v1 = vpop.eup %3496  ;;  %v1719_v3 = vadd.f32 %v1709_v47, %v4418_v38 }
0x12ec   :  { %v1738_v6 = vmul.f32 %v3497_v1, %v3385_v30 }
0x12ed   :  { %3498 = vtanh.f32 %v1719_v3 }
0x12ee   :  { %v1758_v23 = vsel %vm81_vm1, %v1738_v6, 0.0 }
0x12ef   :  { %1759 = vadd.xlane.f32.xlu0 %v1758_v23  ;;  %1756 = vadd.xlane.f32.xlu1 %v1755_v8  ;;  %v3386_v8 = vld [vmem:[%s5047_s14] ss:$0 sm:$0xff] }
0x12f3   :  { %v3499_v0 = vpop.eup %3498 }
0x12f4   :  { %v1739_v2 = vmul.f32 %v3499_v0, %v3385_v30 }
0x12f6   :  { %v1761_v51 = vsel %vm81_vm1, %v1739_v2, 0.0 }
0x12f7   :  { %1762 = vadd.xlane.f32.xlu2 %v1761_v51 }
0x134a   :  { %v1742_v7 = vpop.xlane.xlu0 %1741 }
0x1352   :  { %v1745_v27 = vpop.xlane.xlu2 %1744  ;;  %v1751_v32 = vpop.xlane.xlu0 %1750 }
0x1353   :  { %v1764_v24 = vmax.f32 %v1742_v7, %v1745_v27 }
0x135a   :  { %v1748_v29 = vpop.xlane.xlu1 %1747  ;;  %v1754_v45 = vpop.xlane.xlu2 %1753 }
0x135b   :  { %v1765_v19 = vmax.f32 %v1764_v24, %v1748_v29 }
0x135d   :  { %v1766_v38 = vmax.f32 %v1765_v19, %v1751_v32 }
0x135f   :  { %v1767_v35 = vmax.f32 %v1766_v38, %v1754_v45 }
0x1362   :  { %v1757_v34 = vpop.xlane.xlu1 %1756  ;;  %v1760_v26 = vpop.xlane.xlu0 %1759 }
0x1363   :  { %v1768_v36 = vmax.f32 %v1767_v35, %v1757_v34 }
0x1365   :  { %v1769_v28 = vmax.f32 %v1768_v36, %v1760_v26 }
0x136a   :  { %v1763_v14 = vpop.xlane.xlu2 %1762 }
0x136b   :  { %v1770_v37 = vmax.f32 %v1769_v28, %v1763_v14 }
0x136d   :  { %v1778_v41 = vsub.f32 %v1763_v14, %v1770_v37  ;;  %v1777_v30 = vsub.f32 %v1760_v26, %v1770_v37  ;;  %v1776_v20 = vsub.f32 %v1757_v34, %v1770_v37  ;;  %v1774_v40 = vsub.f32 %v1751_v32, %v1770_v37 }
0x136e   :  { %v1775_v25 = vsub.f32 %v1754_v45, %v1770_v37  ;;  %v1773_v13 = vsub.f32 %v1748_v29, %v1770_v37  ;;  %v1771_v31 = vsub.f32 %v1742_v7, %v1770_v37  ;;  %v1772_v52 = vsub.f32 %v1745_v27, %v1770_v37 }
0x136f   :  { %v1793_v42 = vmul.f32 1.442695, %v1778_v41  ;;  %v1791_v43 = vmul.f32 1.442695, %v1777_v30  ;;  %v1789_v44 = vmul.f32 1.442695, %v1776_v20 }
0x1370   :  { %v1785_v46 = vmul.f32 1.442695, %v1774_v40  ;;  %v1787_v21 = vmul.f32 1.442695, %v1775_v25  ;;  %v1783_v22 = vmul.f32 1.442695, %v1773_v13 }
0x1371   :  { %3500 = vpow2.f32 %v1793_v42  ;;  %v1779_v53 = vmul.f32 1.442695, %v1771_v31  ;;  %v1781_v47 = vmul.f32 1.442695, %v1772_v52 }
0x1372   :  { %3502 = vpow2.f32 %v1791_v43 }
0x1373   :  { %3504 = vpow2.f32 %v1789_v44 }
0x1374   :  { %3506 = vpow2.f32 %v1785_v46 }
0x1375   :  { %3508 = vpow2.f32 %v1787_v21 }
0x1376   :  { %3510 = vpow2.f32 %v1783_v22 }
0x1377   :  { %v3501_v48 = vpop.eup %3500  ;;  %3512 = vpow2.f32 %v1779_v53 }
0x1378   :  { %v3503_v49 = vpop.eup %3502  ;;  %1840 = vperm.xlu1 %3371, %v3501_v48   ;;  %3514 = vpow2.f32 %v1781_v47 }
0x1379   :  { %v3505_v50 = vpop.eup %3504  ;;  %1835 = vperm.xlu0 %3372, %v3503_v49  }
0x137a   :  { %1830 = vperm.xlu2 %3370, %v3505_v50   ;;  %v3507_v55 = vpop.eup %3506 }
0x137b   :  { %v3509_v1 = vpop.eup %3508 }
0x137c   :  { %v3511_v3 = vpop.eup %3510 }
0x137d   :  { %v3513_v6 = vpop.eup %3512 }
0x137e   :  { %v3515_v23 = vpop.eup %3514 }
0x1380   :  { %1820 = vperm.xlu1 %3371, %v3507_v55  }
0x1381   :  { %1825 = vperm.xlu0 %3372, %v3509_v1  }
0x1382   :  { %1815 = vperm.xlu2 %3370, %v3511_v3  }
0x1388   :  { %1805 = vperm.xlu1 %3371, %v3513_v6  }
0x1389   :  { %1810 = vperm.xlu0 %3372, %v3515_v23  }
0x1390   :  { %1946 = vrot.lane.b32.xlu1 %v4529_v9, %s3680_s21 }
0x1391   :  { %1971 = vrot.lane.b32.xlu0 %v3386_v8, %s3680_s21 }
0x13d4   :  { %v1831_v2 = vpop.permute.xlu2 %1830 }
0x13d5   :  { %v1848_v24 = vmul.f32 %v1831_v2, %v4309_v12 }
0x13dc   :  { %v1816_v38 = vpop.permute.xlu2 %1815 }
0x13dd   :  { %v1845_v34 = vmul.f32 %v1816_v38, %v4297_v15 }
0x13ea   :  { %v1841_v0 = vpop.permute.xlu1 %1840 }
0x13eb   :  { %v1850_v51 = vmul.f32 %v1841_v0, %v4317_v18  ;;  %v1836_v7 = vpop.permute.xlu0 %1835 }
0x13ec   :  { %v1849_v27 = vmul.f32 %v1836_v7, %v4313_v17  ;;  %v4597_v7 = vld [vmem:[%s5041_s8 + $0x18] sm:$0xff] }
0x13ed   :  { %1859 = vmatpush.msra.mxu0 %v1850_v51  ;;  %2021 = vmatpush.msrb.mxu2 %v4597_v7 }
0x13ef   :  { %1860 = vmatpush.msra.mxu0 %v1849_v27  ;;  %v4602_v27 = vld [vmem:[%s5041_s8 + $0x10] sm:$0xff] }
0x13f0   :  { %2022 = vmatpush.msrb.mxu2 %v4602_v27 }
0x13f1   :  { %1861 = vmatpush.msra.mxu0 %v1848_v24  ;;  %v4608_v24 = vld [vmem:[%s5041_s8 + $0x8] sm:$0xff] }
0x13f2   :  { %v1821_v29 = vpop.permute.xlu1 %1820  ;;  %2023 = vmatpush.msrb.mxu2 %v4608_v24 }
0x13f3   :  { %v1826_v19 = vpop.permute.xlu0 %1825  ;;  %v1846_v45 = vmul.f32 %v1821_v29, %v4301_v16  ;;  %v4614_v29 = vld [vmem:[%s5041_s8] sm:$0xff] }
0x13f4   :  { %v1847_v32 = vmul.f32 %v1826_v19, %v4305_v54  ;;  %2024 = vmatpush.msrb.mxu2 %v4614_v29 }
0x13f6   :  { %1862 = vmatpush.msra.mxu0 %v1847_v32 }
0x13f8   :  { %1863 = vmatpush.msra.mxu0 %v1846_v45 }
0x13fa   :  { %1864 = vmatpush.msra.mxu0 %v1845_v34  ;;  %v1806_v35 = vpop.permute.xlu1 %1805 }
0x13fb   :  { %v1811_v18 = vpop.permute.xlu0 %1810  ;;  %v1843_v12 = vmul.f32 %v1806_v35, %v4289_v10 }
0x13fc   :  { %v1844_v17 = vmul.f32 %v1811_v18, %v4293_v11 }
0x13fe   :  { %1865 = vmatpush.msra.mxu0 %v1844_v17 }
0x1400   :  { %1866 = vmatpush.msra.mxu0 %v1843_v12 }
0x1401   :  { %3304 = vmatmul.msk.f32.vlgmr.msra.gmra.mxu0 %vm189_vm3, %v4433_v39 }
0x1402   :  { %1879 = vmatpush.msrb.mxu0 %v3501_v48  ;;  %v1947_v13 = vpop.permute.xlu1 %1946 }
0x1403   :  { %v1972_v10 = vpop.permute.xlu0 %1971 }
0x1404   :  { %1880 = vmatpush.msrb.mxu0 %v3503_v49  ;;  %v1974_v16 = vadd.f32 %v1972_v10, %v4529_v9  ;;  %v1911_v9 = vld [vmem:[#allocation3 + $0x8] sm:$0xff] }
0x1406   :  { %1881 = vmatpush.msrb.mxu0 %v3505_v50 }
0x1408   :  { %1882 = vmatpush.msrb.mxu0 %v3509_v1 }
0x140a   :  { %1883 = vmatpush.msrb.mxu0 %v3507_v55 }
0x140c   :  { %1884 = vmatpush.msrb.mxu0 %v3511_v3 }
0x140e   :  { %1885 = vmatpush.msrb.mxu0 %v3515_v23 }
0x1410   :  { %1886 = vmatpush.msrb.mxu0 %v3513_v6 }
0x1411   :  { %3305 = vmatmul.msk.f32.vlgmr.msrb.gmra.mxu0 %vm189_vm3, %v4433_v39 }
0x147e   :  { %v1868_v15 = vpop.f32.mrf.mxu0 }
0x148e   :  { %v1888_v11 = vpop.f32.mrf.mxu0 }
0x148f   :  { %1893 = vperm.xlu2 %3370, %v1888_v11   ;;  %v4650_v11 = vld [vmem:[#allocation4 + $0x8] sm:$0xff] }
0x1497   :  { %1976 = vrot.lane.b32.xlu2 %v1974_v16, %s3675_s30 }
0x14e9   :  { %v1894_v54 = vpop.permute.xlu2 %1893 }
0x14ea   :  { %3516 = vrcp.f32 %v1894_v54  ;;  %v1907_v14 = vand.u32 2147483648, %v1894_v54  ;;  %v1905_v41 = vand.u32 2147483647, %v1894_v54  ;;  %vm1901_vm15 = vweird.f32 %v1894_v54 }
0x14ec   :  { %v1908_v20 = vor.u32 1.1754944e-38, %v1907_v14  ;;  %vm1906_vm4 = vcmp.eq.f32.partialorder %v1905_v41, 8.507059e+37 }
0x14f0   :  { %v3517_v36 = vpop.eup %3516 }
0x14f1   :  { %v1897_v26 = vmul.f32 %v3517_v36, %v1894_v54  ;;  %vm1902_vm14 = vweird.f32 %v3517_v36  ;;  %v1977_v6 = vpop.permute.xlu2 %1976 }
0x14f2   :  { %vm1903_vm2 = vmor %vm1901_vm15, %vm1902_vm14 }
0x14f3   :  { %v1898_v28 = vsub.f32 1.0, %v1897_v26 }
0x14f5   :  { %v1899_v37 = vmul.f32 %v3517_v36, %v1898_v28  ;;  %v4654_v28 = vld [vmem:[#allocation4 + $0x10] sm:$0xff] }
0x14f7   :  { %v1900_v30 = vadd.f32 %v3517_v36, %v1899_v37 }
0x14f9   :  { %v1904_v42 = vsel %vm1903_vm2, %v3517_v36, %v1900_v30 }
0x14fa   :  { %v1909_v43 = vsel %vm1906_vm4, %v1908_v20, %v1904_v42  ;;  %v4658_v42 = vld [vmem:[#allocation4 + $0x18] sm:$0xff] }
0x14fb   :  { %v4588_v44 = vmul.f32 %v1909_v43, %v1868_v15  ;;  %v3387_v15 = vld [vmem:[%s5043_s10] ss:$0 sm:$0xff] }
0x14fd   :  { %3306 = vmatmul.msk.f32.vlgmr.msrb.gmra.mxu1 %vm189_vm3, %v4588_v44 }
0x157a   :  { %v1940_v40 = vpop.f32.mrf.mxu1 }
0x157b   :  { %v1943_v25 = vadd.f32 %v1940_v40, %v1911_v9 }
0x157d   :  { %v1949_v46 = vadd.f32 %v1947_v13, %v1943_v25 }
0x157f   :  { %v3307_v21 = vmul.f32 -1.442695, %v1949_v46  ;;  %v4662_v46 = vld [vmem:[#allocation4 + $0x20] sm:$0xff] }
0x1581   :  { %3518 = vpow2.f32 %v3307_v21 }
0x1587   :  { %v3519_v48 = vpop.eup %3518 }
0x1588   :  { %v1953_v22 = vadd.f32 1.0, %v3519_v48 }
0x158a   :  { %3520 = vrcp.f32 %v1953_v22  ;;  %v1965_v52 = vand.u32 2147483648, %v1953_v22  ;;  %v1963_v47 = vand.u32 2147483647, %v1953_v22  ;;  %vm1959_vm6 = vweird.f32 %v1953_v22 }
0x158c   :  { %v1966_v1 = vor.u32 1.1754944e-38, %v1965_v52  ;;  %vm1964_vm9 = vcmp.eq.f32.partialorder %v1963_v47, 8.507059e+37 }
0x1590   :  { %v3521_v49 = vpop.eup %3520 }
0x1591   :  { %v1955_v50 = vmul.f32 %v3521_v49, %v1953_v22  ;;  %vm1960_vm5 = vweird.f32 %v3521_v49 }
0x1592   :  { %vm1961_vm7 = vmor %vm1959_vm6, %vm1960_vm5 }
0x1593   :  { %v1956_v31 = vsub.f32 1.0, %v1955_v50 }
0x1595   :  { %v1957_v53 = vmul.f32 %v3521_v49, %v1956_v31  ;;  %v4666_v31 = vld [vmem:[#allocation4 + $0x28] sm:$0xff] }
0x1597   :  { %v1958_v55 = vadd.f32 %v3521_v49, %v1957_v53 }
0x1599   :  { %v1962_v3 = vsel %vm1961_vm7, %v3521_v49, %v1958_v55 }
0x159a   :  { %v1967_v23 = vsel %vm1964_vm9, %v1966_v1, %v1962_v3  ;;  %v4670_v3 = vld [vmem:[#allocation4 + $0x30] sm:$0xff] }
0x159b   :  { %v1979_v8 = vmul.f32 %v1977_v6, %v1967_v23  ;;  %v1986_v19 = vsub.f32 1.0, %v1967_v23  ;;  %v1992_v38 = vmul.f32 %v1967_v23, %v4523_v5  ;;  %v4644_v5 = vld [vmem:[#allocation4] sm:$0xff] }
0x159d   :  { %1981 = vrot.lane.b32.xlu0 %v1979_v8, %s3671_s28 }
0x160f   :  { %v1982_v0 = vpop.permute.xlu0 %1981 }
0x1610   :  { %v1984_v2 = vadd.f32 %v1982_v0, %v1943_v25 }
0x1612   :  { %3522 = vtanh.f32 %v1984_v2 }
0x1618   :  { %v3523_v51 = vpop.eup %3522 }
0x1619   :  { %1988 = vrot.lane.b32.xlu1 %v3523_v51, %s3680_s21  ;;  %v4674_v51 = vld [vmem:[#allocation4 + $0x38] sm:$0xff] }
0x168b   :  { %v1989_v32 = vpop.permute.xlu1 %1988 }
0x168c   :  { %v1991_v45 = vmul.f32 %v1989_v32, %v1986_v19 }
0x168e   :  { %v4619_v34 = vadd.f32 %v1992_v38, %v1991_v45 }
0x1690   :  { %1995 = vrot.lane.b32.xlu2 %v4619_v34, %s3680_s21 }
0x16ea   :  { %v1996_v18 = vpop.permute.xlu2 %1995 }
0x16eb   :  { %1998 = vst.msk [vmem:[#allocation5 + $0x8] sm:$0xff] %vm81_vm1, %v1996_v18  ;;  %3308 = vmatmul.msk.f32.vlgmr.msrb.gmra.mxu2 %vm81_vm1, %v1996_v18 }
0x176e   :  { %v4625_v35 = vpop.f32.mrf.mxu2 }
0x176f   :  { %2052 = vmatpush.msra.mxu0 %v4625_v35 }
0x1770   :  { %3309 = vmatmul.msk.f32.vlgmr.msra.gmra.mxu0 %vm1249_vm13, %v4360_v60 }
0x1778   :  { %3310 = vmatmul.msk.f32.gmra.mxu0 %vm1249_vm13, %v4360_v60 }
0x1780   :  { %3311 = vmatmul.msk.f32.gmra.mxu0 %vm1249_vm13, %v4360_v60 }
0x1788   :  { %3312 = vmatmul.msk.f32.gmra.mxu0 %vm1249_vm13, %v4360_v60 }
0x1790   :  { %3313 = vmatmul.msk.f32.gmra.mxu0 %vm1249_vm13, %v4360_v60 }
0x1798   :  { %3314 = vmatmul.msk.f32.gmra.mxu0 %vm1249_vm13, %v4360_v60 }
0x17a0   :  { %3315 = vmatmul.msk.f32.gmra.mxu0 %vm1249_vm13, %v4360_v60 }
0x17a8   :  { %3316 = vmatmul.msk.f32.gmra.mxu0 %vm1249_vm13, %v4360_v60 }
0x17ed   :  { %v2054_v17 = vpop.f32.mrf.mxu0 }
0x17ee   :  { %v2078_v12 = vadd.f32 %v2054_v17, %v4644_v5 }
0x17f0   :  { %3524 = vtanh.f32 %v2078_v12 }
0x17f5   :  { %v2057_v10 = vpop.f32.mrf.mxu0 }
0x17f6   :  { %v3525_v16 = vpop.eup %3524  ;;  %v2079_v54 = vadd.f32 %v2057_v10, %v4650_v11 }
0x17f7   :  { %v2098_v36 = vmul.f32 %v3525_v16, %v3387_v15 }
0x17f8   :  { %3526 = vtanh.f32 %v2079_v54 }
0x17f9   :  { %v2106_v26 = vsel %vm81_vm1, %v2098_v36, 0.0 }
0x17fa   :  { %2107 = vadd.xlane.f32.xlu0 %v2106_v26 }
0x17fd   :  { %v2060_v14 = vpop.f32.mrf.mxu0 }
0x17fe   :  { %v3527_v37 = vpop.eup %3526  ;;  %v2080_v41 = vadd.f32 %v2060_v14, %v4654_v28 }
0x17ff   :  { %v2099_v30 = vmul.f32 %v3527_v37, %v3387_v15 }
0x1800   :  { %3528 = vtanh.f32 %v2080_v41 }
0x1801   :  { %v2109_v20 = vsel %vm81_vm1, %v2099_v30, 0.0 }
0x1802   :  { %2110 = vadd.xlane.f32.xlu1 %v2109_v20 }
0x1805   :  { %v2063_v43 = vpop.f32.mrf.mxu0 }
0x1806   :  { %v3529_v9 = vpop.eup %3528  ;;  %v2081_v40 = vadd.f32 %v2063_v43, %v4658_v42 }
0x1807   :  { %v2100_v25 = vmul.f32 %v3529_v9, %v3387_v15 }
0x1808   :  { %3530 = vtanh.f32 %v2081_v40 }
0x1809   :  { %v2112_v13 = vsel %vm81_vm1, %v2100_v25, 0.0 }
0x180a   :  { %2113 = vadd.xlane.f32.xlu2 %v2112_v13 }
0x180d   :  { %v2066_v21 = vpop.f32.mrf.mxu0 }
0x180e   :  { %v3531_v48 = vpop.eup %3530  ;;  %v2082_v22 = vadd.f32 %v2066_v21, %v4662_v46 }
0x180f   :  { %v2101_v49 = vmul.f32 %v3531_v48, %v3387_v15 }
0x1810   :  { %3532 = vtanh.f32 %v2082_v22 }
0x1811   :  { %v2115_v50 = vsel %vm81_vm1, %v2101_v49, 0.0 }
0x1812   :  { %2116 = vadd.xlane.f32.xlu0 %v2115_v50 }
0x1815   :  { %v2069_v52 = vpop.f32.mrf.mxu0 }
0x1816   :  { %v3533_v53 = vpop.eup %3532  ;;  %v2083_v47 = vadd.f32 %v2069_v52, %v4666_v31 }
0x1817   :  { %v2102_v55 = vmul.f32 %v3533_v53, %v3387_v15 }
0x1818   :  { %3534 = vtanh.f32 %v2083_v47 }
0x1819   :  { %v2118_v1 = vsel %vm81_vm1, %v2102_v55, 0.0 }
0x181a   :  { %2119 = vadd.xlane.f32.xlu1 %v2118_v1 }
0x181d   :  { %v2072_v6 = vpop.f32.mrf.mxu0 }
0x181e   :  { %v3535_v23 = vpop.eup %3534  ;;  %v2084_v8 = vadd.f32 %v2072_v6, %v4670_v3 }
0x181f   :  { %v2103_v0 = vmul.f32 %v3535_v23, %v3387_v15 }
0x1820   :  { %3536 = vtanh.f32 %v2084_v8 }
0x1821   :  { %v2121_v2 = vsel %vm81_vm1, %v2103_v0, 0.0 }
0x1822   :  { %2122 = vadd.xlane.f32.xlu2 %v2121_v2 }
0x1825   :  { %v2075_v19 = vpop.f32.mrf.mxu0 }
0x1826   :  { %v3537_v32 = vpop.eup %3536  ;;  %v2085_v38 = vadd.f32 %v2075_v19, %v4674_v51 }
0x1827   :  { %v2104_v45 = vmul.f32 %v3537_v32, %v3387_v15 }
0x1828   :  { %3538 = vtanh.f32 %v2085_v38 }
0x1829   :  { %v2124_v18 = vsel %vm81_vm1, %v2104_v45, 0.0 }
0x182a   :  { %2125 = vadd.xlane.f32.xlu0 %v2124_v18 }
0x182e   :  { %v3539_v17 = vpop.eup %3538 }
0x182f   :  { %v2105_v12 = vmul.f32 %v3539_v17, %v3387_v15 }
0x1831   :  { %v2127_v10 = vsel %vm81_vm1, %v2105_v12, 0.0 }
0x1832   :  { %2128 = vadd.xlane.f32.xlu1 %v2127_v10 }
0x186d   :  { %v2108_v16 = vpop.xlane.xlu0 %2107 }
0x1875   :  { %v2111_v54 = vpop.xlane.xlu1 %2110 }
0x1876   :  { %v2130_v14 = vmax.f32 %v2108_v16, %v2111_v54 }
0x187d   :  { %v2114_v36 = vpop.xlane.xlu2 %2113 }
0x187e   :  { %v2131_v37 = vmax.f32 %v2130_v14, %v2114_v36 }
0x1885   :  { %v2117_v26 = vpop.xlane.xlu0 %2116 }
0x1886   :  { %v2132_v30 = vmax.f32 %v2131_v37, %v2117_v26  ;;  %v4694_v37 = vld [vmem:[#allocation6 + $0x30] sm:$0xff] }
0x188d   :  { %v2120_v41 = vpop.xlane.xlu1 %2119 }
0x188e   :  { %v2133_v43 = vmax.f32 %v2132_v30, %v2120_v41 }
0x1895   :  { %v2123_v20 = vpop.xlane.xlu2 %2122 }
0x1896   :  { %v2134_v40 = vmax.f32 %v2133_v43, %v2123_v20  ;;  %v4697_v43 = vld [vmem:[#allocation6 + $0x28] sm:$0xff] }
0x189d   :  { %v2126_v9 = vpop.xlane.xlu0 %2125 }
0x189e   :  { %v2135_v25 = vmax.f32 %v2134_v40, %v2126_v9 }
0x18a5   :  { %v2129_v13 = vpop.xlane.xlu1 %2128 }
0x18a6   :  { %v2136_v21 = vmax.f32 %v2135_v25, %v2129_v13  ;;  %v4700_v25 = vld [vmem:[#allocation6 + $0x20] sm:$0xff] }
0x18a8   :  { %v2144_v48 = vsub.f32 %v2129_v13, %v2136_v21  ;;  %v2143_v15 = vsub.f32 %v2126_v9, %v2136_v21  ;;  %v2142_v22 = vsub.f32 %v2123_v20, %v2136_v21  ;;  %v2141_v53 = vsub.f32 %v2120_v41, %v2136_v21 }
0x18a9   :  { %v2140_v47 = vsub.f32 %v2117_v26, %v2136_v21  ;;  %v2139_v1 = vsub.f32 %v2114_v36, %v2136_v21  ;;  %v2138_v23 = vsub.f32 %v2111_v54, %v2136_v21  ;;  %v2137_v2 = vsub.f32 %v2108_v16, %v2136_v21  ;;  %v3388_v54 = vld [vmem:[%s5047_s14] ss:$0 sm:$0xff]  ;;  %v4691_v36 = vld [vmem:[#allocation6 + $0x38] sm:$0xff] }
0x18aa   :  { %v2159_v49 = vmul.f32 1.442695, %v2144_v48  ;;  %v2157_v50 = vmul.f32 1.442695, %v2143_v15  ;;  %v2155_v52 = vmul.f32 1.442695, %v2142_v22 }
0x18ab   :  { %v2153_v55 = vmul.f32 1.442695, %v2141_v53  ;;  %v2151_v6 = vmul.f32 1.442695, %v2140_v47  ;;  %v2149_v0 = vmul.f32 1.442695, %v2139_v1 }
0x18ac   :  { %3540 = vpow2.f32 %v2159_v49  ;;  %v2147_v38 = vmul.f32 1.442695, %v2138_v23  ;;  %v2145_v45 = vmul.f32 1.442695, %v2137_v2  ;;  %v4703_v48 = vld [vmem:[#allocation6 + $0x18] sm:$0xff]  ;;  %v4706_v49 = vld [vmem:[#allocation6 + $0x10] sm:$0xff] }
0x18ad   :  { %3542 = vpow2.f32 %v2157_v50  ;;  %v4709_v53 = vld [vmem:[#allocation6 + $0x8] sm:$0xff]  ;;  %v4712_v1 = vld [vmem:[#allocation6] sm:$0xff] }
0x18ae   :  { %3544 = vpow2.f32 %v2155_v52 }
0x18af   :  { %3546 = vpow2.f32 %v2153_v55 }
0x18b0   :  { %3548 = vpow2.f32 %v2151_v6 }
0x18b1   :  { %3550 = vpow2.f32 %v2149_v0 }
0x18b2   :  { %v3541_v8 = vpop.eup %3540  ;;  %3552 = vpow2.f32 %v2147_v38 }
0x18b3   :  { %v3543_v19 = vpop.eup %3542  ;;  %2206 = vperm.xlu2 %3370, %v3541_v8   ;;  %2245 = vmatpush.msra.mxu2 %v3541_v8  ;;  %3554 = vpow2.f32 %v2145_v45  ;;  %v2277_v45 = vld [vmem:[#allocation3 + $0x10] sm:$0xff] }
0x18b4   :  { %v3545_v32 = vpop.eup %3544  ;;  %2201 = vperm.xlu0 %3372, %v3543_v19  }
0x18b5   :  { %2196 = vperm.xlu1 %3371, %v3545_v32   ;;  %2246 = vmatpush.msra.mxu2 %v3543_v19  ;;  %v3547_v18 = vpop.eup %3546 }
0x18b6   :  { %v3549_v17 = vpop.eup %3548 }
0x18b7   :  { %2247 = vmatpush.msra.mxu2 %v3545_v32  ;;  %v3551_v12 = vpop.eup %3550 }
0x18b8   :  { %v3553_v10 = vpop.eup %3552 }
0x18b9   :  { %2248 = vmatpush.msra.mxu2 %v3547_v18  ;;  %v3555_v16 = vpop.eup %3554 }
0x18bb   :  { %2186 = vperm.xlu2 %3370, %v3549_v17   ;;  %2249 = vmatpush.msra.mxu2 %v3549_v17 }
0x18bc   :  { %2191 = vperm.xlu0 %3372, %v3547_v18  }
0x18bd   :  { %2181 = vperm.xlu1 %3371, %v3551_v12   ;;  %2250 = vmatpush.msra.mxu2 %v3551_v12 }
0x18bf   :  { %2251 = vmatpush.msra.mxu2 %v3553_v10 }
0x18c1   :  { %2252 = vmatpush.msra.mxu2 %v3555_v16 }
0x18c2   :  { %3318 = vmatmul.msk.f32.vlgmr.msra.gmra.mxu2 %vm189_vm3, %v4433_v39 }
0x18c3   :  { %2171 = vperm.xlu2 %3370, %v3555_v16   ;;  %2387 = vmatpush.msrb.mxu2 %v4597_v7 }
0x18c4   :  { %2176 = vperm.xlu0 %3372, %v3553_v10  }
0x18c5   :  { %2388 = vmatpush.msrb.mxu2 %v4602_v27 }
0x18c7   :  { %2389 = vmatpush.msrb.mxu2 %v4608_v24 }
0x18c9   :  { %2390 = vmatpush.msrb.mxu2 %v4614_v29 }
0x18cb   :  { %2312 = vrot.lane.b32.xlu2 %v4625_v35, %s3680_s21 }
0x18cc   :  { %2337 = vrot.lane.b32.xlu0 %v3388_v54, %s3680_s21 }
0x190d   :  { %v2207_v26 = vpop.permute.xlu2 %2206 }
0x190e   :  { %v2216_v14 = vmul.f32 %v2207_v26, %v4691_v36 }
0x1910   :  { %2225 = vmatpush.msra.mxu1 %v2216_v14 }
0x1915   :  { %v2187_v40 = vpop.permute.xlu2 %2186 }
0x1916   :  { %v2212_v22 = vmul.f32 %v2187_v40, %v4703_v48 }
0x191d   :  { %v2172_v52 = vpop.permute.xlu2 %2171 }
0x191e   :  { %v2209_v6 = vmul.f32 %v2172_v52, %v4712_v1 }
0x1925   :  { %v2313_v12 = vpop.permute.xlu2 %2312 }
0x1926   :  { %v2202_v41 = vpop.permute.xlu0 %2201 }
0x1927   :  { %v2215_v30 = vmul.f32 %v2202_v41, %v4694_v37  ;;  %v2197_v20 = vpop.permute.xlu1 %2196 }
0x1928   :  { %v2214_v9 = vmul.f32 %v2197_v20, %v4697_v43 }
0x1929   :  { %2226 = vmatpush.msra.mxu1 %v2215_v30 }
0x192b   :  { %2227 = vmatpush.msra.mxu1 %v2214_v9 }
0x192e   :  { %v2192_v13 = vpop.permute.xlu0 %2191 }
0x192f   :  { %v2213_v21 = vmul.f32 %v2192_v13, %v4700_v25  ;;  %v2182_v15 = vpop.permute.xlu1 %2181 }
0x1930   :  { %v2211_v50 = vmul.f32 %v2182_v15, %v4706_v49 }
0x1931   :  { %2228 = vmatpush.msra.mxu1 %v2213_v21 }
0x1933   :  { %2229 = vmatpush.msra.mxu1 %v2212_v22 }
0x1935   :  { %2230 = vmatpush.msra.mxu1 %v2211_v50 }
0x1936   :  { %v2177_v47 = vpop.permute.xlu0 %2176 }
0x1937   :  { %v2210_v55 = vmul.f32 %v2177_v47, %v4709_v53 }
0x1939   :  { %2231 = vmatpush.msra.mxu1 %v2210_v55 }
0x193b   :  { %2232 = vmatpush.msra.mxu1 %v2209_v6 }
0x193c   :  { %3317 = vmatmul.msk.f32.vlgmr.msra.gmra.mxu1 %vm189_vm3, %v4433_v39 }
0x193d   :  { %2297 = vmatpush.msrb.mxu1 %v4464_v56 }
0x193e   :  { %v2338_v8 = vpop.permute.xlu0 %2337 }
0x193f   :  { %2298 = vmatpush.msrb.mxu1 %v4469_v57  ;;  %v2340_v0 = vadd.f32 %v2338_v8, %v4625_v35 }
0x1941   :  { %2299 = vmatpush.msrb.mxu1 %v4476_v4 }
0x1943   :  { %2300 = vmatpush.msrb.mxu1 %v4485_v58 }
0x1945   :  { %v2254_v23 = vpop.f32.mrf.mxu2  ;;  %2301 = vmatpush.msrb.mxu1 %v4490_v59 }
0x1946   :  { %2259 = vperm.xlu1 %3371, %v2254_v23  }
0x1947   :  { %2302 = vmatpush.msrb.mxu1 %v4497_v61 }
0x1949   :  { %2303 = vmatpush.msrb.mxu1 %v4506_v62 }
0x194b   :  { %2304 = vmatpush.msrb.mxu1 %v4511_v63 }
0x194e   :  { %2342 = vrot.lane.b32.xlu1 %v2340_v0, %s3675_s30 }
0x19b8   :  { %v2260_v56 = vpop.permute.xlu1 %2259 }
0x19b9   :  { %3556 = vrcp.f32 %v2260_v56  ;;  %v2273_v2 = vand.u32 2147483648, %v2260_v56  ;;  %v2271_v59 = vand.u32 2147483647, %v2260_v56  ;;  %vm2267_vm11 = vweird.f32 %v2260_v56  ;;  %v2234_v63 = vpop.f32.mrf.mxu1 }
0x19bb   :  { %v2274_v61 = vor.u32 1.1754944e-38, %v2273_v2  ;;  %vm2272_vm8 = vcmp.eq.f32.partialorder %v2271_v59, 8.507059e+37 }
0x19bf   :  { %v3557_v57 = vpop.eup %3556 }
0x19c0   :  { %v2263_v4 = vmul.f32 %v3557_v57, %v2260_v56  ;;  %vm2268_vm10 = vweird.f32 %v3557_v57  ;;  %v2343_v22 = vpop.permute.xlu1 %2342 }
0x19c1   :  { %vm2269_vm12 = vmor %vm2267_vm11, %vm2268_vm10 }
0x19c2   :  { %v2264_v58 = vsub.f32 1.0, %v2263_v4 }
0x19c4   :  { %v2265_v19 = vmul.f32 %v3557_v57, %v2264_v58 }
0x19c6   :  { %v2266_v32 = vadd.f32 %v3557_v57, %v2265_v19  ;;  %v3389_v19 = vld [vmem:[%s5043_s10] ss:$0 sm:$0xff] }
0x19c8   :  { %v2270_v62 = vsel %vm2269_vm12, %v3557_v57, %v2266_v32 }
0x19c9   :  { %v2275_v38 = vsel %vm2272_vm8, %v2274_v61, %v2270_v62 }
0x19ca   :  { %v4727_v35 = vmul.f32 %v2275_v38, %v2234_v63 }
0x19cc   :  { %3319 = vmatmul.msk.f32.vlgmr.msrb.gmra.mxu1 %vm189_vm3, %v4727_v35 }
0x1a49   :  { %v2306_v18 = vpop.f32.mrf.mxu1 }
0x1a4a   :  { %v2309_v17 = vadd.f32 %v2306_v18, %v2277_v45 }
0x1a4c   :  { %v2315_v10 = vadd.f32 %v2313_v12, %v2309_v17 }
0x1a4e   :  { %v3320_v16 = vmul.f32 -1.442695, %v2315_v10 }
0x1a50   :  { %3558 = vpow2.f32 %v3320_v16 }
0x1a56   :  { %v3559_v54 = vpop.eup %3558 }
0x1a57   :  { %v2319_v26 = vadd.f32 1.0, %v3559_v54 }
0x1a59   :  { %3560 = vrcp.f32 %v2319_v26  ;;  %v2331_v20 = vand.u32 2147483648, %v2319_v26  ;;  %v2329_v40 = vand.u32 2147483647, %v2319_v26  ;;  %vm2325_vm15 = vweird.f32 %v2319_v26 }
0x1a5b   :  { %v2332_v21 = vor.u32 1.1754944e-38, %v2331_v20  ;;  %vm2330_vm4 = vcmp.eq.f32.partialorder %v2329_v40, 8.507059e+37 }
0x1a5f   :  { %v3561_v14 = vpop.eup %3560 }
0x1a60   :  { %v2321_v41 = vmul.f32 %v3561_v14, %v2319_v26  ;;  %vm2326_vm14 = vweird.f32 %v3561_v14 }
0x1a61   :  { %vm2327_vm2 = vmor %vm2325_vm15, %vm2326_vm14 }
0x1a62   :  { %v2322_v30 = vsub.f32 1.0, %v2321_v41 }
0x1a64   :  { %v2323_v9 = vmul.f32 %v3561_v14, %v2322_v30 }
0x1a66   :  { %v2324_v13 = vadd.f32 %v3561_v14, %v2323_v9 }
0x1a68   :  { %v2328_v15 = vsel %vm2327_vm2, %v3561_v14, %v2324_v13 }
0x1a69   :  { %v2333_v50 = vsel %vm2330_vm4, %v2332_v21, %v2328_v15  ;;  %vm3143_vm4 = vcmask 785408  }
0x1a6a   :  { %v2345_v52 = vmul.f32 %v2343_v22, %v2333_v50  ;;  %v2352_v23 = vsub.f32 1.0, %v2333_v50  ;;  %v2358_v0 = vmul.f32 %v2333_v50, %v4619_v34 }
0x1a6c   :  { %2347 = vrot.lane.b32.xlu0 %v2345_v52, %s3671_s28 }
0x1ade   :  { %v2348_v47 = vpop.permute.xlu0 %2347 }
0x1adf   :  { %v2350_v55 = vadd.f32 %v2348_v47, %v2309_v17 }
0x1ae1   :  { %3562 = vtanh.f32 %v2350_v55 }
0x1ae7   :  { %v3563_v6 = vpop.eup %3562 }
0x1ae8   :  { %2354 = vrot.lane.b32.xlu2 %v3563_v6, %s3680_s21 }
0x1b42   :  { %v2355_v8 = vpop.permute.xlu2 %2354 }
0x1b43   :  { %v2357_v56 = vmul.f32 %v2355_v8, %v2352_v23 }
0x1b45   :  { %v4734_v57 = vadd.f32 %v2358_v0, %v2357_v56 }
0x1b47   :  { %2361 = vrot.lane.b32.xlu1 %v4734_v57, %s3680_s21 }
0x1bb9   :  { %v2362_v4 = vpop.permute.xlu1 %2361 }
0x1bba   :  { %2364 = vst.msk [vmem:[#allocation5 + $0x10] sm:$0xff] %vm81_vm1, %v2362_v4  ;;  %3321 = vmatmul.msk.f32.vlgmr.msrb.gmra.mxu2 %vm81_vm1, %v2362_v4 }
0x1c3d   :  { %v4740_v58 = vpop.f32.mrf.mxu2 }
0x1c3e   :  { %2418 = vmatpush.msra.mxu3 %v4740_v58 }
0x1c3f   :  { %3322 = vmatmul.msk.f32.vlgmr.msra.gmra.mxu3 %vm1249_vm13, %v4360_v60 }
0x1c47   :  { %3323 = vmatmul.msk.f32.gmra.mxu3 %vm1249_vm13, %v4360_v60 }
0x1c4f   :  { %3324 = vmatmul.msk.f32.gmra.mxu3 %vm1249_vm13, %v4360_v60 }
0x1c57   :  { %3325 = vmatmul.msk.f32.gmra.mxu3 %vm1249_vm13, %v4360_v60 }
0x1c5f   :  { %3326 = vmatmul.msk.f32.gmra.mxu3 %vm1249_vm13, %v4360_v60 }
0x1c67   :  { %3327 = vmatmul.msk.f32.gmra.mxu3 %vm1249_vm13, %v4360_v60 }
0x1c6f   :  { %3328 = vmatmul.msk.f32.gmra.mxu3 %vm1249_vm13, %v4360_v60 }
0x1c77   :  { %3329 = vmatmul.msk.f32.gmra.mxu3 %vm1249_vm13, %v4360_v60 }
0x1cc2   :  { %v2420_v34 = vpop.f32.mrf.mxu3 }
0x1cc3   :  { %v2444_v2 = vadd.f32 %v2420_v34, %v4644_v5 }
0x1cc5   :  { %3564 = vtanh.f32 %v2444_v2 }
0x1cca   :  { %v2423_v59 = vpop.f32.mrf.mxu3 }
0x1ccb   :  { %v3565_v32 = vpop.eup %3564  ;;  %v2445_v61 = vadd.f32 %v2423_v59, %v4650_v11 }
0x1ccc   :  { %v2464_v62 = vmul.f32 %v3565_v32, %v3389_v19 }
0x1ccd   :  { %3566 = vtanh.f32 %v2445_v61 }
0x1cce   :  { %v2472_v63 = vsel %vm81_vm1, %v2464_v62, 0.0 }
0x1ccf   :  { %2473 = vadd.xlane.f32.xlu0 %v2472_v63 }
0x1cd2   :  { %v2426_v38 = vpop.f32.mrf.mxu3 }
0x1cd3   :  { %v3567_v45 = vpop.eup %3566  ;;  %v2446_v18 = vadd.f32 %v2426_v38, %v4654_v28 }
0x1cd4   :  { %v2465_v17 = vmul.f32 %v3567_v45, %v3389_v19 }
0x1cd5   :  { %3568 = vtanh.f32 %v2446_v18 }
0x1cd6   :  { %v2475_v12 = vsel %vm81_vm1, %v2465_v17, 0.0 }
0x1cd7   :  { %2476 = vadd.xlane.f32.xlu2 %v2475_v12 }
0x1cda   :  { %v2429_v10 = vpop.f32.mrf.mxu3 }
0x1cdb   :  { %v3569_v16 = vpop.eup %3568  ;;  %v2447_v54 = vadd.f32 %v2429_v10, %v4658_v42 }
0x1cdc   :  { %v2466_v26 = vmul.f32 %v3569_v16, %v3389_v19 }
0x1cdd   :  { %3570 = vtanh.f32 %v2447_v54 }
0x1cde   :  { %v2478_v14 = vsel %vm81_vm1, %v2466_v26, 0.0 }
0x1cdf   :  { %2479 = vadd.xlane.f32.xlu1 %v2478_v14 }
0x1ce2   :  { %v2432_v41 = vpop.f32.mrf.mxu3 }
0x1ce3   :  { %v3571_v30 = vpop.eup %3570  ;;  %v2448_v20 = vadd.f32 %v2432_v41, %v4662_v46 }
0x1ce4   :  { %v2467_v9 = vmul.f32 %v3571_v30, %v3389_v19 }
0x1ce5   :  { %3572 = vtanh.f32 %v2448_v20 }
0x1ce6   :  { %v2481_v40 = vsel %vm81_vm1, %v2467_v9, 0.0 }
0x1ce7   :  { %2482 = vadd.xlane.f32.xlu0 %v2481_v40 }
0x1cea   :  { %v2435_v13 = vpop.f32.mrf.mxu3 }
0x1ceb   :  { %v3573_v21 = vpop.eup %3572  ;;  %v2449_v15 = vadd.f32 %v2435_v13, %v4666_v31 }
0x1cec   :  { %v2468_v22 = vmul.f32 %v3573_v21, %v3389_v19 }
0x1ced   :  { %3574 = vtanh.f32 %v2449_v15 }
0x1cee   :  { %v2484_v50 = vsel %vm81_vm1, %v2468_v22, 0.0 }
0x1cef   :  { %2485 = vadd.xlane.f32.xlu2 %v2484_v50 }
0x1cf2   :  { %v2438_v52 = vpop.f32.mrf.mxu3 }
0x1cf3   :  { %v3575_v47 = vpop.eup %3574  ;;  %v2450_v55 = vadd.f32 %v2438_v52, %v4670_v3 }
0x1cf4   :  { %v2469_v6 = vmul.f32 %v3575_v47, %v3389_v19 }
0x1cf5   :  { %3576 = vtanh.f32 %v2450_v55 }
0x1cf6   :  { %v2487_v23 = vsel %vm81_vm1, %v2469_v6, 0.0 }
0x1cf7   :  { %2488 = vadd.xlane.f32.xlu1 %v2487_v23 }
0x1cfa   :  { %v2441_v8 = vpop.f32.mrf.mxu3 }
0x1cfb   :  { %v3577_v0 = vpop.eup %3576  ;;  %v2451_v56 = vadd.f32 %v2441_v8, %v4674_v51 }
0x1cfc   :  { %v2470_v4 = vmul.f32 %v3577_v0, %v3389_v19 }
0x1cfd   :  { %3578 = vtanh.f32 %v2451_v56 }
0x1cfe   :  { %v2490_v34 = vsel %vm81_vm1, %v2470_v4, 0.0 }
0x1cff   :  { %2491 = vadd.xlane.f32.xlu0 %v2490_v34 }
0x1d03   :  { %v3579_v2 = vpop.eup %3578 }
0x1d04   :  { %v2471_v59 = vmul.f32 %v3579_v2, %v3389_v19 }
0x1d06   :  { %v2493_v32 = vsel %vm81_vm1, %v2471_v59, 0.0 }
0x1d07   :  { %2494 = vadd.xlane.f32.xlu2 %v2493_v32 }
0x1d42   :  { %v2474_v61 = vpop.xlane.xlu0 %2473 }
0x1d4a   :  { %v2477_v62 = vpop.xlane.xlu2 %2476 }
0x1d4b   :  { %v2496_v45 = vmax.f32 %v2474_v61, %v2477_v62 }
0x1d52   :  { %v2480_v63 = vpop.xlane.xlu1 %2479 }
0x1d53   :  { %v2497_v18 = vmax.f32 %v2496_v45, %v2480_v63 }
0x1d5a   :  { %v2483_v38 = vpop.xlane.xlu0 %2482 }
0x1d5b   :  { %v2498_v12 = vmax.f32 %v2497_v18, %v2483_v38 }
0x1d62   :  { %v2486_v17 = vpop.xlane.xlu2 %2485 }
0x1d63   :  { %v2499_v16 = vmax.f32 %v2498_v12, %v2486_v17 }
0x1d6a   :  { %v2489_v10 = vpop.xlane.xlu1 %2488 }
0x1d6b   :  { %v2500_v26 = vmax.f32 %v2499_v16, %v2489_v10 }
0x1d72   :  { %v2492_v54 = vpop.xlane.xlu0 %2491 }
0x1d73   :  { %v2501_v14 = vmax.f32 %v2500_v26, %v2492_v54 }
0x1d7a   :  { %v2495_v41 = vpop.xlane.xlu2 %2494 }
0x1d7b   :  { %v2502_v30 = vmax.f32 %v2501_v14, %v2495_v41 }
0x1d7d   :  { %v2510_v20 = vsub.f32 %v2495_v41, %v2502_v30  ;;  %v2509_v19 = vsub.f32 %v2492_v54, %v2502_v30  ;;  %v2508_v9 = vsub.f32 %v2489_v10, %v2502_v30  ;;  %v2507_v15 = vsub.f32 %v2486_v17, %v2502_v30 }
0x1d7e   :  { %v2506_v22 = vsub.f32 %v2483_v38, %v2502_v30  ;;  %v2505_v52 = vsub.f32 %v2480_v63, %v2502_v30  ;;  %v2504_v55 = vsub.f32 %v2477_v62, %v2502_v30  ;;  %v2503_v8 = vsub.f32 %v2474_v61, %v2502_v30  ;;  %v3390_v63 = vld [vmem:[%s5047_s14] ss:$0 sm:$0xff] }
0x1d7f   :  { %v2525_v40 = vmul.f32 1.442695, %v2510_v20  ;;  %v2523_v13 = vmul.f32 1.442695, %v2509_v19  ;;  %v2521_v21 = vmul.f32 1.442695, %v2508_v9 }
0x1d80   :  { %v2519_v50 = vmul.f32 1.442695, %v2507_v15  ;;  %v2517_v47 = vmul.f32 1.442695, %v2506_v22  ;;  %v2515_v23 = vmul.f32 1.442695, %v2505_v52 }
0x1d81   :  { %3580 = vpow2.f32 %v2525_v40  ;;  %v2513_v4 = vmul.f32 1.442695, %v2504_v55  ;;  %v2511_v34 = vmul.f32 1.442695, %v2503_v8  ;;  %v4805_v40 = vld [vmem:[%s5046_s13 + $0x38] sm:$0xff]  ;;  %v4834_v22 = vld [vmem:[%s5046_s13 + $0x10] sm:$0xff] }
0x1d82   :  { %3582 = vpow2.f32 %v2523_v13  ;;  %v4810_v13 = vld [vmem:[%s5046_s13 + $0x30] sm:$0xff]  ;;  %v4828_v15 = vld [vmem:[%s5046_s13 + $0x18] sm:$0xff]  ;;  %v4841_v52 = vld [vmem:[%s5046_s13 + $0x8] sm:$0xff] }
0x1d83   :  { %3584 = vpow2.f32 %v2521_v21  ;;  %v4816_v21 = vld [vmem:[%s5046_s13 + $0x28] sm:$0xff] }
0x1d84   :  { %3586 = vpow2.f32 %v2519_v50 }
0x1d85   :  { %3588 = vpow2.f32 %v2517_v47  ;;  %v4846_v47 = vld [vmem:[%s5046_s13] sm:$0xff] }
0x1d86   :  { %3590 = vpow2.f32 %v2515_v23 }
0x1d87   :  { %v3581_v6 = vpop.eup %3580  ;;  %3592 = vpow2.f32 %v2513_v4 }
0x1d88   :  { %v3583_v0 = vpop.eup %3582  ;;  %2572 = vperm.xlu1 %3371, %v3581_v6   ;;  %2611 = vmatpush.msra.mxu1 %v3581_v6  ;;  %3594 = vpow2.f32 %v2511_v34 }
0x1d89   :  { %v3585_v56 = vpop.eup %3584  ;;  %2567 = vperm.xlu0 %3372, %v3583_v0  }
0x1d8a   :  { %2562 = vperm.xlu2 %3370, %v3585_v56   ;;  %2612 = vmatpush.msra.mxu1 %v3583_v0  ;;  %v3587_v2 = vpop.eup %3586 }
0x1d8b   :  { %v3589_v59 = vpop.eup %3588 }
0x1d8c   :  { %2613 = vmatpush.msra.mxu1 %v3585_v56  ;;  %v3591_v32 = vpop.eup %3590 }
0x1d8d   :  { %v3593_v61 = vpop.eup %3592 }
0x1d8e   :  { %2614 = vmatpush.msra.mxu1 %v3587_v2  ;;  %v3595_v62 = vpop.eup %3594 }
0x1d90   :  { %2552 = vperm.xlu1 %3371, %v3589_v59   ;;  %2615 = vmatpush.msra.mxu1 %v3589_v59 }
0x1d91   :  { %2557 = vperm.xlu0 %3372, %v3587_v2  }
0x1d92   :  { %2547 = vperm.xlu2 %3370, %v3591_v32   ;;  %2616 = vmatpush.msra.mxu1 %v3591_v32 }
0x1d94   :  { %2617 = vmatpush.msra.mxu1 %v3593_v61 }
0x1d96   :  { %2618 = vmatpush.msra.mxu1 %v3595_v62 }
0x1d97   :  { %3331 = vmatmul.msk.f32.vlgmr.msra.gmra.mxu1 %vm189_vm3, %v4433_v39 }
0x1d98   :  { %2537 = vperm.xlu1 %3371, %v3595_v62   ;;  %2753 = vmatpush.msrb.mxu1 %v4597_v7  ;;  %v4854_v62 = vld [vmem:[#allocation3 + $0x18] sm:$0xff] }
0x1d99   :  { %2542 = vperm.xlu0 %3372, %v3593_v61  }
0x1d9a   :  { %2754 = vmatpush.msrb.mxu1 %v4602_v27 }
0x1d9c   :  { %2755 = vmatpush.msrb.mxu1 %v4608_v24 }
0x1d9e   :  { %2756 = vmatpush.msrb.mxu1 %v4614_v29 }
0x1da0   :  { %2678 = vrot.lane.b32.xlu1 %v4740_v58, %s3680_s21 }
0x1da1   :  { %2703 = vrot.lane.b32.xlu0 %v3390_v63, %s3680_s21 }
0x1de4   :  { %v2563_v45 = vpop.permute.xlu2 %2562 }
0x1de5   :  { %v2580_v24 = vmul.f32 %v2563_v45, %v4697_v43 }
0x1dec   :  { %v2548_v10 = vpop.permute.xlu2 %2547 }
0x1ded   :  { %v2577_v54 = vmul.f32 %v2548_v10, %v4706_v49 }
0x1dfa   :  { %v2573_v38 = vpop.permute.xlu1 %2572 }
0x1dfb   :  { %v2582_v7 = vmul.f32 %v2573_v38, %v4691_v36  ;;  %v2568_v18 = vpop.permute.xlu0 %2567 }
0x1dfc   :  { %v2581_v27 = vmul.f32 %v2568_v18, %v4694_v37 }
0x1dfd   :  { %2591 = vmatpush.msra.mxu2 %v2582_v7 }
0x1dff   :  { %2592 = vmatpush.msra.mxu2 %v2581_v27 }
0x1e01   :  { %2593 = vmatpush.msra.mxu2 %v2580_v24 }
0x1e02   :  { %v2553_v17 = vpop.permute.xlu1 %2552 }
0x1e03   :  { %v2558_v12 = vpop.permute.xlu0 %2557  ;;  %v2578_v16 = vmul.f32 %v2553_v17, %v4703_v48 }
0x1e04   :  { %v2579_v29 = vmul.f32 %v2558_v12, %v4700_v25 }
0x1e06   :  { %2594 = vmatpush.msra.mxu2 %v2579_v29 }
0x1e08   :  { %2595 = vmatpush.msra.mxu2 %v2578_v16 }
0x1e0a   :  { %2596 = vmatpush.msra.mxu2 %v2577_v54  ;;  %v2538_v14 = vpop.permute.xlu1 %2537 }
0x1e0b   :  { %v2543_v26 = vpop.permute.xlu0 %2542  ;;  %v2575_v30 = vmul.f32 %v2538_v14, %v4712_v1 }
0x1e0c   :  { %v2576_v41 = vmul.f32 %v2543_v26, %v4709_v53 }
0x1e0e   :  { %2597 = vmatpush.msra.mxu2 %v2576_v41 }
0x1e10   :  { %2598 = vmatpush.msra.mxu2 %v2575_v30 }
0x1e11   :  { %3330 = vmatmul.msk.f32.vlgmr.msra.gmra.mxu2 %vm189_vm3, %v4433_v39 }
0x1e12   :  { %2663 = vmatpush.msrb.mxu2 %v4805_v40  ;;  %v2679_v45 = vpop.permute.xlu1 %2678 }
0x1e13   :  { %v2704_v19 = vpop.permute.xlu0 %2703 }
0x1e14   :  { %v2620_v20 = vpop.f32.mrf.mxu1  ;;  %v2706_v9 = vadd.f32 %v2704_v19, %v4740_v58  ;;  %2664 = vmatpush.msrb.mxu2 %v4810_v13  ;;  %v4822_v58 = vld [vmem:[%s5046_s13 + $0x20] sm:$0xff] }
0x1e15   :  { %2625 = vperm.xlu2 %3370, %v2620_v20  }
0x1e16   :  { %2665 = vmatpush.msrb.mxu2 %v4816_v21 }
0x1e18   :  { %2666 = vmatpush.msrb.mxu2 %v4822_v58 }
0x1e1a   :  { %2667 = vmatpush.msrb.mxu2 %v4828_v15 }
0x1e1c   :  { %2668 = vmatpush.msrb.mxu2 %v4834_v22 }
0x1e1d   :  { %2708 = vrot.lane.b32.xlu2 %v2706_v9, %s3675_s30 }
0x1e1e   :  { %2669 = vmatpush.msrb.mxu2 %v4841_v52 }
0x1e20   :  { %2670 = vmatpush.msrb.mxu2 %v4846_v47 }
0x1e6f   :  { %v2626_v50 = vpop.permute.xlu2 %2625 }
0x1e70   :  { %3596 = vrcp.f32 %v2626_v50  ;;  %v2639_v56 = vand.u32 2147483648, %v2626_v50  ;;  %vm2633_vm6 = vweird.f32 %v2626_v50  ;;  %v2637_v4 = vand.u32 2147483647, %v2626_v50 }
0x1e72   :  { %v2640_v2 = vor.u32 1.1754944e-38, %v2639_v56  ;;  %vm2638_vm9 = vcmp.eq.f32.partialorder %v2637_v4, 8.507059e+37 }
0x1e76   :  { %v3597_v55 = vpop.eup %3596 }
0x1e77   :  { %v2629_v6 = vmul.f32 %v3597_v55, %v2626_v50  ;;  %vm2634_vm5 = vweird.f32 %v3597_v55  ;;  %v2709_v30 = vpop.permute.xlu2 %2708 }
0x1e78   :  { %vm2635_vm7 = vmor %vm2633_vm6, %vm2634_vm5 }
0x1e79   :  { %v2630_v23 = vsub.f32 1.0, %v2629_v6 }
0x1e7b   :  { %v2631_v8 = vmul.f32 %v3597_v55, %v2630_v23 }
0x1e7d   :  { %v2632_v0 = vadd.f32 %v3597_v55, %v2631_v8 }
0x1e7f   :  { %v2636_v34 = vsel %vm2635_vm7, %v3597_v55, %v2632_v0 }
0x1e80   :  { %v2641_v32 = vsel %vm2638_vm9, %v2640_v2, %v2636_v34 }
0x1e94   :  { %v2600_v59 = vpop.f32.mrf.mxu2 }
0x1e95   :  { %v4850_v61 = vmul.f32 %v2641_v32, %v2600_v59  ;;  %v3391_v59 = vld [vmem:[%s5043_s10] ss:$0 sm:$0xff] }
0x1e97   :  { %3332 = vmatmul.msk.f32.vlgmr.msrb.gmra.mxu2 %vm189_vm3, %v4850_v61 }
0x1f1a   :  { %v2672_v63 = vpop.f32.mrf.mxu2 }
0x1f1b   :  { %v2675_v38 = vadd.f32 %v2672_v63, %v4854_v62 }
0x1f1d   :  { %v2681_v7 = vadd.f32 %v2679_v45, %v2675_v38 }
0x1f1f   :  { %v3333_v18 = vmul.f32 -1.442695, %v2681_v7 }
0x1f21   :  { %3598 = vpow2.f32 %v3333_v18 }
0x1f27   :  { %v3599_v27 = vpop.eup %3598 }
0x1f28   :  { %v2685_v24 = vadd.f32 1.0, %v3599_v27 }
0x1f2a   :  { %3600 = vrcp.f32 %v2685_v24  ;;  %v2697_v10 = vand.u32 2147483648, %v2685_v24  ;;  %v2695_v54 = vand.u32 2147483647, %v2685_v24  ;;  %vm2691_vm11 = vweird.f32 %v2685_v24 }
0x1f2c   :  { %v2698_v14 = vor.u32 1.1754944e-38, %v2697_v10  ;;  %vm2696_vm8 = vcmp.eq.f32.partialorder %v2695_v54, 8.507059e+37 }
0x1f30   :  { %v3601_v17 = vpop.eup %3600 }
0x1f31   :  { %v2687_v12 = vmul.f32 %v3601_v17, %v2685_v24  ;;  %vm2692_vm10 = vweird.f32 %v3601_v17 }
0x1f32   :  { %vm2693_vm12 = vmor %vm2691_vm11, %vm2692_vm10 }
0x1f33   :  { %v2688_v29 = vsub.f32 1.0, %v2687_v12 }
0x1f35   :  { %v2689_v16 = vmul.f32 %v3601_v17, %v2688_v29 }
0x1f37   :  { %v2690_v26 = vadd.f32 %v3601_v17, %v2689_v16 }
0x1f39   :  { %v2694_v41 = vsel %vm2693_vm12, %v3601_v17, %v2690_v26 }
0x1f3a   :  { %v2699_v20 = vsel %vm2696_vm8, %v2698_v14, %v2694_v41 }
0x1f3b   :  { %v2711_v19 = vmul.f32 %v2709_v30, %v2699_v20  ;;  %v2718_v6 = vsub.f32 1.0, %v2699_v20  ;;  %v2724_v8 = vmul.f32 %v2699_v20, %v4734_v57 }
0x1f3d   :  { %2713 = vrot.lane.b32.xlu0 %v2711_v19, %s3671_s28 }
0x1faf   :  { %v2714_v9 = vpop.permute.xlu0 %2713 }
0x1fb0   :  { %v2716_v50 = vadd.f32 %v2714_v9, %v2675_v38 }
0x1fb2   :  { %3602 = vtanh.f32 %v2716_v50 }
0x1fb8   :  { %v3603_v55 = vpop.eup %3602 }
0x1fb9   :  { %2720 = vrot.lane.b32.xlu1 %v3603_v55, %s3680_s21 }
0x202b   :  { %v2721_v23 = vpop.permute.xlu1 %2720 }
0x202c   :  { %v2723_v0 = vmul.f32 %v2721_v23, %v2718_v6 }
0x202e   :  { %v4860_v56 = vadd.f32 %v2724_v8, %v2723_v0 }
0x2030   :  { %2727 = vrot.lane.b32.xlu2 %v4860_v56, %s3680_s21 }
0x208a   :  { %v2728_v4 = vpop.permute.xlu2 %2727 }
0x208b   :  { %2730 = vst.msk [vmem:[#allocation5 + $0x18] sm:$0xff] %vm81_vm1, %v2728_v4  ;;  %3334 = vmatmul.msk.f32.vlgmr.msrb.gmra.mxu1 %vm81_vm1, %v2728_v4 }
0x2108   :  { %v4866_v34 = vpop.f32.mrf.mxu1 }
0x2109   :  { %2784 = vmatpush.msra.mxu1 %v4866_v34 }
0x210a   :  { %3335 = vmatmul.msk.f32.vlgmr.msra.gmra.mxu1 %vm1249_vm13, %v4360_v60 }
0x2112   :  { %3336 = vmatmul.msk.f32.gmra.mxu1 %vm1249_vm13, %v4360_v60 }
0x211a   :  { %3337 = vmatmul.msk.f32.gmra.mxu1 %vm1249_vm13, %v4360_v60 }
0x2122   :  { %3338 = vmatmul.msk.f32.gmra.mxu1 %vm1249_vm13, %v4360_v60 }
0x212a   :  { %3339 = vmatmul.msk.f32.gmra.mxu1 %vm1249_vm13, %v4360_v60 }
0x2132   :  { %3340 = vmatmul.msk.f32.gmra.mxu1 %vm1249_vm13, %v4360_v60 }
0x213a   :  { %3341 = vmatmul.msk.f32.gmra.mxu1 %vm1249_vm13, %v4360_v60 }
0x2142   :  { %3342 = vmatmul.msk.f32.gmra.mxu1 %vm1249_vm13, %v4360_v60  ;;  %vm1635_vm13 = vcmask 785664  }
0x2187   :  { %v2786_v57 = vpop.f32.mrf.mxu1 }
0x2188   :  { %v2810_v2 = vadd.f32 %v2786_v57, %v4644_v5 }
0x218a   :  { %3604 = vtanh.f32 %v2810_v2 }
0x218f   :  { %v2789_v32 = vpop.f32.mrf.mxu1 }
0x2190   :  { %v3605_v63 = vpop.eup %3604  ;;  %v2811_v38 = vadd.f32 %v2789_v32, %v4650_v11 }
0x2191   :  { %v2830_v45 = vmul.f32 %v3605_v63, %v3391_v59 }
0x2192   :  { %3606 = vtanh.f32 %v2811_v38 }
0x2193   :  { %v2838_v7 = vsel %vm81_vm1, %v2830_v45, 0.0 }
0x2194   :  { %2839 = vadd.xlane.f32.xlu0 %v2838_v7 }
0x2197   :  { %v2792_v18 = vpop.f32.mrf.mxu1 }
0x2198   :  { %v3607_v27 = vpop.eup %3606  ;;  %v2812_v60 = vadd.f32 %v2792_v18, %v4654_v28 }
0x2199   :  { %v2831_v24 = vmul.f32 %v3607_v27, %v3391_v59 }
0x219a   :  { %3608 = vtanh.f32 %v2812_v60 }
0x219b   :  { %v2841_v5 = vsel %vm81_vm1, %v2831_v24, 0.0 }
0x219c   :  { %2842 = vadd.xlane.f32.xlu1 %v2841_v5 }
0x219f   :  { %v2795_v17 = vpop.f32.mrf.mxu1 }
0x21a0   :  { %v3609_v12 = vpop.eup %3608  ;;  %v2813_v29 = vadd.f32 %v2795_v17, %v4658_v42 }
0x21a1   :  { %v2832_v10 = vmul.f32 %v3609_v12, %v3391_v59 }
0x21a2   :  { %3610 = vtanh.f32 %v2813_v29 }
0x21a3   :  { %v2844_v11 = vsel %vm81_vm1, %v2832_v10, 0.0 }
0x21a4   :  { %2845 = vadd.xlane.f32.xlu2 %v2844_v11 }
0x21a7   :  { %v2798_v16 = vpop.f32.mrf.mxu1 }
0x21a8   :  { %v3611_v54 = vpop.eup %3610  ;;  %v2814_v26 = vadd.f32 %v2798_v16, %v4662_v46 }
0x21a9   :  { %v2833_v14 = vmul.f32 %v3611_v54, %v3391_v59 }
0x21aa   :  { %3612 = vtanh.f32 %v2814_v26 }
0x21ab   :  { %v2847_v28 = vsel %vm81_vm1, %v2833_v14, 0.0 }
0x21ac   :  { %2848 = vadd.xlane.f32.xlu0 %v2847_v28 }
0x21af   :  { %v2801_v41 = vpop.f32.mrf.mxu1 }
0x21b0   :  { %v3613_v30 = vpop.eup %3612  ;;  %v2815_v20 = vadd.f32 %v2801_v41, %v4666_v31 }
0x21b1   :  { %v2834_v19 = vmul.f32 %v3613_v30, %v3391_v59 }
0x21b2   :  { %3614 = vtanh.f32 %v2815_v20 }
0x21b3   :  { %v2850_v42 = vsel %vm81_vm1, %v2834_v19, 0.0 }
0x21b4   :  { %2851 = vadd.xlane.f32.xlu2 %v2850_v42 }
0x21b7   :  { %v2804_v9 = vpop.f32.mrf.mxu1 }
0x21b8   :  { %v3615_v50 = vpop.eup %3614  ;;  %v2816_v55 = vadd.f32 %v2804_v9, %v4670_v3 }
0x21b9   :  { %v2835_v6 = vmul.f32 %v3615_v50, %v3391_v59 }
0x21ba   :  { %3616 = vtanh.f32 %v2816_v55 }
0x21bb   :  { %v2853_v46 = vsel %vm81_vm1, %v2835_v6, 0.0 }
0x21bc   :  { %2854 = vadd.xlane.f32.xlu1 %v2853_v46 }
0x21bf   :  { %v2807_v23 = vpop.f32.mrf.mxu1 }
0x21c0   :  { %v3617_v8 = vpop.eup %3616  ;;  %v2817_v0 = vadd.f32 %v2807_v23, %v4674_v51 }
0x21c1   :  { %v2836_v4 = vmul.f32 %v3617_v8, %v3391_v59 }
0x21c2   :  { %3618 = vtanh.f32 %v2817_v0 }
0x21c3   :  { %v2856_v31 = vsel %vm81_vm1, %v2836_v4, 0.0 }
0x21c4   :  { %2857 = vadd.xlane.f32.xlu0 %v2856_v31 }
0x21c8   :  { %v3619_v57 = vpop.eup %3618 }
0x21c9   :  { %v2837_v2 = vmul.f32 %v3619_v57, %v3391_v59 }
0x21cb   :  { %v2859_v32 = vsel %vm81_vm1, %v2837_v2, 0.0 }
0x21cc   :  { %2860 = vadd.xlane.f32.xlu2 %v2859_v32  ;;  %v3392_v32 = vld [vmem:[%s5047_s14] ss:$0 sm:$0xff] }
0x2207   :  { %v2840_v3 = vpop.xlane.xlu0 %2839 }
0x220f   :  { %v2843_v38 = vpop.xlane.xlu1 %2842 }
0x2210   :  { %v2862_v7 = vmax.f32 %v2840_v3, %v2843_v38 }
0x2217   :  { %v2846_v63 = vpop.xlane.xlu2 %2845 }
0x2218   :  { %v2863_v18 = vmax.f32 %v2862_v7, %v2846_v63 }
0x221f   :  { %v2849_v45 = vpop.xlane.xlu0 %2848 }
0x2220   :  { %v2864_v60 = vmax.f32 %v2863_v18, %v2849_v45 }
0x2227   :  { %v2852_v27 = vpop.xlane.xlu2 %2851 }
0x2228   :  { %v2865_v51 = vmax.f32 %v2864_v60, %v2852_v27 }
0x222f   :  { %v2855_v24 = vpop.xlane.xlu1 %2854 }
0x2230   :  { %v2866_v17 = vmax.f32 %v2865_v51, %v2855_v24 }
0x2237   :  { %v2858_v5 = vpop.xlane.xlu0 %2857 }
0x2238   :  { %v2867_v12 = vmax.f32 %v2866_v17, %v2858_v5 }
0x223f   :  { %v2861_v29 = vpop.xlane.xlu2 %2860 }
0x2240   :  { %v2868_v10 = vmax.f32 %v2867_v12, %v2861_v29 }
0x2242   :  { %v2876_v11 = vsub.f32 %v2861_v29, %v2868_v10  ;;  %v2875_v59 = vsub.f32 %v2858_v5, %v2868_v10  ;;  %v2874_v16 = vsub.f32 %v2855_v24, %v2868_v10  ;;  %v2873_v28 = vsub.f32 %v2852_v27, %v2868_v10 }
0x2243   :  { %v2872_v41 = vsub.f32 %v2849_v45, %v2868_v10  ;;  %v2871_v20 = vsub.f32 %v2846_v63, %v2868_v10  ;;  %v2870_v42 = vsub.f32 %v2843_v38, %v2868_v10  ;;  %v2869_v55 = vsub.f32 %v2840_v3, %v2868_v10 }
0x2244   :  { %v2891_v54 = vmul.f32 1.442695, %v2876_v11  ;;  %v2889_v26 = vmul.f32 1.442695, %v2875_v59  ;;  %v2887_v14 = vmul.f32 1.442695, %v2874_v16 }
0x2245   :  { %v2885_v30 = vmul.f32 1.442695, %v2873_v28  ;;  %v2883_v19 = vmul.f32 1.442695, %v2872_v41  ;;  %v2881_v50 = vmul.f32 1.442695, %v2871_v20 }
0x2246   :  { %3620 = vpow2.f32 %v2891_v54  ;;  %v2879_v23 = vmul.f32 1.442695, %v2870_v42  ;;  %v2877_v8 = vmul.f32 1.442695, %v2869_v55 }
0x2247   :  { %3622 = vpow2.f32 %v2889_v26 }
0x2248   :  { %3624 = vpow2.f32 %v2887_v14 }
0x2249   :  { %3626 = vpow2.f32 %v2885_v30 }
0x224a   :  { %3628 = vpow2.f32 %v2883_v19 }
0x224b   :  { %3630 = vpow2.f32 %v2881_v50  ;;  %v3009_v50 = vld [vmem:[#allocation3 + $0x20] sm:$0xff] }
0x224c   :  { %v3621_v9 = vpop.eup %3620  ;;  %3632 = vpow2.f32 %v2879_v23  ;;  %v4982_v23 = vld [vmem:[%s5049_s16] ss:$0 sm:$0xff] }
0x224d   :  { %v3623_v6 = vpop.eup %3622  ;;  %2938 = vperm.xlu1 %3371, %v3621_v9   ;;  %2977 = vmatpush.msra.mxu2 %v3621_v9  ;;  %3634 = vpow2.f32 %v2877_v8 }
0x224e   :  { %v3625_v46 = vpop.eup %3624  ;;  %2933 = vperm.xlu0 %3372, %v3623_v6  }
0x224f   :  { %2928 = vperm.xlu2 %3370, %v3625_v46   ;;  %2978 = vmatpush.msra.mxu2 %v3623_v6  ;;  %v3627_v0 = vpop.eup %3626 }
0x2250   :  { %v3629_v4 = vpop.eup %3628 }
0x2251   :  { %2979 = vmatpush.msra.mxu2 %v3625_v46  ;;  %v3631_v31 = vpop.eup %3630 }
0x2252   :  { %v3633_v57 = vpop.eup %3632 }
0x2253   :  { %2980 = vmatpush.msra.mxu2 %v3627_v0  ;;  %v3635_v2 = vpop.eup %3634 }
0x2255   :  { %2918 = vperm.xlu1 %3371, %v3629_v4   ;;  %2981 = vmatpush.msra.mxu2 %v3629_v4 }
0x2256   :  { %2923 = vperm.xlu0 %3372, %v3627_v0  }
0x2257   :  { %2913 = vperm.xlu2 %3370, %v3631_v31   ;;  %2982 = vmatpush.msra.mxu2 %v3631_v31 }
0x2259   :  { %2983 = vmatpush.msra.mxu2 %v3633_v57 }
0x225b   :  { %2984 = vmatpush.msra.mxu2 %v3635_v2 }
0x225c   :  { %3344 = vmatmul.msk.f32.vlgmr.msra.gmra.mxu2 %vm189_vm3, %v4433_v39 }
0x225d   :  { %2903 = vperm.xlu1 %3371, %v3635_v2  }
0x225e   :  { %2908 = vperm.xlu0 %3372, %v3633_v57  }
0x2265   :  { %3044 = vrot.lane.b32.xlu1 %v4866_v34, %s3680_s21 }
0x2266   :  { %3069 = vrot.lane.b32.xlu0 %v3392_v32, %s3680_s21 }
0x22a9   :  { %v2929_v63 = vpop.permute.xlu2 %2928 }
0x22aa   :  { %v2946_v18 = vmul.f32 %v2929_v63, %v4697_v43 }
0x22b1   :  { %v2914_v51 = vpop.permute.xlu2 %2913 }
0x22b2   :  { %v2943_v17 = vmul.f32 %v2914_v51, %v4706_v49  ;;  %v3118_v49 = vld [vmem:[#allocation3] sm:$0xff] }
0x22bf   :  { %v2939_v3 = vpop.permute.xlu1 %2938 }
0x22c0   :  { %v2948_v38 = vmul.f32 %v2939_v3, %v4691_v36  ;;  %v2934_v45 = vpop.permute.xlu0 %2933 }
0x22c1   :  { %v2947_v7 = vmul.f32 %v2934_v45, %v4694_v37 }
0x22c2   :  { %2957 = vmatpush.msrb.mxu0 %v2948_v38 }
0x22c4   :  { %2958 = vmatpush.msrb.mxu0 %v2947_v7 }
0x22c6   :  { %2959 = vmatpush.msrb.mxu0 %v2946_v18 }
0x22c7   :  { %v2919_v27 = vpop.permute.xlu1 %2918 }
0x22c8   :  { %v2924_v60 = vpop.permute.xlu0 %2923  ;;  %v2944_v5 = vmul.f32 %v2919_v27, %v4703_v48 }
0x22c9   :  { %v2945_v24 = vmul.f32 %v2924_v60, %v4700_v25 }
0x22cb   :  { %2960 = vmatpush.msrb.mxu0 %v2945_v24 }
0x22cd   :  { %2961 = vmatpush.msrb.mxu0 %v2944_v5 }
0x22cf   :  { %2962 = vmatpush.msrb.mxu0 %v2943_v17  ;;  %v2904_v12 = vpop.permute.xlu1 %2903 }
0x22d0   :  { %v2909_v36 = vpop.permute.xlu0 %2908  ;;  %v2941_v43 = vmul.f32 %v2904_v12, %v4712_v1  ;;  %v3116_v1 = vld [vmem:[%s5048_s15 + $0x50] sm:$0xff] }
0x22d1   :  { %v2942_v37 = vmul.f32 %v2909_v36, %v4709_v53  ;;  %v3117_v53 = vld [vmem:[%s5048_s15 + $0x58] sm:$0xff] }
0x22d2   :  { %3163 = vmatpush.msrb.mxu3 %v3117_v53 }
0x22d3   :  { %2963 = vmatpush.msrb.mxu0 %v2942_v37 }
0x22d4   :  { %3164 = vmatpush.msrb.mxu3 %v3116_v1 }
0x22d5   :  { %2964 = vmatpush.msrb.mxu0 %v2941_v43 }
0x22d6   :  { %3343 = vmatmul.msk.f32.vlgmr.msrb.gmra.mxu0 %vm189_vm3, %v4433_v39 }
0x22d7   :  { %3029 = vmatpush.msra.mxu0 %v4805_v40  ;;  %v3114_v40 = vld [vmem:[%s5048_s15 + $0x40] sm:$0xff]  ;;  %v3045_v46 = vpop.permute.xlu1 %3044 }
0x22d8   :  { %v3070_v48 = vpop.permute.xlu0 %3069 }
0x22d9   :  { %3030 = vmatpush.msra.mxu0 %v4810_v13  ;;  %v3072_v39 = vadd.f32 %v3070_v48, %v4866_v34  ;;  %v3113_v13 = vld [vmem:[%s5048_s15 + $0x38] sm:$0xff]  ;;  %v3120_v48 = vld [vmem:[#allocation3 + $0x10] sm:$0xff] }
0x22db   :  { %3031 = vmatpush.msra.mxu0 %v4816_v21  ;;  %v3112_v21 = vld [vmem:[%s5048_s15 + $0x30] sm:$0xff] }
0x22dd   :  { %3032 = vmatpush.msra.mxu0 %v4822_v58  ;;  %v3111_v58 = vld [vmem:[%s5048_s15 + $0x28] sm:$0xff] }
0x22df   :  { %v2986_v25 = vpop.f32.mrf.mxu2  ;;  %3033 = vmatpush.msra.mxu0 %v4828_v15  ;;  %v3110_v15 = vld [vmem:[%s5048_s15 + $0x20] sm:$0xff] }
0x22e0   :  { %2991 = vperm.xlu2 %3370, %v2986_v25  }
0x22e1   :  { %3034 = vmatpush.msra.mxu0 %v4834_v22  ;;  %v3109_v22 = vld [vmem:[%s5048_s15 + $0x18] sm:$0xff] }
0x22e3   :  { %3035 = vmatpush.msra.mxu0 %v4841_v52  ;;  %v3108_v52 = vld [vmem:[%s5048_s15 + $0x10] sm:$0xff] }
0x22e5   :  { %3036 = vmatpush.msra.mxu0 %v4846_v47  ;;  %v3107_v47 = vld [vmem:[%s5048_s15 + $0x8] sm:$0xff] }
0x22e8   :  { %3074 = vrot.lane.b32.xlu2 %v3072_v39, %s3675_s30 }
0x22f0   :  { %1632 = vrot.lane.b32.xlu2 %v4517_v33, %s3675_s30  ;;  %v3115_v33 = vld [vmem:[%s5048_s15 + $0x48] sm:$0xff] }
0x22f1   :  { %3165 = vmatpush.msrb.mxu3 %v3115_v33 }
0x22f3   :  { %3166 = vmatpush.msrb.mxu3 %v3114_v40  ;;  %v3119_v40 = vld [vmem:[#allocation3 + $0x8] sm:$0xff] }
0x22f5   :  { %3167 = vmatpush.msrb.mxu3 %v3113_v13 }
0x22f7   :  { %3168 = vmatpush.msrb.mxu3 %v3112_v21 }
0x22f8   :  { %2731 = vrot.lane.b32.xlu2 %v4850_v61, %s3675_s30  ;;  %v3106_v61 = vld [vmem:[%s5048_s15] sm:$0xff] }
0x22f9   :  { %3169 = vmatpush.msrb.mxu3 %v3111_v58 }
0x22fb   :  { %3170 = vmatpush.msrb.mxu3 %v3110_v15 }
0x22fd   :  { %3171 = vmatpush.msrb.mxu3 %v3109_v22 }
0x22ff   :  { %3172 = vmatpush.msrb.mxu3 %v3108_v52 }
0x2300   :  { %3128 = vrot.lane.b32.xlu2 %v3118_v49, %s3675_s30 }
0x2301   :  { %3173 = vmatpush.msrb.mxu3 %v3107_v47 }
0x2303   :  { %3174 = vmatpush.msrb.mxu3 %v3106_v61 }
0x2308   :  { %3134 = vrot.lane.b32.xlu2 %v4854_v62, %s3675_s30 }
0x233a   :  { %v2992_v62 = vpop.permute.xlu2 %2991 }
0x233b   :  { %3636 = vrcp.f32 %v2992_v62  ;;  %v3005_v26 = vand.u32 2147483648, %v2992_v62  ;;  %vm2999_vm15 = vweird.f32 %v2992_v62  ;;  %v3003_v14 = vand.u32 2147483647, %v2992_v62 }
0x233d   :  { %v3006_v41 = vor.u32 1.1754944e-38, %v3005_v26  ;;  %vm3004_vm5 = vcmp.eq.f32.partialorder %v3003_v14, 8.507059e+37 }
0x2341   :  { %v3637_v34 = vpop.eup %3636 }
0x2342   :  { %v2995_v29 = vmul.f32 %v3637_v34, %v2992_v62  ;;  %v3075_v10 = vpop.permute.xlu2 %3074  ;;  %vm3000_vm14 = vweird.f32 %v3637_v34 }
0x2343   :  { %vm3001_vm2 = vmor %vm2999_vm15, %vm3000_vm14 }
0x2344   :  { %v2996_v11 = vsub.f32 1.0, %v2995_v29 }
0x2346   :  { %v2997_v59 = vmul.f32 %v3637_v34, %v2996_v11 }
0x2348   :  { %v2998_v54 = vadd.f32 %v3637_v34, %v2997_v59 }
0x234a   :  { %v1633_v16 = vpop.permute.xlu2 %1632  ;;  %v3002_v28 = vsel %vm3001_vm2, %v3637_v34, %v2998_v54 }
0x234b   :  { %1636 = vst.msk [vmem:[#allocation5] sm:$0xff] %vm1635_vm13, %v1633_v16  ;;  %v3007_v42 = vsel %vm3004_vm5, %v3006_v41, %v3002_v28 }
0x2352   :  { %v2732_v30 = vpop.permute.xlu2 %2731  ;;  %v3101_v20 = vld [vmem:[#allocation5] sm:$0xff] }
0x2353   :  { %v2966_v19 = vpop.f32.mrf.mxu0  ;;  %2734 = vst.msk [vmem:[#allocation5 + $0x18] sm:$0xff] %vm1635_vm13, %v2732_v30  ;;  %3347 = vmatmul.msk.f32.vlgmr.msrb.gmra.mxu3 %vm3143_vm4, %v3101_v20 }
0x2354   :  { %v3008_v9 = vmul.f32 %v3007_v42, %v2966_v19 }
0x2356   :  { %3345 = vmatmul.msk.f32.vlgmr.msra.gmra.mxu0 %vm189_vm3, %v3008_v9 }
0x235a   :  { %v3129_v8 = vpop.permute.xlu2 %3128  ;;  %v3104_v13 = vld [vmem:[#allocation5 + $0x18] sm:$0xff] }
0x23d3   :  { %v3038_v55 = vpop.f32.mrf.mxu0 }
0x23d4   :  { %v3041_v6 = vadd.f32 %v3038_v55, %v3009_v50 }
0x23d6   :  { %v3047_v0 = vadd.f32 %v3045_v46, %v3041_v6  ;;  %v3176_v4 = vpop.f32.mrf.mxu3 }
0x23d7   :  { %v3177_v31 = vadd.f32 %v3176_v4, %v3129_v8 }
0x23d8   :  { %v3346_v57 = vmul.f32 -1.442695, %v3047_v0 }
0x23d9   :  { %v3195_v2 = vadd.f32 %v4982_v23, %v3177_v31 }
0x23da   :  { %3638 = vpow2.f32 %v3346_v57 }
0x23db   :  { %3201 = vst.msk [vmem:[%s5051_s18 + $0x8] sm:$0xff] %vm217_vm0, %v3195_v2 }
0x23e0   :  { %v3639_v32 = vpop.eup %3638 }
0x23e1   :  { %v3051_v3 = vadd.f32 1.0, %v3639_v32 }
0x23e3   :  { %3640 = vrcp.f32 %v3051_v3  ;;  %v3063_v7 = vand.u32 2147483648, %v3051_v3  ;;  %v3061_v27 = vand.u32 2147483647, %v3051_v3  ;;  %vm3057_vm6 = vweird.f32 %v3051_v3 }
0x23e5   :  { %v3064_v24 = vor.u32 1.1754944e-38, %v3063_v7  ;;  %vm3062_vm9 = vcmp.eq.f32.partialorder %v3061_v27, 8.507059e+37 }
0x23e9   :  { %v3641_v63 = vpop.eup %3640 }
0x23ea   :  { %v3053_v38 = vmul.f32 %v3641_v63, %v3051_v3  ;;  %vm3058_vm3 = vweird.f32 %v3641_v63 }
0x23eb   :  { %vm3059_vm7 = vmor %vm3057_vm6, %vm3058_vm3 }
0x23ec   :  { %v3054_v45 = vsub.f32 1.0, %v3053_v38 }
0x23ee   :  { %v3055_v18 = vmul.f32 %v3641_v63, %v3054_v45 }
0x23f0   :  { %v3056_v60 = vadd.f32 %v3641_v63, %v3055_v18 }
0x23f2   :  { %v3060_v51 = vsel %vm3059_vm7, %v3641_v63, %v3056_v60 }
0x23f3   :  { %v3065_v5 = vsel %vm3062_vm9, %v3064_v24, %v3060_v51 }
0x23f4   :  { %v3077_v17 = vmul.f32 %v3075_v10, %v3065_v5  ;;  %v3090_v49 = vmul.f32 %v3065_v5, %v4860_v56  ;;  %v3135_v10 = vpop.permute.xlu2 %3134 }
0x23f6   :  { %3079 = vrot.lane.b32.xlu0 %v3077_v17, %s3671_s28 }
0x23fe   :  { %1999 = vrot.lane.b32.xlu0 %v4588_v44, %s3675_s30  ;;  %v3084_v44 = vsub.f32 1.0, %v3065_v5 }
0x2468   :  { %v3080_v36 = vpop.permute.xlu0 %3079 }
0x2469   :  { %v3082_v12 = vadd.f32 %v3080_v36, %v3041_v6 }
0x246b   :  { %3642 = vtanh.f32 %v3082_v12 }
0x2470   :  { %v2000_v37 = vpop.permute.xlu0 %1999 }
0x2471   :  { %v3643_v43 = vpop.eup %3642  ;;  %2002 = vst.msk [vmem:[#allocation5 + $0x8] sm:$0xff] %vm1635_vm13, %v2000_v37 }
0x2472   :  { %3086 = vrot.lane.b32.xlu1 %v3643_v43, %s3680_s21 }
0x2478   :  { %v3102_v25 = vld [vmem:[#allocation5 + $0x8] sm:$0xff] }
0x2479   :  { %3348 = vmatmul.msk.f32.gmra.mxu3 %vm3143_vm4, %v3102_v25 }
0x247a   :  { %2365 = vrot.lane.b32.xlu1 %v4727_v35, %s3675_s30 }
0x2482   :  { %3097 = vrot.lane.b32.xlu1 %v3008_v9, %s3675_s30 }
0x248a   :  { %3132 = vrot.lane.b32.xlu1 %v3120_v48, %s3675_s30 }
0x24e4   :  { %v3087_v39 = vpop.permute.xlu1 %3086 }
0x24e5   :  { %v3089_v53 = vmul.f32 %v3087_v39, %v3084_v44 }
0x24e7   :  { %v3091_v1 = vadd.f32 %v3090_v49, %v3089_v53 }
0x24e9   :  { %3093 = vrot.lane.b32.xlu0 %v3091_v1, %s3680_s21 }
0x24ec   :  { %v2366_v33 = vpop.permute.xlu1 %2365 }
0x24ed   :  { %2368 = vst.msk [vmem:[#allocation5 + $0x10] sm:$0xff] %vm1635_vm13, %v2366_v33 }
0x24f1   :  { %3130 = vrot.lane.b32.xlu0 %v3119_v40, %s3675_s30 }
0x24f4   :  { %v3103_v35 = vld [vmem:[#allocation5 + $0x10] sm:$0xff]  ;;  %v3098_v56 = vpop.permute.xlu1 %3097 }
0x24f5   :  { %3349 = vmatmul.msk.f32.gmra.mxu3 %vm3143_vm4, %v3103_v35 }
0x24f9   :  { %3136 = vrot.lane.b32.xlu0 %v3009_v50, %s3675_s30 }
0x24fc   :  { %v3179_v58 = vpop.f32.mrf.mxu3  ;;  %v3133_v61 = vpop.permute.xlu1 %3132 }
0x24fd   :  { %3350 = vmatmul.msk.f32.gmra.mxu3 %vm3143_vm4, %v3104_v13 }
0x255b   :  { %v3094_v21 = vpop.permute.xlu0 %3093 }
0x255c   :  { %3096 = vst.msk [vmem:[#allocation5 + $0x20] sm:$0xff] %vm81_vm1, %v3094_v21 }
0x255d   :  { %3100 = vst.msk [vmem:[#allocation5 + $0x20] sm:$0xff] %vm1635_vm13, %v3098_v56 }
0x2563   :  { %v3131_v15 = vpop.permute.xlu0 %3130 }
0x2564   :  { %v3180_v22 = vadd.f32 %v3179_v58, %v3131_v15  ;;  %v3105_v52 = vld [vmem:[#allocation5 + $0x20] sm:$0xff] }
0x2565   :  { %3351 = vmatmul.msk.f32.gmra.mxu3 %vm3143_vm4, %v3105_v52 }
0x2566   :  { %v3196_v47 = vadd.f32 %v4982_v23, %v3180_v22 }
0x2568   :  { %3202 = vst.msk [vmem:[%s5051_s18 + $0x10] sm:$0xff] %vm217_vm0, %v3196_v47 }
0x256b   :  { %v3137_v54 = vpop.permute.xlu0 %3136 }
0x2578   :  { %v3182_v62 = vpop.f32.mrf.mxu3 }
0x2579   :  { %v3183_v34 = vadd.f32 %v3182_v62, %v3133_v61 }
0x257b   :  { %v3197_v29 = vadd.f32 %v4982_v23, %v3183_v34 }
0x257d   :  { %3203 = vst.msk [vmem:[%s5051_s18 + $0x18] sm:$0xff] %vm217_vm0, %v3197_v29 }
0x2580   :  { %v3185_v11 = vpop.f32.mrf.mxu3 }
0x2581   :  { %v3186_v59 = vadd.f32 %v3185_v11, %v3135_v10 }
0x2583   :  { %v3198_v16 = vadd.f32 %v4982_v23, %v3186_v59 }
0x2585   :  { %3204 = vst.msk [vmem:[%s5051_s18 + $0x20] sm:$0xff] %vm217_vm0, %v3198_v16 }
0x25e8   :  { %v3188_v26 = vpop.f32.mrf.mxu3 }
0x25e9   :  { %v3189_v14 = vadd.f32 %v3188_v26, %v3137_v54 }
0x25eb   :  { %v3199_v28 = vadd.f32 %v4982_v23, %v3189_v14 }
0x25ed   :  { %3205 = vst.msk [vmem:[%s5051_s18 + $0x28] sm:$0xff] %vm217_vm0, %v3199_v28 }
0x25ee   :  { %3668 = dma.done.wait [#allocation7], 1024  }
0x25ef   :  { %3669 = vsyncadd [#allocation7], 4294966272 }
0x25f0   :  { %3227 = vsyncpa [#allocation7], 1 }

</bundles_post_ra>
